<compile_context>
chip_gen: v7x
topology: tpu7x:2x2x1
jax: 0.10.0
libtpu: 0.0.40
codegen_flags: <defaults>
</compile_context>

<pallas_src>
import functools
import math

import jax
import jax.numpy as jnp
from jax.experimental import pallas as pl
from jax.experimental.pallas import tpu as pltpu


# ----------------------------------------------------------------------------
# Fused forward kernel
# ----------------------------------------------------------------------------
def _fused_forward_kernel(
    x_ref, pe_ref, win_ref, bin_ref,
    wqkv_ref, bqkv_ref, wout_ref, bout_ref,
    ln1g_ref, ln1b_ref, wff1_ref, bff1_ref, wff2_ref, bff2_ref,
    ln2g_ref, ln2b_ref,
    w1_ref, b1_ref, w2_ref, b2_ref,
    o_ref,
    attn_scr,
    *, B, S, D, H, num_layers, eps,
):
    T = B * S
    Dh = D // H
    scale = 1.0 / math.sqrt(Dh)
    bf16 = jnp.bfloat16

    # ---- input projection + positional encoding (PE broadcast in-kernel) ----
    x = x_ref[...]                                                    # (T, F) f32
    h = jnp.dot(x.astype(bf16), win_ref[...],
                preferred_element_type=jnp.float32) + bin_ref[...]    # (T, D) f32
    pe = pe_ref[...]                                                  # (S, D) f32
    h = (h.reshape(B, S, D) + pe[None, :, :]).reshape(T, D)

    # Attention validity mask (batch_first=False semantics): row r=(b, s) may
    # only attend to rows with the same s (attention runs over the b axis).
    row_s = jax.lax.broadcasted_iota(jnp.int32, (T, T), 0) % S
    col_s = jax.lax.broadcasted_iota(jnp.int32, (T, T), 1) % S
    valid = row_s == col_s

    def layer_norm(y, g, b):
        mu = jnp.mean(y, axis=-1, keepdims=True)
        var = jnp.mean(jnp.square(y - mu), axis=-1, keepdims=True)
        return (y - mu) * jax.lax.rsqrt(var + eps) * g + b

    for l in range(num_layers):
        # --- multi-head self-attention (post-norm, packed QKV) ---------------
        qkv = jnp.dot(h.astype(bf16), wqkv_ref[l],
                      preferred_element_type=jnp.float32) + bqkv_ref[l]   # (T, 3D)
        for hh in range(H):
            q = qkv[:, hh * Dh:(hh + 1) * Dh]                  # (T, Dh)
            k = qkv[:, D + hh * Dh:D + (hh + 1) * Dh]
            v = qkv[:, 2 * D + hh * Dh:2 * D + (hh + 1) * Dh]
            s = jax.lax.dot_general(q, k, (((1,), (1,)), ((), ())),
                                    preferred_element_type=jnp.float32) * scale
            s = jnp.where(valid, s, -1e30)
            s = s - jnp.max(s, axis=-1, keepdims=True)
            p = jnp.exp(s)
            p = p * pl.reciprocal(jnp.sum(p, axis=-1, keepdims=True), approx=True)
            attn_scr[:, hh * Dh:(hh + 1) * Dh] = jnp.dot(
                p, v, preferred_element_type=jnp.float32)
        attn = jnp.dot(attn_scr[...].astype(bf16), wout_ref[l],
                       preferred_element_type=jnp.float32) + bout_ref[l]
        h = layer_norm(h + attn, ln1g_ref[l], ln1b_ref[l])

        # --- feed-forward -----------------------------------------------------
        ff = jnp.dot(h.astype(bf16), wff1_ref[l],
                     preferred_element_type=jnp.float32) + bff1_ref[l]
        ff = jnp.maximum(ff, 0.0)
        ff = jnp.dot(ff.astype(bf16), wff2_ref[l],
                     preferred_element_type=jnp.float32) + bff2_ref[l]
        h = layer_norm(h + ff, ln2g_ref[l], ln2b_ref[l])

    # ---- mean over dim=1 (S) + classifier ------------------------------------
    pooled = jnp.mean(h.reshape(B, S, D), axis=1)                    # (B, D)
    z = jnp.dot(pooled.astype(bf16), w1_ref[...],
                preferred_element_type=jnp.float32) + b1_ref[...]    # (B, 64)
    z = jnp.maximum(z, 0.0)
    w2 = w2_ref[...]                                                 # (out_dim, 64)
    if w2.shape[0] == 1:
        # N=1 output: VPU multiply + lane reduce instead of wasting the MXU.
        out = jnp.sum(z * w2, axis=-1, keepdims=True) + b2_ref[...]
    else:
        out = jax.lax.dot_general(z, w2, (((1,), (1,)), ((), ())),
                                  preferred_element_type=jnp.float32) + b2_ref[...]
    o_ref[...] = out.astype(o_ref.dtype)


# ----------------------------------------------------------------------------
# Model glue (plain JAX: parameter setup + packing; no HBM activation traffic)
# ----------------------------------------------------------------------------
def positional_encoding(seq_len, d_model, max_len=500):
    position = jnp.arange(max_len, dtype=jnp.float32)[:, None]
    div_term = jnp.exp(jnp.arange(0, d_model, 2, dtype=jnp.float32)
                       * (-math.log(10000.0) / d_model))
    pe = jnp.zeros((max_len, d_model), dtype=jnp.float32)
    pe = pe.at[:, 0::2].set(jnp.sin(position * div_term))
    pe = pe.at[:, 1::2].set(jnp.cos(position * div_term))
    return pe[:seq_len]


def init_params(key, input_dim, model_dim=128, nhead=4, num_layers=2,
                output_dim=1, dim_feedforward=2048):
    def lin(k, out_f, in_f):
        kw, kb = jax.random.split(k)
        bound = 1.0 / math.sqrt(in_f)
        w = jax.random.uniform(kw, (out_f, in_f), jnp.float32, -bound, bound)
        b = jax.random.uniform(kb, (out_f,), jnp.float32, -bound, bound)
        return w, b

    keys = jax.random.split(key, 3 + num_layers)
    p = {}
    p["in_proj_w"], p["in_proj_b"] = lin(keys[0], model_dim, input_dim)
    layers = []
    for l in range(num_layers):
        lk = jax.random.split(keys[1 + l], 4)
        qkv_w, qkv_b = lin(lk[0], 3 * model_dim, model_dim)
        out_w, out_b = lin(lk[1], model_dim, model_dim)
        ff1_w, ff1_b = lin(lk[2], dim_feedforward, model_dim)
        ff2_w, ff2_b = lin(lk[3], model_dim, dim_feedforward)
        layers.append(dict(
            qkv_w=qkv_w, qkv_b=qkv_b, out_w=out_w, out_b=out_b,
            ff1_w=ff1_w, ff1_b=ff1_b, ff2_w=ff2_w, ff2_b=ff2_b,
            ln1_g=jnp.ones((model_dim,), jnp.float32),
            ln1_b=jnp.zeros((model_dim,), jnp.float32),
            ln2_g=jnp.ones((model_dim,), jnp.float32),
            ln2_b=jnp.zeros((model_dim,), jnp.float32),
        ))
    p["layers"] = layers
    p["fc1_w"], p["fc1_b"] = lin(keys[1 + num_layers], 64, model_dim)
    p["fc2_w"], p["fc2_b"] = lin(keys[2 + num_layers], output_dim, 64)
    return p


def survival_transformer_forward(x, params, *, model_dim=128, nhead=4):
    B, S, F = x.shape
    D = model_dim
    T = B * S
    layers = params["layers"]
    num_layers = len(layers)
    output_dim = params["fc2_w"].shape[0]

    f32, bf16 = jnp.float32, jnp.bfloat16
    pe = positional_encoding(S, D)                                   # (S, D) f32

    def stack_w(name):  # (L, in, out) bf16, pre-transposed for x @ w
        return jnp.stack([lp[name].T.astype(bf16) for lp in layers])

    def stack_v(name):  # (L, 1, out) f32 (biases / LN params)
        return jnp.stack([lp[name].reshape(1, -1).astype(f32) for lp in layers])

    operands = [
        x.reshape(T, F).astype(f32),
        pe,
        params["in_proj_w"].T.astype(bf16),                 # (F, D)
        params["in_proj_b"].reshape(1, D).astype(f32),
        stack_w("qkv_w"), stack_v("qkv_b"),
        stack_w("out_w"), stack_v("out_b"),
        stack_v("ln1_g"), stack_v("ln1_b"),
        stack_w("ff1_w"), stack_v("ff1_b"),
        stack_w("ff2_w"), stack_v("ff2_b"),
        stack_v("ln2_g"), stack_v("ln2_b"),
        params["fc1_w"].T.astype(bf16),                     # (D, 64)
        params["fc1_b"].reshape(1, -1).astype(f32),         # (1, 64)
        params["fc2_w"].astype(f32),                        # (out_dim, 64) -- VPU path
        params["fc2_b"].reshape(1, -1).astype(f32),         # (1, out_dim)
    ]

    def full_spec(a):
        return pl.BlockSpec(a.shape, lambda *_, n=a.ndim: (0,) * n)

    return pl.pallas_call(
        functools.partial(_fused_forward_kernel, B=B, S=S, D=D, H=nhead,
                          num_layers=num_layers, eps=1e-5),
        out_shape=jax.ShapeDtypeStruct((B, output_dim), f32),
        in_specs=[full_spec(a) for a in operands],
        out_specs=pl.BlockSpec((B, output_dim), lambda *_: (0, 0)),
        scratch_shapes=[pltpu.VMEM((T, D), f32)],
    )(*operands)


if __name__ == "__main__":
    key = jax.random.PRNGKey(0)
    kx, kp = jax.random.split(key)

    B, S, F = 2, 8, 16
    model_dim, nhead, num_layers, output_dim = 128, 4, 2, 1

    x = jax.random.normal(kx, (B, S, F), jnp.float32)
    params = init_params(kp, F, model_dim, nhead, num_layers, output_dim)

    fwd = jax.jit(functools.partial(survival_transformer_forward,
                                    model_dim=model_dim, nhead=nhead))
    out = fwd(x, params)
    jax.block_until_ready(out)
    assert out.shape == (B, output_dim)
    print("KERNEL_OK")
</pallas_src>

<mosaic_0001>
module attributes {stable_mosaic.version = 11 : i64} {
  func.func @_fused_forward_kernel(%arg0: memref<16x16xf32, #tpu.memory_space<vmem>>, %arg1: memref<8x128xf32, #tpu.memory_space<vmem>>, %arg2: memref<16x128xbf16, #tpu.memory_space<vmem>>, %arg3: memref<1x128xf32, #tpu.memory_space<vmem>>, %arg4: memref<2x128x384xbf16, #tpu.memory_space<vmem>>, %arg5: memref<2x1x384xf32, #tpu.memory_space<vmem>>, %arg6: memref<2x128x128xbf16, #tpu.memory_space<vmem>>, %arg7: memref<2x1x128xf32, #tpu.memory_space<vmem>>, %arg8: memref<2x1x128xf32, #tpu.memory_space<vmem>>, %arg9: memref<2x1x128xf32, #tpu.memory_space<vmem>>, %arg10: memref<2x128x2048xbf16, #tpu.memory_space<vmem>>, %arg11: memref<2x1x2048xf32, #tpu.memory_space<vmem>>, %arg12: memref<2x2048x128xbf16, #tpu.memory_space<vmem>>, %arg13: memref<2x1x128xf32, #tpu.memory_space<vmem>>, %arg14: memref<2x1x128xf32, #tpu.memory_space<vmem>>, %arg15: memref<2x1x128xf32, #tpu.memory_space<vmem>>, %arg16: memref<128x64xbf16, #tpu.memory_space<vmem>>, %arg17: memref<1x64xf32, #tpu.memory_space<vmem>>, %arg18: memref<1x64xf32, #tpu.memory_space<vmem>>, %arg19: memref<1x1xf32, #tpu.memory_space<vmem>>, %arg20: memref<2x1xf32, #tpu.memory_space<vmem>>, %arg21: memref<16x128xf32, #tpu.memory_space<vmem>>) attributes {dimension_semantics = [], scalar_prefetch = 0 : i64, scratch_operands = 1 : i64, tpu.core_type = #tpu.core_type<tc>} {
    %c0 = arith.constant 0 : index
    %c0_0 = arith.constant 0 : index
    %0 = vector.load %arg0[%c0, %c0_0] : memref<16x16xf32, #tpu.memory_space<vmem>>, vector<16x16xf32>
    %1 = arith.truncf %0 : vector<16x16xf32> to vector<16x16xbf16>
    %c0_1 = arith.constant 0 : index
    %c0_2 = arith.constant 0 : index
    %2 = vector.load %arg2[%c0_1, %c0_2] : memref<16x128xbf16, #tpu.memory_space<vmem>>, vector<16x128xbf16>
    %cst = arith.constant dense<0.000000e+00> : vector<16x128xf32>
    %3 = tpu.matmul %1, %2, %cst {dimension_numbers = #tpu.dot_dimension_numbers<[1], [0], [0], [1], [0, 0, 1, 1], [], []>} : vector<16x16xbf16>, vector<16x128xbf16>, vector<16x128xf32> -> vector<16x128xf32>
    %c0_3 = arith.constant 0 : index
    %c0_4 = arith.constant 0 : index
    %4 = vector.load %arg3[%c0_3, %c0_4] : memref<1x128xf32, #tpu.memory_space<vmem>>, vector<1x128xf32>
    %5 = vector.broadcast %4 : vector<1x128xf32> to vector<16x128xf32>
    %6 = arith.addf %3, %5 : vector<16x128xf32>
    %c0_5 = arith.constant 0 : index
    %c0_6 = arith.constant 0 : index
    %7 = vector.load %arg1[%c0_5, %c0_6] : memref<8x128xf32, #tpu.memory_space<vmem>>, vector<8x128xf32>
    %8 = vector.shape_cast %6 : vector<16x128xf32> to vector<2x8x128xf32>
    %9 = vector.shape_cast %7 : vector<8x128xf32> to vector<1x8x128xf32>
    %10 = vector.broadcast %9 : vector<1x8x128xf32> to vector<2x8x128xf32>
    %11 = arith.addf %8, %10 : vector<2x8x128xf32>
    %12 = vector.shape_cast %11 : vector<2x8x128xf32> to vector<16x128xf32>
    %13 = tpu.iota {dimensions = array<i32: 0>} : vector<16x16xi32>
    %c8_i32 = arith.constant 8 : i32
    %c0_i32 = arith.constant 0 : i32
    %14 = arith.cmpi eq, %c8_i32, %c0_i32 : i32
    %c1_i32 = arith.constant 1 : i32
    %15 = arith.select %14, %c1_i32, %c8_i32 : i32
    %16 = vector.broadcast %15 : i32 to vector<16x16xi32>
    %17 = arith.remsi %13, %16 : vector<16x16xi32>
    %c0_i32_7 = arith.constant 0 : i32
    %18 = vector.broadcast %c0_i32_7 : i32 to vector<16x16xi32>
    %19 = arith.cmpi ne, %17, %18 : vector<16x16xi32>
    %c0_i32_8 = arith.constant 0 : i32
    %20 = vector.broadcast %c0_i32_8 : i32 to vector<16x16xi32>
    %21 = arith.cmpi slt, %17, %20 : vector<16x16xi32>
    %c0_i32_9 = arith.constant 0 : i32
    %22 = arith.cmpi slt, %15, %c0_i32_9 : i32
    %23 = vector.broadcast %22 : i1 to vector<16x16xi1>
    %24 = vector.broadcast %23 : vector<16x16xi1> to vector<16x16xi1>
    %25 = arith.xori %21, %24 : vector<16x16xi1>
    %26 = arith.andi %25, %19 : vector<16x16xi1>
    %27 = vector.broadcast %15 : i32 to vector<16x16xi32>
    %28 = arith.addi %17, %27 : vector<16x16xi32>
    %29 = arith.select %26, %28, %17 : vector<16x16xi1>, vector<16x16xi32>
    %30 = tpu.iota {dimensions = array<i32: 1>} : vector<16x16xi32>
    %c8_i32_10 = arith.constant 8 : i32
    %c0_i32_11 = arith.constant 0 : i32
    %31 = arith.cmpi eq, %c8_i32_10, %c0_i32_11 : i32
    %c1_i32_12 = arith.constant 1 : i32
    %32 = arith.select %31, %c1_i32_12, %c8_i32_10 : i32
    %33 = vector.broadcast %32 : i32 to vector<16x16xi32>
    %34 = arith.remsi %30, %33 : vector<16x16xi32>
    %c0_i32_13 = arith.constant 0 : i32
    %35 = vector.broadcast %c0_i32_13 : i32 to vector<16x16xi32>
    %36 = arith.cmpi ne, %34, %35 : vector<16x16xi32>
    %c0_i32_14 = arith.constant 0 : i32
    %37 = vector.broadcast %c0_i32_14 : i32 to vector<16x16xi32>
    %38 = arith.cmpi slt, %34, %37 : vector<16x16xi32>
    %c0_i32_15 = arith.constant 0 : i32
    %39 = arith.cmpi slt, %32, %c0_i32_15 : i32
    %40 = vector.broadcast %39 : i1 to vector<16x16xi1>
    %41 = vector.broadcast %40 : vector<16x16xi1> to vector<16x16xi1>
    %42 = arith.xori %38, %41 : vector<16x16xi1>
    %43 = arith.andi %42, %36 : vector<16x16xi1>
    %44 = vector.broadcast %32 : i32 to vector<16x16xi32>
    %45 = arith.addi %34, %44 : vector<16x16xi32>
    %46 = arith.select %43, %45, %34 : vector<16x16xi1>, vector<16x16xi32>
    %47 = arith.cmpi eq, %29, %46 : vector<16x16xi32>
    %48 = arith.truncf %12 : vector<16x128xf32> to vector<16x128xbf16>
    %c0_16 = arith.constant 0 : index
    %c0_17 = arith.constant 0 : index
    %c0_18 = arith.constant 0 : index
    %49 = vector.load %arg4[%c0_16, %c0_17, %c0_18] : memref<2x128x384xbf16, #tpu.memory_space<vmem>>, vector<1x128x384xbf16>
    %50 = vector.shape_cast %49 : vector<1x128x384xbf16> to vector<128x384xbf16>
    %cst_19 = arith.constant dense<0.000000e+00> : vector<16x384xf32>
    %51 = tpu.matmul %48, %50, %cst_19 {dimension_numbers = #tpu.dot_dimension_numbers<[1], [0], [0], [1], [0, 0, 1, 1], [], []>} : vector<16x128xbf16>, vector<128x384xbf16>, vector<16x384xf32> -> vector<16x384xf32>
    %c0_20 = arith.constant 0 : index
    %c0_21 = arith.constant 0 : index
    %c0_22 = arith.constant 0 : index
    %52 = vector.load %arg5[%c0_20, %c0_21, %c0_22] : memref<2x1x384xf32, #tpu.memory_space<vmem>>, vector<1x1x384xf32>
    %53 = vector.shape_cast %52 : vector<1x1x384xf32> to vector<1x384xf32>
    %54 = vector.broadcast %53 : vector<1x384xf32> to vector<16x384xf32>
    %55 = arith.addf %51, %54 : vector<16x384xf32>
    %56 = vector.extract_strided_slice %55 {offsets = [0, 0], sizes = [16, 32], strides = [1, 1]} : vector<16x384xf32> to vector<16x32xf32>
    %57 = vector.extract_strided_slice %55 {offsets = [0, 128], sizes = [16, 32], strides = [1, 1]} : vector<16x384xf32> to vector<16x32xf32>
    %58 = vector.extract_strided_slice %55 {offsets = [0, 256], sizes = [16, 32], strides = [1, 1]} : vector<16x384xf32> to vector<16x32xf32>
    %cst_23 = arith.constant dense<0.000000e+00> : vector<16x16xf32>
    %59 = tpu.matmul %56, %57, %cst_23 {dimension_numbers = #tpu.dot_dimension_numbers<[1], [1], [0], [0], [0, 0, 1, 0], [], []>} : vector<16x32xf32>, vector<16x32xf32>, vector<16x16xf32> -> vector<16x16xf32>
    %cst_24 = arith.constant 0.176776692 : f32
    %60 = vector.broadcast %cst_24 : f32 to vector<16x16xf32>
    %61 = arith.mulf %59, %60 : vector<16x16xf32>
    %cst_25 = arith.constant -1.000000e+30 : f32
    %62 = vector.broadcast %cst_25 : f32 to vector<16x16xf32>
    %63 = arith.select %47, %61, %62 : vector<16x16xi1>, vector<16x16xf32>
    %cst_26 = arith.constant dense<0xFF800000> : vector<16xf32>
    %64 = vector.multi_reduction <maximumf>, %63, %cst_26 [1] : vector<16x16xf32> to vector<16xf32>
    %65 = vector.shape_cast %64 : vector<16xf32> to vector<16x1xf32>
    %66 = vector.broadcast %65 : vector<16x1xf32> to vector<16x16xf32>
    %67 = arith.subf %63, %66 : vector<16x16xf32>
    %68 = math.exp %67 : vector<16x16xf32>
    %cst_27 = arith.constant dense<0.000000e+00> : vector<16xf32>
    %69 = vector.multi_reduction <add>, %68, %cst_27 [1] : vector<16x16xf32> to vector<16xf32>
    %70 = vector.shape_cast %69 : vector<16xf32> to vector<16x1xf32>
    %71 = tpu.reciprocal %70 {approx = true} : vector<16x1xf32> -> vector<16x1xf32>
    %72 = vector.broadcast %71 : vector<16x1xf32> to vector<16x16xf32>
    %73 = arith.mulf %68, %72 : vector<16x16xf32>
    %cst_28 = arith.constant dense<0.000000e+00> : vector<16x32xf32>
    %74 = tpu.matmul %73, %58, %cst_28 {dimension_numbers = #tpu.dot_dimension_numbers<[1], [0], [0], [1], [0, 0, 1, 1], [], []>} : vector<16x16xf32>, vector<16x32xf32>, vector<16x32xf32> -> vector<16x32xf32>
    %c0_29 = arith.constant 0 : index
    %c0_30 = arith.constant 0 : index
    %75 = vector.load %arg21[%c0_29, %c0_30] : memref<16x128xf32, #tpu.memory_space<vmem>>, vector<16x32xf32>
    tpu.vector_store %arg21[%c0_29, %c0_30], %74 {strides = array<i32>} : memref<16x128xf32, #tpu.memory_space<vmem>>, vector<16x32xf32>,
    %76 = vector.extract_strided_slice %55 {offsets = [0, 32], sizes = [16, 32], strides = [1, 1]} : vector<16x384xf32> to vector<16x32xf32>
    %77 = vector.extract_strided_slice %55 {offsets = [0, 160], sizes = [16, 32], strides = [1, 1]} : vector<16x384xf32> to vector<16x32xf32>
    %78 = vector.extract_strided_slice %55 {offsets = [0, 288], sizes = [16, 32], strides = [1, 1]} : vector<16x384xf32> to vector<16x32xf32>
    %cst_31 = arith.constant dense<0.000000e+00> : vector<16x16xf32>
    %79 = tpu.matmul %76, %77, %cst_31 {dimension_numbers = #tpu.dot_dimension_numbers<[1], [1], [0], [0], [0, 0, 1, 0], [], []>} : vector<16x32xf32>, vector<16x32xf32>, vector<16x16xf32> -> vector<16x16xf32>
    %cst_32 = arith.constant 0.176776692 : f32
    %80 = vector.broadcast %cst_32 : f32 to vector<16x16xf32>
    %81 = arith.mulf %79, %80 : vector<16x16xf32>
    %cst_33 = arith.constant -1.000000e+30 : f32
    %82 = vector.broadcast %cst_33 : f32 to vector<16x16xf32>
    %83 = arith.select %47, %81, %82 : vector<16x16xi1>, vector<16x16xf32>
    %cst_34 = arith.constant dense<0xFF800000> : vector<16xf32>
    %84 = vector.multi_reduction <maximumf>, %83, %cst_34 [1] : vector<16x16xf32> to vector<16xf32>
    %85 = vector.shape_cast %84 : vector<16xf32> to vector<16x1xf32>
    %86 = vector.broadcast %85 : vector<16x1xf32> to vector<16x16xf32>
    %87 = arith.subf %83, %86 : vector<16x16xf32>
    %88 = math.exp %87 : vector<16x16xf32>
    %cst_35 = arith.constant dense<0.000000e+00> : vector<16xf32>
    %89 = vector.multi_reduction <add>, %88, %cst_35 [1] : vector<16x16xf32> to vector<16xf32>
    %90 = vector.shape_cast %89 : vector<16xf32> to vector<16x1xf32>
    %91 = tpu.reciprocal %90 {approx = true} : vector<16x1xf32> -> vector<16x1xf32>
    %92 = vector.broadcast %91 : vector<16x1xf32> to vector<16x16xf32>
    %93 = arith.mulf %88, %92 : vector<16x16xf32>
    %cst_36 = arith.constant dense<0.000000e+00> : vector<16x32xf32>
    %94 = tpu.matmul %93, %78, %cst_36 {dimension_numbers = #tpu.dot_dimension_numbers<[1], [0], [0], [1], [0, 0, 1, 1], [], []>} : vector<16x16xf32>, vector<16x32xf32>, vector<16x32xf32> -> vector<16x32xf32>
    %c0_37 = arith.constant 0 : index
    %c32 = arith.constant 32 : index
    %95 = vector.load %arg21[%c0_37, %c32] : memref<16x128xf32, #tpu.memory_space<vmem>>, vector<16x32xf32>
    tpu.vector_store %arg21[%c0_37, %c32], %94 {strides = array<i32>} : memref<16x128xf32, #tpu.memory_space<vmem>>, vector<16x32xf32>,
    %96 = vector.extract_strided_slice %55 {offsets = [0, 64], sizes = [16, 32], strides = [1, 1]} : vector<16x384xf32> to vector<16x32xf32>
    %97 = vector.extract_strided_slice %55 {offsets = [0, 192], sizes = [16, 32], strides = [1, 1]} : vector<16x384xf32> to vector<16x32xf32>
    %98 = vector.extract_strided_slice %55 {offsets = [0, 320], sizes = [16, 32], strides = [1, 1]} : vector<16x384xf32> to vector<16x32xf32>
    %cst_38 = arith.constant dense<0.000000e+00> : vector<16x16xf32>
    %99 = tpu.matmul %96, %97, %cst_38 {dimension_numbers = #tpu.dot_dimension_numbers<[1], [1], [0], [0], [0, 0, 1, 0], [], []>} : vector<16x32xf32>, vector<16x32xf32>, vector<16x16xf32> -> vector<16x16xf32>
    %cst_39 = arith.constant 0.176776692 : f32
    %100 = vector.broadcast %cst_39 : f32 to vector<16x16xf32>
    %101 = arith.mulf %99, %100 : vector<16x16xf32>
    %cst_40 = arith.constant -1.000000e+30 : f32
    %102 = vector.broadcast %cst_40 : f32 to vector<16x16xf32>
    %103 = arith.select %47, %101, %102 : vector<16x16xi1>, vector<16x16xf32>
    %cst_41 = arith.constant dense<0xFF800000> : vector<16xf32>
    %104 = vector.multi_reduction <maximumf>, %103, %cst_41 [1] : vector<16x16xf32> to vector<16xf32>
    %105 = vector.shape_cast %104 : vector<16xf32> to vector<16x1xf32>
    %106 = vector.broadcast %105 : vector<16x1xf32> to vector<16x16xf32>
    %107 = arith.subf %103, %106 : vector<16x16xf32>
    %108 = math.exp %107 : vector<16x16xf32>
    %cst_42 = arith.constant dense<0.000000e+00> : vector<16xf32>
    %109 = vector.multi_reduction <add>, %108, %cst_42 [1] : vector<16x16xf32> to vector<16xf32>
    %110 = vector.shape_cast %109 : vector<16xf32> to vector<16x1xf32>
    %111 = tpu.reciprocal %110 {approx = true} : vector<16x1xf32> -> vector<16x1xf32>
    %112 = vector.broadcast %111 : vector<16x1xf32> to vector<16x16xf32>
    %113 = arith.mulf %108, %112 : vector<16x16xf32>
    %cst_43 = arith.constant dense<0.000000e+00> : vector<16x32xf32>
    %114 = tpu.matmul %113, %98, %cst_43 {dimension_numbers = #tpu.dot_dimension_numbers<[1], [0], [0], [1], [0, 0, 1, 1], [], []>} : vector<16x16xf32>, vector<16x32xf32>, vector<16x32xf32> -> vector<16x32xf32>
    %c0_44 = arith.constant 0 : index
    %c64 = arith.constant 64 : index
    %115 = vector.load %arg21[%c0_44, %c64] : memref<16x128xf32, #tpu.memory_space<vmem>>, vector<16x32xf32>
    tpu.vector_store %arg21[%c0_44, %c64], %114 {strides = array<i32>} : memref<16x128xf32, #tpu.memory_space<vmem>>, vector<16x32xf32>,
    %116 = vector.extract_strided_slice %55 {offsets = [0, 96], sizes = [16, 32], strides = [1, 1]} : vector<16x384xf32> to vector<16x32xf32>
    %117 = vector.extract_strided_slice %55 {offsets = [0, 224], sizes = [16, 32], strides = [1, 1]} : vector<16x384xf32> to vector<16x32xf32>
    %118 = vector.extract_strided_slice %55 {offsets = [0, 352], sizes = [16, 32], strides = [1, 1]} : vector<16x384xf32> to vector<16x32xf32>
    %cst_45 = arith.constant dense<0.000000e+00> : vector<16x16xf32>
    %119 = tpu.matmul %116, %117, %cst_45 {dimension_numbers = #tpu.dot_dimension_numbers<[1], [1], [0], [0], [0, 0, 1, 0], [], []>} : vector<16x32xf32>, vector<16x32xf32>, vector<16x16xf32> -> vector<16x16xf32>
    %cst_46 = arith.constant 0.176776692 : f32
    %120 = vector.broadcast %cst_46 : f32 to vector<16x16xf32>
    %121 = arith.mulf %119, %120 : vector<16x16xf32>
    %cst_47 = arith.constant -1.000000e+30 : f32
    %122 = vector.broadcast %cst_47 : f32 to vector<16x16xf32>
    %123 = arith.select %47, %121, %122 : vector<16x16xi1>, vector<16x16xf32>
    %cst_48 = arith.constant dense<0xFF800000> : vector<16xf32>
    %124 = vector.multi_reduction <maximumf>, %123, %cst_48 [1] : vector<16x16xf32> to vector<16xf32>
    %125 = vector.shape_cast %124 : vector<16xf32> to vector<16x1xf32>
    %126 = vector.broadcast %125 : vector<16x1xf32> to vector<16x16xf32>
    %127 = arith.subf %123, %126 : vector<16x16xf32>
    %128 = math.exp %127 : vector<16x16xf32>
    %cst_49 = arith.constant dense<0.000000e+00> : vector<16xf32>
    %129 = vector.multi_reduction <add>, %128, %cst_49 [1] : vector<16x16xf32> to vector<16xf32>
    %130 = vector.shape_cast %129 : vector<16xf32> to vector<16x1xf32>
    %131 = tpu.reciprocal %130 {approx = true} : vector<16x1xf32> -> vector<16x1xf32>
    %132 = vector.broadcast %131 : vector<16x1xf32> to vector<16x16xf32>
    %133 = arith.mulf %128, %132 : vector<16x16xf32>
    %cst_50 = arith.constant dense<0.000000e+00> : vector<16x32xf32>
    %134 = tpu.matmul %133, %118, %cst_50 {dimension_numbers = #tpu.dot_dimension_numbers<[1], [0], [0], [1], [0, 0, 1, 1], [], []>} : vector<16x16xf32>, vector<16x32xf32>, vector<16x32xf32> -> vector<16x32xf32>
    %c0_51 = arith.constant 0 : index
    %c96 = arith.constant 96 : index
    %135 = vector.load %arg21[%c0_51, %c96] : memref<16x128xf32, #tpu.memory_space<vmem>>, vector<16x32xf32>
    tpu.vector_store %arg21[%c0_51, %c96], %134 {strides = array<i32>} : memref<16x128xf32, #tpu.memory_space<vmem>>, vector<16x32xf32>,
    %c0_52 = arith.constant 0 : index
    %c0_53 = arith.constant 0 : index
    %136 = vector.load %arg21[%c0_52, %c0_53] : memref<16x128xf32, #tpu.memory_space<vmem>>, vector<16x128xf32>
    %137 = arith.truncf %136 : vector<16x128xf32> to vector<16x128xbf16>
    %c0_54 = arith.constant 0 : index
    %c0_55 = arith.constant 0 : index
    %c0_56 = arith.constant 0 : index
    %138 = vector.load %arg6[%c0_54, %c0_55, %c0_56] : memref<2x128x128xbf16, #tpu.memory_space<vmem>>, vector<1x128x128xbf16>
    %139 = vector.shape_cast %138 : vector<1x128x128xbf16> to vector<128x128xbf16>
    %cst_57 = arith.constant dense<0.000000e+00> : vector<16x128xf32>
    %140 = tpu.matmul %137, %139, %cst_57 {dimension_numbers = #tpu.dot_dimension_numbers<[1], [0], [0], [1], [0, 0, 1, 1], [], []>} : vector<16x128xbf16>, vector<128x128xbf16>, vector<16x128xf32> -> vector<16x128xf32>
    %c0_58 = arith.constant 0 : index
    %c0_59 = arith.constant 0 : index
    %c0_60 = arith.constant 0 : index
    %141 = vector.load %arg7[%c0_58, %c0_59, %c0_60] : memref<2x1x128xf32, #tpu.memory_space<vmem>>, vector<1x1x128xf32>
    %142 = vector.shape_cast %141 : vector<1x1x128xf32> to vector<1x128xf32>
    %143 = vector.broadcast %142 : vector<1x128xf32> to vector<16x128xf32>
    %144 = arith.addf %140, %143 : vector<16x128xf32>
    %145 = arith.addf %12, %144 : vector<16x128xf32>
    %c0_61 = arith.constant 0 : index
    %c0_62 = arith.constant 0 : index
    %c0_63 = arith.constant 0 : index
    %146 = vector.load %arg8[%c0_61, %c0_62, %c0_63] : memref<2x1x128xf32, #tpu.memory_space<vmem>>, vector<1x1x128xf32>
    %147 = vector.shape_cast %146 : vector<1x1x128xf32> to vector<1x128xf32>
    %c0_64 = arith.constant 0 : index
    %c0_65 = arith.constant 0 : index
    %c0_66 = arith.constant 0 : index
    %148 = vector.load %arg9[%c0_64, %c0_65, %c0_66] : memref<2x1x128xf32, #tpu.memory_space<vmem>>, vector<1x1x128xf32>
    %149 = vector.shape_cast %148 : vector<1x1x128xf32> to vector<1x128xf32>
    %cst_67 = arith.constant dense<0.000000e+00> : vector<16xf32>
    %150 = vector.multi_reduction <add>, %145, %cst_67 [1] : vector<16x128xf32> to vector<16xf32>
    %151 = vector.shape_cast %150 : vector<16xf32> to vector<16x1xf32>
    %cst_68 = arith.constant 1.280000e+02 : f32
    %152 = vector.broadcast %cst_68 : f32 to vector<16x1xf32>
    %153 = arith.divf %151, %152 : vector<16x1xf32>
    %154 = vector.broadcast %153 : vector<16x1xf32> to vector<16x128xf32>
    %155 = arith.subf %145, %154 : vector<16x128xf32>
    %156 = arith.mulf %155, %155 : vector<16x128xf32>
    %cst_69 = arith.constant dense<0.000000e+00> : vector<16xf32>
    %157 = vector.multi_reduction <add>, %156, %cst_69 [1] : vector<16x128xf32> to vector<16xf32>
    %158 = vector.shape_cast %157 : vector<16xf32> to vector<16x1xf32>
    %cst_70 = arith.constant 1.280000e+02 : f32
    %159 = vector.broadcast %cst_70 : f32 to vector<16x1xf32>
    %160 = arith.divf %158, %159 : vector<16x1xf32>
    %161 = vector.broadcast %153 : vector<16x1xf32> to vector<16x128xf32>
    %162 = arith.subf %145, %161 : vector<16x128xf32>
    %cst_71 = arith.constant 9.99999974E-6 : f32
    %163 = vector.broadcast %cst_71 : f32 to vector<16x1xf32>
    %164 = arith.addf %160, %163 : vector<16x1xf32>
    %165 = math.rsqrt %164 : vector<16x1xf32>
    %166 = vector.broadcast %165 : vector<16x1xf32> to vector<16x128xf32>
    %167 = arith.mulf %162, %166 : vector<16x128xf32>
    %168 = vector.broadcast %147 : vector<1x128xf32> to vector<16x128xf32>
    %169 = arith.mulf %167, %168 : vector<16x128xf32>
    %170 = vector.broadcast %149 : vector<1x128xf32> to vector<16x128xf32>
    %171 = arith.addf %169, %170 : vector<16x128xf32>
    %172 = arith.truncf %171 : vector<16x128xf32> to vector<16x128xbf16>
    %c0_72 = arith.constant 0 : index
    %c0_73 = arith.constant 0 : index
    %c0_74 = arith.constant 0 : index
    %173 = vector.load %arg10[%c0_72, %c0_73, %c0_74] : memref<2x128x2048xbf16, #tpu.memory_space<vmem>>, vector<1x128x2048xbf16>
    %174 = vector.shape_cast %173 : vector<1x128x2048xbf16> to vector<128x2048xbf16>
    %cst_75 = arith.constant dense<0.000000e+00> : vector<16x2048xf32>
    %175 = tpu.matmul %172, %174, %cst_75 {dimension_numbers = #tpu.dot_dimension_numbers<[1], [0], [0], [1], [0, 0, 1, 1], [], []>} : vector<16x128xbf16>, vector<128x2048xbf16>, vector<16x2048xf32> -> vector<16x2048xf32>
    %c0_76 = arith.constant 0 : index
    %c0_77 = arith.constant 0 : index
    %c0_78 = arith.constant 0 : index
    %176 = vector.load %arg11[%c0_76, %c0_77, %c0_78] : memref<2x1x2048xf32, #tpu.memory_space<vmem>>, vector<1x1x2048xf32>
    %177 = vector.shape_cast %176 : vector<1x1x2048xf32> to vector<1x2048xf32>
    %178 = vector.broadcast %177 : vector<1x2048xf32> to vector<16x2048xf32>
    %179 = arith.addf %175, %178 : vector<16x2048xf32>
    %cst_79 = arith.constant 0.000000e+00 : f32
    %180 = vector.broadcast %cst_79 : f32 to vector<16x2048xf32>
    %181 = arith.maximumf %179, %180 : vector<16x2048xf32>
    %182 = arith.truncf %181 : vector<16x2048xf32> to vector<16x2048xbf16>
    %c0_80 = arith.constant 0 : index
    %c0_81 = arith.constant 0 : index
    %c0_82 = arith.constant 0 : index
    %183 = vector.load %arg12[%c0_80, %c0_81, %c0_82] : memref<2x2048x128xbf16, #tpu.memory_space<vmem>>, vector<1x2048x128xbf16>
    %184 = vector.shape_cast %183 : vector<1x2048x128xbf16> to vector<2048x128xbf16>
    %cst_83 = arith.constant dense<0.000000e+00> : vector<16x128xf32>
    %185 = tpu.matmul %182, %184, %cst_83 {dimension_numbers = #tpu.dot_dimension_numbers<[1], [0], [0], [1], [0, 0, 1, 1], [], []>} : vector<16x2048xbf16>, vector<2048x128xbf16>, vector<16x128xf32> -> vector<16x128xf32>
    %c0_84 = arith.constant 0 : index
    %c0_85 = arith.constant 0 : index
    %c0_86 = arith.constant 0 : index
    %186 = vector.load %arg13[%c0_84, %c0_85, %c0_86] : memref<2x1x128xf32, #tpu.memory_space<vmem>>, vector<1x1x128xf32>
    %187 = vector.shape_cast %186 : vector<1x1x128xf32> to vector<1x128xf32>
    %188 = vector.broadcast %187 : vector<1x128xf32> to vector<16x128xf32>
    %189 = arith.addf %185, %188 : vector<16x128xf32>
    %190 = arith.addf %171, %189 : vector<16x128xf32>
    %c0_87 = arith.constant 0 : index
    %c0_88 = arith.constant 0 : index
    %c0_89 = arith.constant 0 : index
    %191 = vector.load %arg14[%c0_87, %c0_88, %c0_89] : memref<2x1x128xf32, #tpu.memory_space<vmem>>, vector<1x1x128xf32>
    %192 = vector.shape_cast %191 : vector<1x1x128xf32> to vector<1x128xf32>
    %c0_90 = arith.constant 0 : index
    %c0_91 = arith.constant 0 : index
    %c0_92 = arith.constant 0 : index
    %193 = vector.load %arg15[%c0_90, %c0_91, %c0_92] : memref<2x1x128xf32, #tpu.memory_space<vmem>>, vector<1x1x128xf32>
    %194 = vector.shape_cast %193 : vector<1x1x128xf32> to vector<1x128xf32>
    %cst_93 = arith.constant dense<0.000000e+00> : vector<16xf32>
    %195 = vector.multi_reduction <add>, %190, %cst_93 [1] : vector<16x128xf32> to vector<16xf32>
    %196 = vector.shape_cast %195 : vector<16xf32> to vector<16x1xf32>
    %cst_94 = arith.constant 1.280000e+02 : f32
    %197 = vector.broadcast %cst_94 : f32 to vector<16x1xf32>
    %198 = arith.divf %196, %197 : vector<16x1xf32>
    %199 = vector.broadcast %198 : vector<16x1xf32> to vector<16x128xf32>
    %200 = arith.subf %190, %199 : vector<16x128xf32>
    %201 = arith.mulf %200, %200 : vector<16x128xf32>
    %cst_95 = arith.constant dense<0.000000e+00> : vector<16xf32>
    %202 = vector.multi_reduction <add>, %201, %cst_95 [1] : vector<16x128xf32> to vector<16xf32>
    %203 = vector.shape_cast %202 : vector<16xf32> to vector<16x1xf32>
    %cst_96 = arith.constant 1.280000e+02 : f32
    %204 = vector.broadcast %cst_96 : f32 to vector<16x1xf32>
    %205 = arith.divf %203, %204 : vector<16x1xf32>
    %206 = vector.broadcast %198 : vector<16x1xf32> to vector<16x128xf32>
    %207 = arith.subf %190, %206 : vector<16x128xf32>
    %cst_97 = arith.constant 9.99999974E-6 : f32
    %208 = vector.broadcast %cst_97 : f32 to vector<16x1xf32>
    %209 = arith.addf %205, %208 : vector<16x1xf32>
    %210 = math.rsqrt %209 : vector<16x1xf32>
    %211 = vector.broadcast %210 : vector<16x1xf32> to vector<16x128xf32>
    %212 = arith.mulf %207, %211 : vector<16x128xf32>
    %213 = vector.broadcast %192 : vector<1x128xf32> to vector<16x128xf32>
    %214 = arith.mulf %212, %213 : vector<16x128xf32>
    %215 = vector.broadcast %194 : vector<1x128xf32> to vector<16x128xf32>
    %216 = arith.addf %214, %215 : vector<16x128xf32>
    %217 = arith.truncf %216 : vector<16x128xf32> to vector<16x128xbf16>
    %c1 = arith.constant 1 : index
    %c0_98 = arith.constant 0 : index
    %c0_99 = arith.constant 0 : index
    %218 = vector.load %arg4[%c1, %c0_98, %c0_99] : memref<2x128x384xbf16, #tpu.memory_space<vmem>>, vector<1x128x384xbf16>
    %219 = vector.shape_cast %218 : vector<1x128x384xbf16> to vector<128x384xbf16>
    %cst_100 = arith.constant dense<0.000000e+00> : vector<16x384xf32>
    %220 = tpu.matmul %217, %219, %cst_100 {dimension_numbers = #tpu.dot_dimension_numbers<[1], [0], [0], [1], [0, 0, 1, 1], [], []>} : vector<16x128xbf16>, vector<128x384xbf16>, vector<16x384xf32> -> vector<16x384xf32>
    %c1_101 = arith.constant 1 : index
    %c0_102 = arith.constant 0 : index
    %c0_103 = arith.constant 0 : index
    %221 = vector.load %arg5[%c1_101, %c0_102, %c0_103] : memref<2x1x384xf32, #tpu.memory_space<vmem>>, vector<1x1x384xf32>
    %222 = vector.shape_cast %221 : vector<1x1x384xf32> to vector<1x384xf32>
    %223 = vector.broadcast %222 : vector<1x384xf32> to vector<16x384xf32>
    %224 = arith.addf %220, %223 : vector<16x384xf32>
    %225 = vector.extract_strided_slice %224 {offsets = [0, 0], sizes = [16, 32], strides = [1, 1]} : vector<16x384xf32> to vector<16x32xf32>
    %226 = vector.extract_strided_slice %224 {offsets = [0, 128], sizes = [16, 32], strides = [1, 1]} : vector<16x384xf32> to vector<16x32xf32>
    %227 = vector.extract_strided_slice %224 {offsets = [0, 256], sizes = [16, 32], strides = [1, 1]} : vector<16x384xf32> to vector<16x32xf32>
    %cst_104 = arith.constant dense<0.000000e+00> : vector<16x16xf32>
    %228 = tpu.matmul %225, %226, %cst_104 {dimension_numbers = #tpu.dot_dimension_numbers<[1], [1], [0], [0], [0, 0, 1, 0], [], []>} : vector<16x32xf32>, vector<16x32xf32>, vector<16x16xf32> -> vector<16x16xf32>
    %cst_105 = arith.constant 0.176776692 : f32
    %229 = vector.broadcast %cst_105 : f32 to vector<16x16xf32>
    %230 = arith.mulf %228, %229 : vector<16x16xf32>
    %cst_106 = arith.constant -1.000000e+30 : f32
    %231 = vector.broadcast %cst_106 : f32 to vector<16x16xf32>
    %232 = arith.select %47, %230, %231 : vector<16x16xi1>, vector<16x16xf32>
    %cst_107 = arith.constant dense<0xFF800000> : vector<16xf32>
    %233 = vector.multi_reduction <maximumf>, %232, %cst_107 [1] : vector<16x16xf32> to vector<16xf32>
    %234 = vector.shape_cast %233 : vector<16xf32> to vector<16x1xf32>
    %235 = vector.broadcast %234 : vector<16x1xf32> to vector<16x16xf32>
    %236 = arith.subf %232, %235 : vector<16x16xf32>
    %237 = math.exp %236 : vector<16x16xf32>
    %cst_108 = arith.constant dense<0.000000e+00> : vector<16xf32>
    %238 = vector.multi_reduction <add>, %237, %cst_108 [1] : vector<16x16xf32> to vector<16xf32>
    %239 = vector.shape_cast %238 : vector<16xf32> to vector<16x1xf32>
    %240 = tpu.reciprocal %239 {approx = true} : vector<16x1xf32> -> vector<16x1xf32>
    %241 = vector.broadcast %240 : vector<16x1xf32> to vector<16x16xf32>
    %242 = arith.mulf %237, %241 : vector<16x16xf32>
    %cst_109 = arith.constant dense<0.000000e+00> : vector<16x32xf32>
    %243 = tpu.matmul %242, %227, %cst_109 {dimension_numbers = #tpu.dot_dimension_numbers<[1], [0], [0], [1], [0, 0, 1, 1], [], []>} : vector<16x16xf32>, vector<16x32xf32>, vector<16x32xf32> -> vector<16x32xf32>
    %c0_110 = arith.constant 0 : index
    %c0_111 = arith.constant 0 : index
    %244 = vector.load %arg21[%c0_110, %c0_111] : memref<16x128xf32, #tpu.memory_space<vmem>>, vector<16x32xf32>
    tpu.vector_store %arg21[%c0_110, %c0_111], %243 {strides = array<i32>} : memref<16x128xf32, #tpu.memory_space<vmem>>, vector<16x32xf32>,
    %245 = vector.extract_strided_slice %224 {offsets = [0, 32], sizes = [16, 32], strides = [1, 1]} : vector<16x384xf32> to vector<16x32xf32>
    %246 = vector.extract_strided_slice %224 {offsets = [0, 160], sizes = [16, 32], strides = [1, 1]} : vector<16x384xf32> to vector<16x32xf32>
    %247 = vector.extract_strided_slice %224 {offsets = [0, 288], sizes = [16, 32], strides = [1, 1]} : vector<16x384xf32> to vector<16x32xf32>
    %cst_112 = arith.constant dense<0.000000e+00> : vector<16x16xf32>
    %248 = tpu.matmul %245, %246, %cst_112 {dimension_numbers = #tpu.dot_dimension_numbers<[1], [1], [0], [0], [0, 0, 1, 0], [], []>} : vector<16x32xf32>, vector<16x32xf32>, vector<16x16xf32> -> vector<16x16xf32>
    %cst_113 = arith.constant 0.176776692 : f32
    %249 = vector.broadcast %cst_113 : f32 to vector<16x16xf32>
    %250 = arith.mulf %248, %249 : vector<16x16xf32>
    %cst_114 = arith.constant -1.000000e+30 : f32
    %251 = vector.broadcast %cst_114 : f32 to vector<16x16xf32>
    %252 = arith.select %47, %250, %251 : vector<16x16xi1>, vector<16x16xf32>
    %cst_115 = arith.constant dense<0xFF800000> : vector<16xf32>
    %253 = vector.multi_reduction <maximumf>, %252, %cst_115 [1] : vector<16x16xf32> to vector<16xf32>
    %254 = vector.shape_cast %253 : vector<16xf32> to vector<16x1xf32>
    %255 = vector.broadcast %254 : vector<16x1xf32> to vector<16x16xf32>
    %256 = arith.subf %252, %255 : vector<16x16xf32>
    %257 = math.exp %256 : vector<16x16xf32>
    %cst_116 = arith.constant dense<0.000000e+00> : vector<16xf32>
    %258 = vector.multi_reduction <add>, %257, %cst_116 [1] : vector<16x16xf32> to vector<16xf32>
    %259 = vector.shape_cast %258 : vector<16xf32> to vector<16x1xf32>
    %260 = tpu.reciprocal %259 {approx = true} : vector<16x1xf32> -> vector<16x1xf32>
    %261 = vector.broadcast %260 : vector<16x1xf32> to vector<16x16xf32>
    %262 = arith.mulf %257, %261 : vector<16x16xf32>
    %cst_117 = arith.constant dense<0.000000e+00> : vector<16x32xf32>
    %263 = tpu.matmul %262, %247, %cst_117 {dimension_numbers = #tpu.dot_dimension_numbers<[1], [0], [0], [1], [0, 0, 1, 1], [], []>} : vector<16x16xf32>, vector<16x32xf32>, vector<16x32xf32> -> vector<16x32xf32>
    %c0_118 = arith.constant 0 : index
    %c32_119 = arith.constant 32 : index
    %264 = vector.load %arg21[%c0_118, %c32_119] : memref<16x128xf32, #tpu.memory_space<vmem>>, vector<16x32xf32>
    tpu.vector_store %arg21[%c0_118, %c32_119], %263 {strides = array<i32>} : memref<16x128xf32, #tpu.memory_space<vmem>>, vector<16x32xf32>,
    %265 = vector.extract_strided_slice %224 {offsets = [0, 64], sizes = [16, 32], strides = [1, 1]} : vector<16x384xf32> to vector<16x32xf32>
    %266 = vector.extract_strided_slice %224 {offsets = [0, 192], sizes = [16, 32], strides = [1, 1]} : vector<16x384xf32> to vector<16x32xf32>
    %267 = vector.extract_strided_slice %224 {offsets = [0, 320], sizes = [16, 32], strides = [1, 1]} : vector<16x384xf32> to vector<16x32xf32>
    %cst_120 = arith.constant dense<0.000000e+00> : vector<16x16xf32>
    %268 = tpu.matmul %265, %266, %cst_120 {dimension_numbers = #tpu.dot_dimension_numbers<[1], [1], [0], [0], [0, 0, 1, 0], [], []>} : vector<16x32xf32>, vector<16x32xf32>, vector<16x16xf32> -> vector<16x16xf32>
    %cst_121 = arith.constant 0.176776692 : f32
    %269 = vector.broadcast %cst_121 : f32 to vector<16x16xf32>
    %270 = arith.mulf %268, %269 : vector<16x16xf32>
    %cst_122 = arith.constant -1.000000e+30 : f32
    %271 = vector.broadcast %cst_122 : f32 to vector<16x16xf32>
    %272 = arith.select %47, %270, %271 : vector<16x16xi1>, vector<16x16xf32>
    %cst_123 = arith.constant dense<0xFF800000> : vector<16xf32>
    %273 = vector.multi_reduction <maximumf>, %272, %cst_123 [1] : vector<16x16xf32> to vector<16xf32>
    %274 = vector.shape_cast %273 : vector<16xf32> to vector<16x1xf32>
    %275 = vector.broadcast %274 : vector<16x1xf32> to vector<16x16xf32>
    %276 = arith.subf %272, %275 : vector<16x16xf32>
    %277 = math.exp %276 : vector<16x16xf32>
    %cst_124 = arith.constant dense<0.000000e+00> : vector<16xf32>
    %278 = vector.multi_reduction <add>, %277, %cst_124 [1] : vector<16x16xf32> to vector<16xf32>
    %279 = vector.shape_cast %278 : vector<16xf32> to vector<16x1xf32>
    %280 = tpu.reciprocal %279 {approx = true} : vector<16x1xf32> -> vector<16x1xf32>
    %281 = vector.broadcast %280 : vector<16x1xf32> to vector<16x16xf32>
    %282 = arith.mulf %277, %281 : vector<16x16xf32>
    %cst_125 = arith.constant dense<0.000000e+00> : vector<16x32xf32>
    %283 = tpu.matmul %282, %267, %cst_125 {dimension_numbers = #tpu.dot_dimension_numbers<[1], [0], [0], [1], [0, 0, 1, 1], [], []>} : vector<16x16xf32>, vector<16x32xf32>, vector<16x32xf32> -> vector<16x32xf32>
    %c0_126 = arith.constant 0 : index
    %c64_127 = arith.constant 64 : index
    %284 = vector.load %arg21[%c0_126, %c64_127] : memref<16x128xf32, #tpu.memory_space<vmem>>, vector<16x32xf32>
    tpu.vector_store %arg21[%c0_126, %c64_127], %283 {strides = array<i32>} : memref<16x128xf32, #tpu.memory_space<vmem>>, vector<16x32xf32>,
    %285 = vector.extract_strided_slice %224 {offsets = [0, 96], sizes = [16, 32], strides = [1, 1]} : vector<16x384xf32> to vector<16x32xf32>
    %286 = vector.extract_strided_slice %224 {offsets = [0, 224], sizes = [16, 32], strides = [1, 1]} : vector<16x384xf32> to vector<16x32xf32>
    %287 = vector.extract_strided_slice %224 {offsets = [0, 352], sizes = [16, 32], strides = [1, 1]} : vector<16x384xf32> to vector<16x32xf32>
    %cst_128 = arith.constant dense<0.000000e+00> : vector<16x16xf32>
    %288 = tpu.matmul %285, %286, %cst_128 {dimension_numbers = #tpu.dot_dimension_numbers<[1], [1], [0], [0], [0, 0, 1, 0], [], []>} : vector<16x32xf32>, vector<16x32xf32>, vector<16x16xf32> -> vector<16x16xf32>
    %cst_129 = arith.constant 0.176776692 : f32
    %289 = vector.broadcast %cst_129 : f32 to vector<16x16xf32>
    %290 = arith.mulf %288, %289 : vector<16x16xf32>
    %cst_130 = arith.constant -1.000000e+30 : f32
    %291 = vector.broadcast %cst_130 : f32 to vector<16x16xf32>
    %292 = arith.select %47, %290, %291 : vector<16x16xi1>, vector<16x16xf32>
    %cst_131 = arith.constant dense<0xFF800000> : vector<16xf32>
    %293 = vector.multi_reduction <maximumf>, %292, %cst_131 [1] : vector<16x16xf32> to vector<16xf32>
    %294 = vector.shape_cast %293 : vector<16xf32> to vector<16x1xf32>
    %295 = vector.broadcast %294 : vector<16x1xf32> to vector<16x16xf32>
    %296 = arith.subf %292, %295 : vector<16x16xf32>
    %297 = math.exp %296 : vector<16x16xf32>
    %cst_132 = arith.constant dense<0.000000e+00> : vector<16xf32>
    %298 = vector.multi_reduction <add>, %297, %cst_132 [1] : vector<16x16xf32> to vector<16xf32>
    %299 = vector.shape_cast %298 : vector<16xf32> to vector<16x1xf32>
    %300 = tpu.reciprocal %299 {approx = true} : vector<16x1xf32> -> vector<16x1xf32>
    %301 = vector.broadcast %300 : vector<16x1xf32> to vector<16x16xf32>
    %302 = arith.mulf %297, %301 : vector<16x16xf32>
    %cst_133 = arith.constant dense<0.000000e+00> : vector<16x32xf32>
    %303 = tpu.matmul %302, %287, %cst_133 {dimension_numbers = #tpu.dot_dimension_numbers<[1], [0], [0], [1], [0, 0, 1, 1], [], []>} : vector<16x16xf32>, vector<16x32xf32>, vector<16x32xf32> -> vector<16x32xf32>
    %c0_134 = arith.constant 0 : index
    %c96_135 = arith.constant 96 : index
    %304 = vector.load %arg21[%c0_134, %c96_135] : memref<16x128xf32, #tpu.memory_space<vmem>>, vector<16x32xf32>
    tpu.vector_store %arg21[%c0_134, %c96_135], %303 {strides = array<i32>} : memref<16x128xf32, #tpu.memory_space<vmem>>, vector<16x32xf32>,
    %c0_136 = arith.constant 0 : index
    %c0_137 = arith.constant 0 : index
    %305 = vector.load %arg21[%c0_136, %c0_137] : memref<16x128xf32, #tpu.memory_space<vmem>>, vector<16x128xf32>
    %306 = arith.truncf %305 : vector<16x128xf32> to vector<16x128xbf16>
    %c1_138 = arith.constant 1 : index
    %c0_139 = arith.constant 0 : index
    %c0_140 = arith.constant 0 : index
    %307 = vector.load %arg6[%c1_138, %c0_139, %c0_140] : memref<2x128x128xbf16, #tpu.memory_space<vmem>>, vector<1x128x128xbf16>
    %308 = vector.shape_cast %307 : vector<1x128x128xbf16> to vector<128x128xbf16>
    %cst_141 = arith.constant dense<0.000000e+00> : vector<16x128xf32>
    %309 = tpu.matmul %306, %308, %cst_141 {dimension_numbers = #tpu.dot_dimension_numbers<[1], [0], [0], [1], [0, 0, 1, 1], [], []>} : vector<16x128xbf16>, vector<128x128xbf16>, vector<16x128xf32> -> vector<16x128xf32>
    %c1_142 = arith.constant 1 : index
    %c0_143 = arith.constant 0 : index
    %c0_144 = arith.constant 0 : index
    %310 = vector.load %arg7[%c1_142, %c0_143, %c0_144] : memref<2x1x128xf32, #tpu.memory_space<vmem>>, vector<1x1x128xf32>
    %311 = vector.shape_cast %310 : vector<1x1x128xf32> to vector<1x128xf32>
    %312 = vector.broadcast %311 : vector<1x128xf32> to vector<16x128xf32>
    %313 = arith.addf %309, %312 : vector<16x128xf32>
    %314 = arith.addf %216, %313 : vector<16x128xf32>
    %c1_145 = arith.constant 1 : index
    %c0_146 = arith.constant 0 : index
    %c0_147 = arith.constant 0 : index
    %315 = vector.load %arg8[%c1_145, %c0_146, %c0_147] : memref<2x1x128xf32, #tpu.memory_space<vmem>>, vector<1x1x128xf32>
    %316 = vector.shape_cast %315 : vector<1x1x128xf32> to vector<1x128xf32>
    %c1_148 = arith.constant 1 : index
    %c0_149 = arith.constant 0 : index
    %c0_150 = arith.constant 0 : index
    %317 = vector.load %arg9[%c1_148, %c0_149, %c0_150] : memref<2x1x128xf32, #tpu.memory_space<vmem>>, vector<1x1x128xf32>
    %318 = vector.shape_cast %317 : vector<1x1x128xf32> to vector<1x128xf32>
    %cst_151 = arith.constant dense<0.000000e+00> : vector<16xf32>
    %319 = vector.multi_reduction <add>, %314, %cst_151 [1] : vector<16x128xf32> to vector<16xf32>
    %320 = vector.shape_cast %319 : vector<16xf32> to vector<16x1xf32>
    %cst_152 = arith.constant 1.280000e+02 : f32
    %321 = vector.broadcast %cst_152 : f32 to vector<16x1xf32>
    %322 = arith.divf %320, %321 : vector<16x1xf32>
    %323 = vector.broadcast %322 : vector<16x1xf32> to vector<16x128xf32>
    %324 = arith.subf %314, %323 : vector<16x128xf32>
    %325 = arith.mulf %324, %324 : vector<16x128xf32>
    %cst_153 = arith.constant dense<0.000000e+00> : vector<16xf32>
    %326 = vector.multi_reduction <add>, %325, %cst_153 [1] : vector<16x128xf32> to vector<16xf32>
    %327 = vector.shape_cast %326 : vector<16xf32> to vector<16x1xf32>
    %cst_154 = arith.constant 1.280000e+02 : f32
    %328 = vector.broadcast %cst_154 : f32 to vector<16x1xf32>
    %329 = arith.divf %327, %328 : vector<16x1xf32>
    %330 = vector.broadcast %322 : vector<16x1xf32> to vector<16x128xf32>
    %331 = arith.subf %314, %330 : vector<16x128xf32>
    %cst_155 = arith.constant 9.99999974E-6 : f32
    %332 = vector.broadcast %cst_155 : f32 to vector<16x1xf32>
    %333 = arith.addf %329, %332 : vector<16x1xf32>
    %334 = math.rsqrt %333 : vector<16x1xf32>
    %335 = vector.broadcast %334 : vector<16x1xf32> to vector<16x128xf32>
    %336 = arith.mulf %331, %335 : vector<16x128xf32>
    %337 = vector.broadcast %316 : vector<1x128xf32> to vector<16x128xf32>
    %338 = arith.mulf %336, %337 : vector<16x128xf32>
    %339 = vector.broadcast %318 : vector<1x128xf32> to vector<16x128xf32>
    %340 = arith.addf %338, %339 : vector<16x128xf32>
    %341 = arith.truncf %340 : vector<16x128xf32> to vector<16x128xbf16>
    %c1_156 = arith.constant 1 : index
    %c0_157 = arith.constant 0 : index
    %c0_158 = arith.constant 0 : index
    %342 = vector.load %arg10[%c1_156, %c0_157, %c0_158] : memref<2x128x2048xbf16, #tpu.memory_space<vmem>>, vector<1x128x2048xbf16>
    %343 = vector.shape_cast %342 : vector<1x128x2048xbf16> to vector<128x2048xbf16>
    %cst_159 = arith.constant dense<0.000000e+00> : vector<16x2048xf32>
    %344 = tpu.matmul %341, %343, %cst_159 {dimension_numbers = #tpu.dot_dimension_numbers<[1], [0], [0], [1], [0, 0, 1, 1], [], []>} : vector<16x128xbf16>, vector<128x2048xbf16>, vector<16x2048xf32> -> vector<16x2048xf32>
    %c1_160 = arith.constant 1 : index
    %c0_161 = arith.constant 0 : index
    %c0_162 = arith.constant 0 : index
    %345 = vector.load %arg11[%c1_160, %c0_161, %c0_162] : memref<2x1x2048xf32, #tpu.memory_space<vmem>>, vector<1x1x2048xf32>
    %346 = vector.shape_cast %345 : vector<1x1x2048xf32> to vector<1x2048xf32>
    %347 = vector.broadcast %346 : vector<1x2048xf32> to vector<16x2048xf32>
    %348 = arith.addf %344, %347 : vector<16x2048xf32>
    %cst_163 = arith.constant 0.000000e+00 : f32
    %349 = vector.broadcast %cst_163 : f32 to vector<16x2048xf32>
    %350 = arith.maximumf %348, %349 : vector<16x2048xf32>
    %351 = arith.truncf %350 : vector<16x2048xf32> to vector<16x2048xbf16>
    %c1_164 = arith.constant 1 : index
    %c0_165 = arith.constant 0 : index
    %c0_166 = arith.constant 0 : index
    %352 = vector.load %arg12[%c1_164, %c0_165, %c0_166] : memref<2x2048x128xbf16, #tpu.memory_space<vmem>>, vector<1x2048x128xbf16>
    %353 = vector.shape_cast %352 : vector<1x2048x128xbf16> to vector<2048x128xbf16>
    %cst_167 = arith.constant dense<0.000000e+00> : vector<16x128xf32>
    %354 = tpu.matmul %351, %353, %cst_167 {dimension_numbers = #tpu.dot_dimension_numbers<[1], [0], [0], [1], [0, 0, 1, 1], [], []>} : vector<16x2048xbf16>, vector<2048x128xbf16>, vector<16x128xf32> -> vector<16x128xf32>
    %c1_168 = arith.constant 1 : index
    %c0_169 = arith.constant 0 : index
    %c0_170 = arith.constant 0 : index
    %355 = vector.load %arg13[%c1_168, %c0_169, %c0_170] : memref<2x1x128xf32, #tpu.memory_space<vmem>>, vector<1x1x128xf32>
    %356 = vector.shape_cast %355 : vector<1x1x128xf32> to vector<1x128xf32>
    %357 = vector.broadcast %356 : vector<1x128xf32> to vector<16x128xf32>
    %358 = arith.addf %354, %357 : vector<16x128xf32>
    %359 = arith.addf %340, %358 : vector<16x128xf32>
    %c1_171 = arith.constant 1 : index
    %c0_172 = arith.constant 0 : index
    %c0_173 = arith.constant 0 : index
    %360 = vector.load %arg14[%c1_171, %c0_172, %c0_173] : memref<2x1x128xf32, #tpu.memory_space<vmem>>, vector<1x1x128xf32>
    %361 = vector.shape_cast %360 : vector<1x1x128xf32> to vector<1x128xf32>
    %c1_174 = arith.constant 1 : index
    %c0_175 = arith.constant 0 : index
    %c0_176 = arith.constant 0 : index
    %362 = vector.load %arg15[%c1_174, %c0_175, %c0_176] : memref<2x1x128xf32, #tpu.memory_space<vmem>>, vector<1x1x128xf32>
    %363 = vector.shape_cast %362 : vector<1x1x128xf32> to vector<1x128xf32>
    %cst_177 = arith.constant dense<0.000000e+00> : vector<16xf32>
    %364 = vector.multi_reduction <add>, %359, %cst_177 [1] : vector<16x128xf32> to vector<16xf32>
    %365 = vector.shape_cast %364 : vector<16xf32> to vector<16x1xf32>
    %cst_178 = arith.constant 1.280000e+02 : f32
    %366 = vector.broadcast %cst_178 : f32 to vector<16x1xf32>
    %367 = arith.divf %365, %366 : vector<16x1xf32>
    %368 = vector.broadcast %367 : vector<16x1xf32> to vector<16x128xf32>
    %369 = arith.subf %359, %368 : vector<16x128xf32>
    %370 = arith.mulf %369, %369 : vector<16x128xf32>
    %cst_179 = arith.constant dense<0.000000e+00> : vector<16xf32>
    %371 = vector.multi_reduction <add>, %370, %cst_179 [1] : vector<16x128xf32> to vector<16xf32>
    %372 = vector.shape_cast %371 : vector<16xf32> to vector<16x1xf32>
    %cst_180 = arith.constant 1.280000e+02 : f32
    %373 = vector.broadcast %cst_180 : f32 to vector<16x1xf32>
    %374 = arith.divf %372, %373 : vector<16x1xf32>
    %375 = vector.broadcast %367 : vector<16x1xf32> to vector<16x128xf32>
    %376 = arith.subf %359, %375 : vector<16x128xf32>
    %cst_181 = arith.constant 9.99999974E-6 : f32
    %377 = vector.broadcast %cst_181 : f32 to vector<16x1xf32>
    %378 = arith.addf %374, %377 : vector<16x1xf32>
    %379 = math.rsqrt %378 : vector<16x1xf32>
    %380 = vector.broadcast %379 : vector<16x1xf32> to vector<16x128xf32>
    %381 = arith.mulf %376, %380 : vector<16x128xf32>
    %382 = vector.broadcast %361 : vector<1x128xf32> to vector<16x128xf32>
    %383 = arith.mulf %381, %382 : vector<16x128xf32>
    %384 = vector.broadcast %363 : vector<1x128xf32> to vector<16x128xf32>
    %385 = arith.addf %383, %384 : vector<16x128xf32>
    %386 = vector.shape_cast %385 : vector<16x128xf32> to vector<2x8x128xf32>
    %cst_182 = arith.constant dense<0.000000e+00> : vector<2x128xf32>
    %387 = vector.multi_reduction <add>, %386, %cst_182 [1] : vector<2x8x128xf32> to vector<2x128xf32>
    %cst_183 = arith.constant 8.000000e+00 : f32
    %388 = vector.broadcast %cst_183 : f32 to vector<2x128xf32>
    %389 = arith.divf %387, %388 : vector<2x128xf32>
    %390 = arith.truncf %389 : vector<2x128xf32> to vector<2x128xbf16>
    %c0_184 = arith.constant 0 : index
    %c0_185 = arith.constant 0 : index
    %391 = vector.load %arg16[%c0_184, %c0_185] : memref<128x64xbf16, #tpu.memory_space<vmem>>, vector<128x64xbf16>
    %cst_186 = arith.constant dense<0.000000e+00> : vector<2x64xf32>
    %392 = tpu.matmul %390, %391, %cst_186 {dimension_numbers = #tpu.dot_dimension_numbers<[1], [0], [0], [1], [0, 0, 1, 1], [], []>} : vector<2x128xbf16>, vector<128x64xbf16>, vector<2x64xf32> -> vector<2x64xf32>
    %c0_187 = arith.constant 0 : index
    %c0_188 = arith.constant 0 : index
    %393 = vector.load %arg17[%c0_187, %c0_188] : memref<1x64xf32, #tpu.memory_space<vmem>>, vector<1x64xf32>
    %394 = vector.broadcast %393 : vector<1x64xf32> to vector<2x64xf32>
    %395 = arith.addf %392, %394 : vector<2x64xf32>
    %cst_189 = arith.constant 0.000000e+00 : f32
    %396 = vector.broadcast %cst_189 : f32 to vector<2x64xf32>
    %397 = arith.maximumf %395, %396 : vector<2x64xf32>
    %c0_190 = arith.constant 0 : index
    %c0_191 = arith.constant 0 : index
    %398 = vector.load %arg18[%c0_190, %c0_191] : memref<1x64xf32, #tpu.memory_space<vmem>>, vector<1x64xf32>
    %399 = vector.broadcast %398 : vector<1x64xf32> to vector<2x64xf32>
    %400 = arith.mulf %397, %399 : vector<2x64xf32>
    %cst_192 = arith.constant dense<0.000000e+00> : vector<2xf32>
    %401 = vector.multi_reduction <add>, %400, %cst_192 [1] : vector<2x64xf32> to vector<2xf32>
    %402 = vector.shape_cast %401 : vector<2xf32> to vector<2x1xf32>
    %c0_193 = arith.constant 0 : index
    %c0_194 = arith.constant 0 : index
    %403 = vector.load %arg19[%c0_193, %c0_194] : memref<1x1xf32, #tpu.memory_space<vmem>>, vector<1x1xf32>
    %404 = vector.broadcast %403 : vector<1x1xf32> to vector<2x1xf32>
    %405 = arith.addf %402, %404 : vector<2x1xf32>
    %c0_195 = arith.constant 0 : index
    %c0_196 = arith.constant 0 : index
    %406 = vector.load %arg20[%c0_195, %c0_196] : memref<2x1xf32, #tpu.memory_space<vmem>>, vector<2x1xf32>
    tpu.vector_store %arg20[%c0_195, %c0_196], %405 {strides = array<i32>} : memref<2x1xf32, #tpu.memory_space<vmem>>, vector<2x1xf32>,
    return
  }
}

</mosaic_0001>

<bundles_post_ra>
// kernel: survival_transformer_forward.1
= control target key start
LH: loop header
LB: loop body
LE: loop exit
PB: predicated region body
PF: predicated region fallthrough
CT: control target
= control target key end

     0   :  { %v10510_v0 = vmov 0.0   ;;  %vm10511_vm0 = vmmov 0   ;;  %vm86_vm1 = vcmask 130048   ;;  %v10512_v29 = vmov 0   ;;  %s10513_s27 = smov 96   ;;  %s10514_s28 = smov 64   ;;  %s12948_s2 = inlined_call_operand.vmem [shape: bf16[16,128], index: 2, kind: input, shape index: {}]   ;;  %s12949_s0 = inlined_call_operand.vmem [shape: f32[16,16], index: 0, kind: input, shape index: {}]   ;;  %s12950_s4 = inlined_call_operand.vmem [shape: bf16[2,128,384], index: 4, kind: input, shape index: {}]   ;;  %s12951_s3 = inlined_call_operand.vmem [shape: f32[1,128], index: 3, kind: input, shape index: {}]   ;;  %s12952_s1 = inlined_call_operand.vmem [shape: f32[8,128], index: 1, kind: input, shape index: {}]   ;;  %s12953_s5 = inlined_call_operand.vmem [shape: f32[2,1,384], index: 5, kind: input, shape index: {}]   ;;  %s12954_s6 = inlined_call_operand.vmem [shape: bf16[2,128,128], index: 6, kind: input, shape index: {}]   ;;  %s12955_s7 = inlined_call_operand.vmem [shape: f32[2,1,128], index: 7, kind: input, shape index: {}]   ;;  %s12956_s10 = inlined_call_operand.vmem [shape: bf16[2,128,2048], index: 10, kind: input, shape index: {}]   ;;  %s12957_s12 = inlined_call_operand.vmem [shape: bf16[2,2048,128], index: 12, kind: input, shape index: {}]   ;;  %s12958_s8 = inlined_call_operand.vmem [shape: f32[2,1,128], index: 8, kind: input, shape index: {}]   ;;  %s12959_s9 = inlined_call_operand.vmem [shape: f32[2,1,128], index: 9, kind: input, shape index: {}]   ;;  %s12960_s11 = inlined_call_operand.vmem [shape: f32[2,1,2048], index: 11, kind: input, shape index: {}]   ;;  %s12961_s13 = inlined_call_operand.vmem [shape: f32[2,1,128], index: 13, kind: input, shape index: {}]   ;;  %s12962_s14 = inlined_call_operand.vmem [shape: f32[2,1,128], index: 14, kind: input, shape index: {}]   ;;  %s12963_s15 = inlined_call_operand.vmem [shape: f32[2,1,128], index: 15, kind: input, shape index: {}]   ;;  %s12964_s16 = inlined_call_operand.vmem [shape: bf16[128,64], index: 16, kind: input, shape index: {}]   ;;  %s12965_s19 = inlined_call_operand.<no memory space> [shape: f32[1,1], index: 19, kind: input, shape index: {}]   ;;  %s12966_s17 = inlined_call_operand.vmem [shape: f32[1,64], index: 17, kind: input, shape index: {}]   ;;  %s12967_s18 = inlined_call_operand.vmem [shape: f32[1,64], index: 18, kind: input, shape index: {}]   ;;  %s12968_s20 = inlined_call_operand.vmem [shape: f32[2,1], index: 20, kind: output, shape index: {}]  }
   0x1   :  { %12971 = sst [smem:[#allocation4_spill]] %s12948_s2  ;;  %9721 = vmatprep.subr.bf16.mxu0 %v10510_v0  ;;  %9723 = vmatprep.mubr.msk.bf16.mxu0 %vm10511_vm0, %v10510_v0  ;;  %v134_v41 = vlaneseq  ;;  %v210_v44 = vld [vmem:[%s12953_s5] sm:$0x7]  ;;  %vm439_vm2 = vcmask 261120   ;;  %s10515_s29 = smov 32   ;;  %vm850_vm6 = vcmask 523520  }
   0x2   :  { %12972 = sst [smem:[#allocation5_spill]] %s12949_s0  ;;  %s12976_s23 = sld [smem:[#allocation4_spill]]  ;;  %387 = vmatprep.mubr.bf16.mxu1 %v10512_v29  ;;  %vm10756_vm3 = vmpackc.low %vm439_vm2, %vm439_vm2  ;;  %vm1065_vm7 = vcmask 785920   ;;  %vm1280_vm8 = vcmask 1048320   ;;  %vm8048_vm9 = vcmask 1041409   ;;  %vm8149_vm10 = vcmask 517120  }
   0x3   :  { %12973 = sst [smem:[#allocation6_spill]] %s12950_s4  ;;  %s12977_s25 = sld [smem:[#allocation5_spill]]  ;;  %v10729_v42 = vshrl.u32 %v134_v41, 7  ;;  %vm8161_vm11 = vcmask 1024  }
   0x4   :  { %12974 = sst [smem:[#allocation7_spill]] %s12951_s3 }
   0x5   :  { %12975 = sst [smem:[#allocation8_spill]] %s12952_s1  ;;  %s12978_s1 = sld [smem:[#allocation6_spill]]  ;;  %v10732_v43 = vsub.s32 0, %v10729_v42  ;;  %v10738_v45 = vsub.s32 2, %v10729_v42  ;;  %v10741_v46 = vsub.s32 1, %v10729_v42 }
   0x7   :  { %v215_v47 = vrot.slane %v210_v44, %v10732_v43  ;;  %v223_v48 = vrot.slane %v210_v44, %v10738_v45  ;;  %v219_v51 = vrot.slane %v210_v44, %v10741_v46 }
   0x8   :  { %v10085_v1 = vld [vmem:[%s12976_s23] sm:$0xff]   ;;  %s12979_s23 = sld [smem:[#allocation7_spill]] }
   0x9   :  { %v68_v2 = vld [vmem:[%s12977_s25] sm:$0xff]  ;;  %v69_v3 = vld [vmem:[%s12977_s25 + $0x8] sm:$0xff]  ;;  %9722 = vmatpush3.bf16.msra.mxu0 %v10085_v1  ;;  %s12980_s25 = sld [smem:[#allocation8_spill]] }
   0xa   :  { %v70_v4 = vpack.c.bf16 %v69_v3, %v68_v2  ;;  %9727 = vmatprep.subr.bf16.mxu0 %v10510_v0 }
   0xb   :  { %v10086_v5 = vld [vmem:[%s12978_s1 + $0x4] ss:$12 sps:$4 sm:$0xff]   ;;  %v10088_v6 = vld [vmem:[%s12978_s1] ss:$12 sps:$4 sm:$0xff]   ;;  %v10089_v7 = vld [vmem:[%s12978_s1 + $0x8] ss:$12 sps:$4 sm:$0xff]  }
   0xc   :  { %355 = vmatprep.subr.bf16.mxu1 %v10086_v5  ;;  %v10090_v8 = vld [vmem:[%s12978_s1 + $0x1c] ss:$12 sps:$4 sm:$0xff]   ;;  %9724 = vmatmul.mubr.msk.bf16.vlgmr.msra.gmra.mrb[0].mxu0 %vm86_vm1, %v70_v4  ;;  %v10092_v9 = vld [vmem:[%s12978_s1 + $0x18] ss:$12 sps:$4 sm:$0xff]   ;;  %v10093_v10 = vld [vmem:[%s12978_s1 + $0x20] ss:$12 sps:$4 sm:$0xff]  }
   0xd   :  { %356 = vmatpush1.bf16.msra.mxu1 %v10088_v6  ;;  %9728 = vmatpush3.bf16.msra.mxu0 %v10089_v7  ;;  %v10094_v11 = vld [vmem:[%s12978_s1 + $0x34] ss:$12 sps:$4 sm:$0xff]   ;;  %v10096_v12 = vld [vmem:[%s12978_s1 + $0x30] ss:$12 sps:$4 sm:$0xff]   ;;  %v10097_v13 = vld [vmem:[%s12978_s1 + $0x38] ss:$12 sps:$4 sm:$0xff]  }
   0xe   :  { %357 = vmatprep.subr.bf16.mxu1 %v10090_v8  ;;  %9729 = vmatprep.subr.bf16.mxu0 %v10510_v0  ;;  %v10098_v14 = vld [vmem:[%s12978_s1 + $0x4c] ss:$12 sps:$4 sm:$0xff]   ;;  %v10100_v15 = vld [vmem:[%s12978_s1 + $0x48] ss:$12 sps:$4 sm:$0xff]   ;;  %v10101_v16 = vld [vmem:[%s12978_s1 + $0x50] ss:$12 sps:$4 sm:$0xff]  }
   0xf   :  { %9743 = vmatprep.mubr.msk.bf16.mxu0 %vm10511_vm0, %v10510_v0  ;;  %v10102_v17 = vld [vmem:[%s12978_s1 + $0x64] ss:$12 sps:$4 sm:$0xff]   ;;  %v10104_v18 = vld [vmem:[%s12978_s1 + $0x60] ss:$12 sps:$4 sm:$0xff]   ;;  %v10105_v19 = vld [vmem:[%s12978_s1 + $0x68] ss:$12 sps:$4 sm:$0xff]  }
  0x10   :  { %v10106_v20 = vld [vmem:[%s12978_s1 + $0x7c] ss:$12 sps:$4 sm:$0xff]   ;;  %v10108_v21 = vld [vmem:[%s12978_s1 + $0x78] ss:$12 sps:$4 sm:$0xff]   ;;  %v10109_v22 = vld [vmem:[%s12978_s1 + $0x80] ss:$12 sps:$4 sm:$0xff]  }
  0x11   :  { %358 = vmatpush1.bf16.msra.mxu1 %v10092_v9  ;;  %9730 = vmatpush3.bf16.msra.mxu0 %v10093_v10  ;;  %v10110_v23 = vld [vmem:[%s12978_s1 + $0x94] ss:$12 sps:$4 sm:$0xff]   ;;  %v10112_v24 = vld [vmem:[%s12978_s1 + $0x90] ss:$12 sps:$4 sm:$0xff]   ;;  %v10113_v25 = vld [vmem:[%s12978_s1 + $0x98] ss:$12 sps:$4 sm:$0xff]  }
  0x12   :  { %359 = vmatprep.subr.bf16.mxu1 %v10094_v11  ;;  %9731 = vmatprep.subr.bf16.mxu0 %v10510_v0  ;;  %v10114_v26 = vld [vmem:[%s12978_s1 + $0xac] ss:$12 sps:$4 sm:$0xff]   ;;  %v10116_v27 = vld [vmem:[%s12978_s1 + $0xa8] ss:$12 sps:$4 sm:$0xff]   ;;  %v10117_v28 = vld [vmem:[%s12978_s1 + $0xb0] ss:$12 sps:$4 sm:$0xff]  }
  0x13   :  { %v8167_v30 = vld [vmem:[%s12979_s23] ss:$0 sm:$0xff] }
  0x14   :  { %v131_v34 = vld [vmem:[%s12980_s25] sm:$0xff] }
  0x15   :  { %360 = vmatpush1.bf16.msra.mxu1 %v10096_v12  ;;  %9732 = vmatpush3.bf16.msra.mxu0 %v10097_v13  ;;  %v136_v12 = vadd.s32 8, %v10729_v42  ;;  %v162_v13 = vand.u32 127, %v134_v41 }
  0x16   :  { %361 = vmatprep.subr.bf16.mxu1 %v10098_v14  ;;  %9733 = vmatprep.subr.bf16.mxu0 %v10510_v0 }
  0x17   :  { %v148_v14 = vand.u32 7, %v136_v12 }
  0x19   :  { %362 = vmatpush1.bf16.msra.mxu1 %v10100_v15  ;;  %9734 = vmatpush3.bf16.msra.mxu0 %v10101_v16  ;;  %v167_v15 = vand.u32 7, %v162_v13  ;;  %v141_v16 = vand.u32 7, %v10729_v42 }
  0x1a   :  { %363 = vmatprep.subr.bf16.mxu1 %v10102_v17  ;;  %9735 = vmatprep.subr.bf16.mxu0 %v10510_v0 }
  0x1b   :  { %vm10782_vm4 = vcmp.eq.s32.totalorder %v148_v14, %v167_v15  ;;  %vm10786_vm5 = vcmp.eq.s32.totalorder %v141_v16, %v167_v15 }
  0x1d   :  { %364 = vmatpush1.bf16.msra.mxu1 %v10104_v18  ;;  %9736 = vmatpush3.bf16.msra.mxu0 %v10105_v19 }
  0x1e   :  { %365 = vmatprep.subr.bf16.mxu1 %v10106_v20  ;;  %9737 = vmatprep.subr.bf16.mxu0 %v10510_v0 }
  0x21   :  { %366 = vmatpush1.bf16.msra.mxu1 %v10108_v21  ;;  %9738 = vmatpush3.bf16.msra.mxu0 %v10109_v22 }
  0x22   :  { %9739 = vmatprep.subr.bf16.mxu0 %v10510_v0  ;;  %367 = vmatprep.subr.bf16.mxu1 %v10110_v23 }
  0x25   :  { %368 = vmatpush1.bf16.msra.mxu1 %v10112_v24  ;;  %9740 = vmatpush3.bf16.msra.mxu0 %v10113_v25 }
  0x26   :  { %9741 = vmatprep.subr.bf16.mxu0 %v10510_v0  ;;  %369 = vmatprep.subr.bf16.mxu1 %v10114_v26 }
  0x29   :  { %370 = vmatpush1.bf16.msra.mxu1 %v10116_v27  ;;  %9742 = vmatpush3.bf16.msra.mxu0 %v10117_v28 }
  0xdf   :  { %v124_v31 = vpop.f32.mrb[0].mxu0 }
  0xe0   :  { %v125_v32 = vadd.f32 %v8167_v30, %v124_v31  ;;  %v9725_v33 = vpop.f32.mrb[1].mxu0 }
  0xe1   :  { %v127_v35 = vpop.f32.mrb[2].mxu0 }
  0xe2   :  { %v128_v36 = vadd.f32 %v8167_v30, %v127_v35  ;;  %v9726_v37 = vpop.f32.mrb[3].mxu0  ;;  %v10723_v38 = vadd.f32 %v131_v34, %v125_v32 }
  0xe4   :  { %v10725_v39 = vadd.f32 %v131_v34, %v128_v36 }
  0xe6   :  { %v177_v40 = vpack.c.bf16 %v10725_v39, %v10723_v38 }
  0xe8   :  { %388 = vmatmul.mubr.bf16.vlgmr.msra.gmra.mrb[0].mxu1 %v177_v40  ;;  %9744 = vmatmul.mubr.bf16.vlgmr.msra.gmra.mrb[4].mxu0 %v177_v40 }
 0x1bb   :  { %v389_v49 = vpop.f32.mrb[0].mxu1  ;;  %v432_v50 = vpop.f32.mrb[4].mxu0 }
 0x1bc   :  { %v10746_v52 = vadd.f32 %v389_v49, %v215_v47  ;;  %v391_v53 = vpop.f32.mrb[1].mxu1  ;;  %v9745_v54 = vpop.f32.mrb[5].mxu0  ;;  %v433_v57 = vadd.f32 %v432_v50, %v223_v48 }
 0x1bd   :  { %v393_v55 = vpop.f32.mrb[2].mxu1  ;;  %v435_v56 = vpop.f32.mrb[6].mxu0  ;;  %v392_v62 = vadd.f32 %v391_v53, %v219_v51 }
 0x1be   :  { %v10748_v58 = vadd.f32 %v393_v55, %v215_v47  ;;  %v436_v59 = vadd.f32 %v435_v56, %v223_v48  ;;  %v395_v60 = vpop.f32.mrb[3].mxu1  ;;  %v9746_v61 = vpop.f32.mrb[7].mxu0  ;;  %9751 = vmatprep.mubr.msk.f32.mxu1 %vm439_vm2, %v10746_v52 }
 0x1bf   :  { %v396_v63 = vadd.f32 %v395_v60, %v219_v51 }
 0x1c0   :  { %638 = vrot.lane.b32.xlu1 %v10748_v58, %s10513_s27  ;;  %v9945_v1 = vpack.c.bf16 %v436_v59, %v433_v57  ;;  %v10760_v3 = vpack.i.bf16 %v436_v59, %v433_v57 }
 0x1c1   :  { %v10762_v4 = vpack.i.bf16 %v396_v63, %v392_v62  ;;  %v9939_v5 = vpack.c.bf16 %v396_v63, %v392_v62 }
 0x1c2   :  { %9946 = vmatprep.subr.bf16.mxu0 %v9945_v1 }
 0x1c3   :  { %10026 = vrot.lane.b32.xlu0 %v10762_v4, %s10513_s27  ;;  %9941 = vmatprep.subr.msk.bf16.mxu1 %vm10756_vm3, %v9939_v5 }
 0x1c4   :  { %9948 = vmatpush3.bf16.msra.mxu0 %v9945_v1  ;;  %9944 = vmatpush3.bf16.xpose.msk.msra.mxu1 %vm10756_vm3, %v9939_v5 }
 0x1c7   :  { %636 = vrot.lane.b32.xlu0 %v10746_v52, %s10513_s27 }
 0x1cb   :  { %9752 = vmatmul.mubr.msk.f32.vlgmr.msra.gmra.mrb[4].mxu1 %vm439_vm2, %v10748_v58 }
 0x232   :  { %v639_v11 = vpop.permute.xlu1 %638 }
 0x235   :  { %v10027_v6 = vpop.permute.xlu0 %10026 }
 0x236   :  { %v10029_v7 = vunpack.i.h.bf16 %v10027_v6  ;;  %v10028_v8 = vunpack.i.l.bf16 %v10027_v6 }
 0x238   :  { %v9949_v9 = vpack.c.bf16 %v10029_v7, %v10028_v8 }
 0x239   :  { %v637_v10 = vpop.permute.xlu0 %636 }
 0x23a   :  { %9951 = vmatprep.subr.msk.bf16.mxu1 %vm10756_vm3, %v9949_v9  ;;  %9765 = vmatprep.mubr.msk.f32.mxu1 %vm439_vm2, %v637_v10 }
 0x23b   :  { %9954 = vmatpush3.bf16.xpose.msk.msra.mxu1 %vm10756_vm3, %v9949_v9 }
 0x242   :  { %9766 = vmatmul.mubr.msk.f32.vlgmr.msra.gmra.mrb[6].mxu1 %vm439_vm2, %v639_v11 }
 0x29e   :  { %v9753_v17 = vpop.f32.mrb[4].mxu1 }
 0x29f   :  { %v528_v19 = vmul.f32 0.17677669, %v9753_v17  ;;  %v518_v20 = vpop.f32.mrb[5].mxu1 }
 0x2a0   :  { %v527_v22 = vmul.f32 0.17677669, %v518_v20 }
 0x2a1   :  { %v530_v23 = vsel %vm10782_vm4, %v528_v19, -1e+30 }
 0x2a2   :  { %v534_v24 = vsel %vm86_vm1, %v530_v23, -inf  ;;  %v529_v25 = vsel %vm10786_vm5, %v527_v22, -1e+30 }
 0x2a3   :  { %535 = vmax.xlane.f32.xlu0 %v534_v24  ;;  %v531_v26 = vsel %vm86_vm1, %v529_v25, -inf }
 0x2a4   :  { %532 = vmax.xlane.f32.xlu1 %v531_v26 }
 0x315   :  { %v9767_v27 = vpop.f32.mrb[6].mxu1 }
 0x316   :  { %v728_v28 = vmul.f32 0.17677669, %v9767_v27  ;;  %v718_v30 = vpop.f32.mrb[7].mxu1 }
 0x317   :  { %v727_v31 = vmul.f32 0.17677669, %v718_v30 }
 0x318   :  { %v730_v32 = vsel %vm10782_vm4, %v728_v28, -1e+30 }
 0x319   :  { %v734_v33 = vsel %vm86_vm1, %v730_v32, -inf  ;;  %v729_v34 = vsel %vm10786_vm5, %v727_v31, -1e+30 }
 0x31a   :  { %735 = vmax.xlane.f32.xlu1 %v734_v33  ;;  %v731_v35 = vsel %vm86_vm1, %v729_v34, -inf }
 0x31b   :  { %732 = vmax.xlane.f32.xlu0 %v731_v35 }
 0x330   :  { %v536_v36 = vpop.xlane.xlu0 %535 }
 0x331   :  { %v538_v37 = vsub.f32 %v530_v23, %v536_v36  ;;  %v533_v40 = vpop.xlane.xlu1 %532 }
 0x332   :  { %v537_v41 = vsub.f32 %v529_v25, %v533_v40 }
 0x333   :  { %v541_v44 = vmul.f32 1.442695, %v538_v37 }
 0x334   :  { %v539_v47 = vmul.f32 1.442695, %v537_v41 }
 0x335   :  { %10430 = vpow2.f32 %v541_v44 }
 0x336   :  { %10432 = vpow2.f32 %v539_v47 }
 0x33f   :  { %v10431_v48 = vpop.eup %10430 }
 0x340   :  { %v10433_v49 = vpop.eup %10432  ;;  %v546_v50 = vsel %vm86_vm1, %v10431_v48, 0.0 }
 0x341   :  { %547 = vadd.xlane.f32.xlu1 %v546_v50  ;;  %v543_v51 = vsel %vm86_vm1, %v10433_v49, 0.0 }
 0x342   :  { %544 = vadd.xlane.f32.xlu0 %v543_v51 }
 0x3a7   :  { %v736_v53 = vpop.xlane.xlu1 %735 }
 0x3a8   :  { %v738_v54 = vsub.f32 %v730_v32, %v736_v53  ;;  %v733_v55 = vpop.xlane.xlu0 %732 }
 0x3a9   :  { %v737_v56 = vsub.f32 %v729_v34, %v733_v55 }
 0x3aa   :  { %v741_v57 = vmul.f32 1.442695, %v738_v54 }
 0x3ab   :  { %v739_v59 = vmul.f32 1.442695, %v737_v56 }
 0x3ac   :  { %10434 = vpow2.f32 %v741_v57 }
 0x3ad   :  { %10436 = vpow2.f32 %v739_v59 }
 0x3b6   :  { %v10435_v60 = vpop.eup %10434 }
 0x3b7   :  { %v10437_v61 = vpop.eup %10436  ;;  %v746_v62 = vsel %vm86_vm1, %v10435_v60, 0.0 }
 0x3b8   :  { %747 = vadd.xlane.f32.xlu1 %v746_v62  ;;  %v743_v63 = vsel %vm86_vm1, %v10437_v61, 0.0 }
 0x3b9   :  { %744 = vadd.xlane.f32.xlu0 %v743_v63 }
 0x3c9   :  { %10036 = vrot.lane.b32.xlu1 %v10762_v4, %s10514_s28 }
 0x3cd   :  { %853 = vrot.lane.b32.xlu1 %v10746_v52, %s10514_s28 }
 0x3ce   :  { %v548_v1 = vpop.xlane.xlu1 %547 }
 0x3cf   :  { %10438 = vrcp.f32 %v548_v1  ;;  %v545_v5 = vpop.xlane.xlu0 %544  ;;  %10031 = vrot.lane.b32.xlu0 %v10760_v3, %s10513_s27 }
 0x3d0   :  { %10440 = vrcp.f32 %v545_v5 }
 0x3d3   :  { %855 = vrot.lane.b32.xlu0 %v10748_v58, %s10514_s28 }
 0x3d9   :  { %v10439_v6 = vpop.eup %10438 }
 0x3da   :  { %v10441_v7 = vpop.eup %10440  ;;  %v552_v9 = vmul.f32 %v10439_v6, %v10431_v48 }
 0x3db   :  { %v551_v8 = vmul.f32 %v10441_v7, %v10433_v49 }
 0x3dd   :  { %9758 = vmatprep.mubr.msk.f32.mxu0 %vm86_vm1, %v551_v8 }
 0x3de   :  { %9759 = vmatmul.mubr.msk.f32.vlgmr.msra.gmra.mrb[8].mxu0 %vm86_vm1, %v552_v9 }
 0x445   :  { %v748_v10 = vpop.xlane.xlu1 %747 }
 0x446   :  { %10442 = vrcp.f32 %v748_v10  ;;  %v745_v11 = vpop.xlane.xlu0 %744 }
 0x447   :  { %10444 = vrcp.f32 %v745_v11 }
 0x449   :  { %v10037_v12 = vpop.permute.xlu1 %10036 }
 0x44a   :  { %v10032_v13 = vpop.permute.xlu0 %10031  ;;  %v10039_v14 = vunpack.i.h.bf16 %v10037_v12  ;;  %v10038_v15 = vunpack.i.l.bf16 %v10037_v12 }
 0x44b   :  { %v10034_v16 = vunpack.i.h.bf16 %v10032_v13  ;;  %v10033_v17 = vunpack.i.l.bf16 %v10032_v13 }
 0x44c   :  { %v9959_v20 = vpack.c.bf16 %v10039_v14, %v10038_v15 }
 0x44d   :  { %v9955_v19 = vpack.c.bf16 %v10034_v16, %v10033_v17  ;;  %v854_v26 = vpop.permute.xlu1 %853 }
 0x44e   :  { %v856_v27 = vpop.permute.xlu0 %855 }
 0x44f   :  { %9956 = vmatprep.subr.bf16.mxu0 %v9955_v19 }
 0x450   :  { %v10443_v22 = vpop.eup %10442  ;;  %9958 = vmatpush3.bf16.msra.mxu0 %v9955_v19 }
 0x451   :  { %v10445_v23 = vpop.eup %10444  ;;  %9961 = vmatprep.subr.msk.bf16.mxu0 %vm10756_vm3, %v9959_v20  ;;  %v752_v25 = vmul.f32 %v10443_v22, %v10435_v60 }
 0x452   :  { %v751_v24 = vmul.f32 %v10445_v23, %v10437_v61 }
 0x454   :  { %9772 = vmatprep.mubr.msk.f32.mxu0 %vm86_vm1, %v751_v24 }
 0x455   :  { %9773 = vmatmul.mubr.msk.f32.vlgmr.msra.gmra.mrb[10].mxu0 %vm86_vm1, %v752_v25 }
 0x456   :  { %9779 = vmatprep.mubr.msk.f32.mxu0 %vm439_vm2, %v854_v26 }
 0x459   :  { %9964 = vmatpush3.bf16.xpose.msk.msra.mxu0 %vm10756_vm3, %v9959_v20 }
 0x460   :  { %9780 = vmatmul.mubr.msk.f32.vlgmr.msra.gmra.mrb[12].mxu0 %vm439_vm2, %v856_v27 }
 0x4b1   :  { %v9760_v28 = vpop.f32.mrb[8].mxu0 }
 0x4b2   :  { %635 = vst.msk [vmem:[#allocation2 + $0x8] sm:$0xff] %vm439_vm2, %v9760_v28  ;;  %v625_v30 = vpop.f32.mrb[9].mxu0 }
 0x4b3   :  { %634 = vst.msk [vmem:[#allocation2] sm:$0xff] %vm439_vm2, %v625_v30 }
 0x528   :  { %v10826_v31 = vpop.f32.mrb[10].mxu0 }
 0x529   :  { %v10828_v32 = vpop.f32.mrb[11].mxu0 }
 0x533   :  { %v9781_v33 = vpop.f32.mrb[12].mxu0 }
 0x534   :  { %v945_v34 = vmul.f32 0.17677669, %v9781_v33  ;;  %v935_v35 = vpop.f32.mrb[13].mxu0 }
 0x535   :  { %v944_v36 = vmul.f32 0.17677669, %v935_v35 }
 0x536   :  { %v947_v37 = vsel %vm10782_vm4, %v945_v34, -1e+30 }
 0x537   :  { %v951_v40 = vsel %vm86_vm1, %v947_v37, -inf  ;;  %v946_v41 = vsel %vm10786_vm5, %v944_v36, -1e+30 }
 0x538   :  { %952 = vmax.xlane.f32.xlu0 %v951_v40  ;;  %v948_v44 = vsel %vm86_vm1, %v946_v41, -inf }
 0x539   :  { %949 = vmax.xlane.f32.xlu1 %v948_v44 }
 0x5c5   :  { %v953_v47 = vpop.xlane.xlu0 %952 }
 0x5c6   :  { %v955_v48 = vsub.f32 %v947_v37, %v953_v47  ;;  %v950_v49 = vpop.xlane.xlu1 %949 }
 0x5c7   :  { %v954_v50 = vsub.f32 %v946_v41, %v950_v49 }
 0x5c8   :  { %v958_v51 = vmul.f32 1.442695, %v955_v48 }
 0x5c9   :  { %v956_v53 = vmul.f32 1.442695, %v954_v50 }
 0x5ca   :  { %10446 = vpow2.f32 %v958_v51 }
 0x5cb   :  { %10448 = vpow2.f32 %v956_v53 }
 0x5d4   :  { %v10447_v54 = vpop.eup %10446 }
 0x5d5   :  { %v10449_v55 = vpop.eup %10448  ;;  %v963_v56 = vsel %vm86_vm1, %v10447_v54, 0.0 }
 0x5d6   :  { %964 = vadd.xlane.f32.xlu1 %v963_v56  ;;  %v960_v57 = vsel %vm86_vm1, %v10449_v55, 0.0  ;;  %v10119_v56 = vld [vmem:[%s12954_s6 + $0x8] sm:$0xff]  }
 0x5d7   :  { %961 = vadd.xlane.f32.xlu0 %v960_v57  ;;  %v10120_v57 = vld [vmem:[%s12954_s6 + $0x10] sm:$0xff]  }
 0x5e7   :  { %10046 = vrot.lane.b32.xlu1 %v10762_v4, %s10515_s29 }
 0x5eb   :  { %1068 = vrot.lane.b32.xlu1 %v10746_v52, %s10515_s29 }
 0x5ed   :  { %10041 = vrot.lane.b32.xlu0 %v10760_v3, %s10514_s28 }
 0x5f1   :  { %1070 = vrot.lane.b32.xlu0 %v10748_v58, %s10515_s29 }
 0x663   :  { %v965_v59 = vpop.xlane.xlu1 %964 }
 0x664   :  { %10450 = vrcp.f32 %v965_v59  ;;  %v962_v60 = vpop.xlane.xlu0 %961  ;;  %v10121_v59 = vld [vmem:[%s12954_s6 + $0x18] sm:$0xff]  }
 0x665   :  { %10452 = vrcp.f32 %v962_v60  ;;  %v10122_v60 = vld [vmem:[%s12954_s6 + $0x20] sm:$0xff]  }
 0x667   :  { %v10047_v61 = vpop.permute.xlu1 %10046 }
 0x668   :  { %v10042_v62 = vpop.permute.xlu0 %10041  ;;  %v10049_v63 = vunpack.i.h.bf16 %v10047_v61  ;;  %v10048_v1 = vunpack.i.l.bf16 %v10047_v61  ;;  %v10123_v61 = vld [vmem:[%s12954_s6 + $0x28] sm:$0xff]  }
 0x669   :  { %v10044_v5 = vunpack.i.h.bf16 %v10042_v62  ;;  %v10043_v6 = vunpack.i.l.bf16 %v10042_v62  ;;  %v10124_v62 = vld [vmem:[%s12954_s6 + $0x30] sm:$0xff]  }
 0x66a   :  { %v9969_v7 = vpack.c.bf16 %v10049_v63, %v10048_v1  ;;  %v10125_v63 = vld [vmem:[%s12954_s6 + $0x38] sm:$0xff]  }
 0x66b   :  { %v9965_v4 = vpack.c.bf16 %v10044_v5, %v10043_v6  ;;  %v1069_v10 = vpop.permute.xlu1 %1068 }
 0x66c   :  { %v1071_v11 = vpop.permute.xlu0 %1070 }
 0x66d   :  { %9966 = vmatprep.subr.bf16.mxu1 %v9965_v4 }
 0x66e   :  { %v10451_v52 = vpop.eup %10450  ;;  %9968 = vmatpush3.bf16.msra.mxu1 %v9965_v4 }
 0x66f   :  { %v10453_v8 = vpop.eup %10452  ;;  %9971 = vmatprep.subr.msk.bf16.mxu1 %vm10756_vm3, %v9969_v7  ;;  %v969_v9 = vmul.f32 %v10451_v52, %v10447_v54 }
 0x670   :  { %v968_v58 = vmul.f32 %v10453_v8, %v10449_v55  ;;  %v10118_v55 = vld [vmem:[%s12954_s6] sm:$0xff]  }
 0x672   :  { %9786 = vmatprep.mubr.msk.f32.mxu1 %vm86_vm1, %v968_v58  ;;  %v8218_v58 = vld [vmem:[%s12955_s7] ss:$0 sm:$0xff] }
 0x673   :  { %9787 = vmatmul.mubr.msk.f32.vlgmr.msra.gmra.mrb[8].mxu1 %vm86_vm1, %v969_v9 }
 0x674   :  { %9793 = vmatprep.mubr.msk.f32.mxu1 %vm439_vm2, %v1069_v10 }
 0x677   :  { %9974 = vmatpush3.bf16.xpose.msk.msra.mxu1 %vm10756_vm3, %v9969_v7 }
 0x67e   :  { %9794 = vmatmul.mubr.msk.f32.vlgmr.msra.gmra.mrb[10].mxu1 %vm439_vm2, %v1071_v11 }
 0x67f   :  { %2326 = vmatprep.mubr.bf16.mxu1 %v10512_v29 }
 0x746   :  { %v9788_v12 = vpop.f32.mrb[8].mxu1 }
 0x747   :  { %v1048_v13 = vpop.f32.mrb[9].mxu1 }
 0x751   :  { %v9795_v14 = vpop.f32.mrb[10].mxu1 }
 0x752   :  { %v1160_v15 = vmul.f32 0.17677669, %v9795_v14  ;;  %v1150_v16 = vpop.f32.mrb[11].mxu1 }
 0x753   :  { %v1159_v17 = vmul.f32 0.17677669, %v1150_v16 }
 0x754   :  { %v1162_v19 = vsel %vm10782_vm4, %v1160_v15, -1e+30 }
 0x755   :  { %v1166_v20 = vsel %vm86_vm1, %v1162_v19, -inf  ;;  %v1161_v22 = vsel %vm10786_vm5, %v1159_v17, -1e+30  ;;  %v1442_v17 = vld [vmem:[%s12956_s10] sm:$0xff] }
 0x756   :  { %1167 = vmax.xlane.f32.xlu0 %v1166_v20  ;;  %v1163_v23 = vsel %vm86_vm1, %v1161_v22, -inf  ;;  %v1443_v20 = vld [vmem:[%s12956_s10 + $0x8] sm:$0xff] }
 0x757   :  { %1164 = vmax.xlane.f32.xlu1 %v1163_v23 }
 0x7e3   :  { %v1168_v24 = vpop.xlane.xlu0 %1167 }
 0x7e4   :  { %v1170_v25 = vsub.f32 %v1162_v19, %v1168_v24  ;;  %v1165_v26 = vpop.xlane.xlu1 %1164  ;;  %v1450_v19 = vld [vmem:[%s12956_s10 + $0x40] sm:$0xff] }
 0x7e5   :  { %v1169_v27 = vsub.f32 %v1161_v22, %v1165_v26  ;;  %v8229_v22 = vcombine.low %v1442_v17, %v1450_v19  ;;  %v8230_v23 = vcombine.high %v1442_v17, %v1450_v19  ;;  %v1466_v24 = vld [vmem:[%s12956_s10 + $0xc0] sm:$0xff] }
 0x7e6   :  { %v1173_v28 = vmul.f32 1.442695, %v1170_v25  ;;  %v1538_v19 = vld [vmem:[%s12956_s10 + $0x300] sm:$0xff] }
 0x7e7   :  { %v1171_v30 = vmul.f32 1.442695, %v1169_v27  ;;  %2294 = vmatprep.subr.bf16.mxu1 %v8230_v23 }
 0x7e8   :  { %10454 = vpow2.f32 %v1173_v28  ;;  %v1459_v28 = vld [vmem:[%s12956_s10 + $0x88] sm:$0xff]  ;;  %2295 = vmatpush1.bf16.msra.mxu1 %v8229_v22 }
 0x7e9   :  { %10456 = vpow2.f32 %v1171_v30  ;;  %v1467_v30 = vld [vmem:[%s12956_s10 + $0xc8] sm:$0xff] }
 0x7ea   :  { %v1539_v22 = vld [vmem:[%s12956_s10 + $0x308] sm:$0xff] }
 0x7f2   :  { %v10455_v33 = vpop.eup %10454 }
 0x7f3   :  { %v10457_v34 = vpop.eup %10456  ;;  %v1178_v35 = vsel %vm86_vm1, %v10455_v33, 0.0 }
 0x7f4   :  { %1179 = vadd.xlane.f32.xlu1 %v1178_v35  ;;  %v1175_v36 = vsel %vm86_vm1, %v10457_v34, 0.0  ;;  %v8247_v35 = vcombine.low %v1459_v28, %v1467_v30 }
 0x7f5   :  { %1176 = vadd.xlane.f32.xlu0 %v1175_v36 }
 0x805   :  { %844 = vrot.lane.b32.xlu1 %v10828_v32, %s10515_s29 }
 0x809   :  { %846 = vrot.lane.b32.xlu1 %v10826_v31, %s10515_s29 }
 0x80b   :  { %10051 = vrot.lane.b32.xlu0 %v10760_v3, %s10515_s29 }
 0x80d   :  { %1061 = vrot.lane.b32.xlu1 %v9788_v12, %s10514_s28 }
 0x80f   :  { %1059 = vrot.lane.b32.xlu0 %v1048_v13, %s10514_s28 }
 0x881   :  { %v1180_v37 = vpop.xlane.xlu1 %1179 }
 0x882   :  { %10458 = vrcp.f32 %v1180_v37  ;;  %v1177_v40 = vpop.xlane.xlu0 %1176 }
 0x883   :  { %10460 = vrcp.f32 %v1177_v40 }
 0x885   :  { %v845_v41 = vpop.permute.xlu1 %844 }
 0x886   :  { %851 = vst.msk [vmem:[#allocation2] sm:$0xff] %vm850_vm6, %v845_v41  ;;  %v10052_v44 = vpop.permute.xlu0 %10051 }
 0x887   :  { %v10054_v32 = vunpack.i.h.bf16 %v10052_v44  ;;  %v10053_v47 = vunpack.i.l.bf16 %v10052_v44 }
 0x889   :  { %v9975_v31 = vpack.c.bf16 %v10054_v32, %v10053_v47  ;;  %v847_v48 = vpop.permute.xlu1 %846 }
 0x88a   :  { %852 = vst.msk [vmem:[#allocation2 + $0x8] sm:$0xff] %vm850_vm6, %v847_v48  ;;  %v1060_v3 = vpop.permute.xlu0 %1059  ;;  %v1474_v48 = vld [vmem:[%s12956_s10 + $0x100] sm:$0xff] }
 0x88b   :  { %1066 = vst.msk [vmem:[#allocation2] sm:$0xff] %vm1065_vm7, %v1060_v3  ;;  %9976 = vmatprep.subr.bf16.mxu0 %v9975_v31  ;;  %v1482_v3 = vld [vmem:[%s12956_s10 + $0x140] sm:$0xff] }
 0x88c   :  { %v10459_v49 = vpop.eup %10458  ;;  %9978 = vmatpush3.bf16.msra.mxu0 %v9975_v31 }
 0x88d   :  { %v10461_v50 = vpop.eup %10460  ;;  %v1062_v51 = vpop.permute.xlu1 %1061  ;;  %9803 = vmatprep.subr.bf16.mxu0 %v10510_v0  ;;  %v1184_v54 = vmul.f32 %v10459_v49, %v10455_v33  ;;  %v8248_v33 = vcombine.high %v1459_v28, %v1467_v30  ;;  %v1475_v49 = vld [vmem:[%s12956_s10 + $0x108] sm:$0xff] }
 0x88e   :  { %1067 = vst.msk [vmem:[#allocation2 + $0x8] sm:$0xff] %vm1065_vm7, %v1062_v51  ;;  %v1183_v53 = vmul.f32 %v10461_v50, %v10457_v34  ;;  %v8262_v50 = vcombine.high %v1474_v48, %v1482_v3  ;;  %v1483_v51 = vld [vmem:[%s12956_s10 + $0x148] sm:$0xff] }
 0x88f   :  { %v1555_v28 = vld [vmem:[%s12956_s10 + $0x388] sm:$0xff] }
 0x890   :  { %9800 = vmatprep.mubr.msk.f32.mxu0 %vm86_vm1, %v1183_v53  ;;  %v8261_v53 = vcombine.low %v1474_v48, %v1482_v3  ;;  %v1453_v48 = vld [vmem:[%s12956_s10 + $0x58] sm:$0xff] }
 0x891   :  { %9801 = vmatmul.mubr.msk.f32.vlgmr.msra.gmra.mrb[14].mxu0 %vm86_vm1, %v1184_v54  ;;  %v8263_v54 = vcombine.low %v1475_v49, %v1483_v51 }
 0x892   :  { %9819 = vmatprep.mubr.msk.bf16.mxu0 %vm10511_vm0, %v10510_v0  ;;  %9804 = vmatpush3.bf16.msra.mxu0 %v10118_v55  ;;  %v8264_v55 = vcombine.high %v1475_v49, %v1483_v51 }
 0x893   :  { %9805 = vmatprep.subr.bf16.mxu0 %v10510_v0 }
 0x896   :  { %9806 = vmatpush3.bf16.msra.mxu0 %v10119_v56  ;;  %v1490_v56 = vld [vmem:[%s12956_s10 + $0x180] sm:$0xff] }
 0x897   :  { %9807 = vmatprep.subr.bf16.mxu0 %v10510_v0 }
 0x89a   :  { %9808 = vmatpush3.bf16.msra.mxu0 %v10120_v57  ;;  %v1498_v57 = vld [vmem:[%s12956_s10 + $0x1c0] sm:$0xff] }
 0x89b   :  { %9809 = vmatprep.subr.bf16.mxu0 %v10510_v0 }
 0x89e   :  { %9810 = vmatpush3.bf16.msra.mxu0 %v10121_v59  ;;  %v1491_v59 = vld [vmem:[%s12956_s10 + $0x188] sm:$0xff] }
 0x89f   :  { %9811 = vmatprep.subr.bf16.mxu0 %v10510_v0 }
 0x8a2   :  { %9812 = vmatpush3.bf16.msra.mxu0 %v10122_v60  ;;  %v8278_v60 = vcombine.high %v1490_v56, %v1498_v57 }
 0x8a3   :  { %9813 = vmatprep.subr.bf16.mxu0 %v10510_v0 }
 0x8a6   :  { %9814 = vmatpush3.bf16.msra.mxu0 %v10123_v61  ;;  %v1499_v61 = vld [vmem:[%s12956_s10 + $0x1c8] sm:$0xff] }
 0x8a7   :  { %9815 = vmatprep.subr.bf16.mxu0 %v10510_v0 }
 0x8aa   :  { %9816 = vmatpush3.bf16.msra.mxu0 %v10124_v62  ;;  %v8277_v62 = vcombine.low %v1490_v56, %v1498_v57 }
 0x8ab   :  { %9817 = vmatprep.subr.bf16.mxu0 %v10510_v0 }
 0x8ae   :  { %9818 = vmatpush3.bf16.msra.mxu0 %v10125_v63  ;;  %v8279_v63 = vcombine.low %v1491_v59, %v1499_v61 }
 0x964   :  { %v9802_v1 = vpop.f32.mrb[14].mxu0 }
 0x965   :  { %1276 = vrot.lane.b32.xlu1 %v9802_v1, %s10513_s27  ;;  %v1263_v5 = vpop.f32.mrb[15].mxu0  ;;  %v8280_v1 = vcombine.high %v1491_v59, %v1499_v61 }
 0x966   :  { %1274 = vrot.lane.b32.xlu0 %v1263_v5, %s10513_s27  ;;  %v1506_v5 = vld [vmem:[%s12956_s10 + $0x200] sm:$0xff] }
 0x9d7   :  { %v1277_v6 = vpop.permute.xlu1 %1276 }
 0x9d8   :  { %1282 = vst.msk [vmem:[#allocation2 + $0x8] sm:$0xff] %vm1280_vm8, %v1277_v6  ;;  %v1275_v4 = vpop.permute.xlu0 %1274  ;;  %v1514_v6 = vld [vmem:[%s12956_s10 + $0x240] sm:$0xff] }
 0x9d9   :  { %1281 = vst.msk [vmem:[#allocation2] sm:$0xff] %vm1280_vm8, %v1275_v4  ;;  %v1507_v4 = vld [vmem:[%s12956_s10 + $0x208] sm:$0xff] }
 0x9df   :  { %v1284_v7 = vld [vmem:[#allocation2 + $0x8] sm:$0xff] }
 0x9e0   :  { %v1283_v52 = vld [vmem:[#allocation2] sm:$0xff] }
 0x9e1   :  { %v1285_v8 = vpack.c.bf16 %v1284_v7, %v1283_v52  ;;  %v8294_v7 = vcombine.high %v1506_v5, %v1514_v6  ;;  %v1515_v52 = vld [vmem:[%s12956_s10 + $0x248] sm:$0xff] }
 0x9e3   :  { %9820 = vmatmul.mubr.bf16.vlgmr.msra.gmra.mrb[16].mxu0 %v1285_v8  ;;  %v8293_v8 = vcombine.low %v1506_v5, %v1514_v6  ;;  %v1460_v5 = vld [vmem:[%s12956_s10 + $0x90] sm:$0xff]  ;;  %v1461_v6 = vld [vmem:[%s12956_s10 + $0x98] sm:$0xff] }
 0x9e4   :  { %2369 = vmatprep.mubr.bf16.mxu0 %v10512_v29 }
 0xab6   :  { %v1391_v9 = vpop.f32.mrb[16].mxu0 }
 0xab7   :  { %v1392_v10 = vadd.f32 %v8218_v58, %v1391_v9  ;;  %v9821_v11 = vpop.f32.mrb[17].mxu0  ;;  %v8296_v9 = vcombine.high %v1507_v4, %v1515_v52 }
 0xab8   :  { %v1394_v12 = vpop.f32.mrb[18].mxu0  ;;  %v1530_v11 = vld [vmem:[%s12956_s10 + $0x2c0] sm:$0xff] }
 0xab9   :  { %v1395_v13 = vadd.f32 %v8218_v58, %v1394_v12  ;;  %v9822_v14 = vpop.f32.mrb[19].mxu0  ;;  %v1398_v15 = vadd.f32 %v1392_v10, %v10723_v38  ;;  %v1451_v38 = vld [vmem:[%s12956_s10 + $0x48] sm:$0xff]  ;;  %v8295_v58 = vcombine.low %v1507_v4, %v1515_v52  ;;  %v1522_v10 = vld [vmem:[%s12956_s10 + $0x280] sm:$0xff]  ;;  %v1469_v4 = vld [vmem:[%s12956_s10 + $0xd8] sm:$0xff] }
 0xaba   :  { %v8231_v25 = vcombine.low %v1443_v20, %v1451_v38  ;;  %v8232_v26 = vcombine.high %v1443_v20, %v1451_v38  ;;  %v1523_v12 = vld [vmem:[%s12956_s10 + $0x288] sm:$0xff]  ;;  %v1546_v20 = vld [vmem:[%s12956_s10 + $0x340] sm:$0xff] }
 0xabb   :  { %1402 = vadd.xlane.f32.xlu0 %v1398_v15  ;;  %v1399_v16 = vadd.f32 %v1395_v13, %v10725_v39  ;;  %v1458_v39 = vld [vmem:[%s12956_s10 + $0x80] sm:$0xff]  ;;  %v8310_v13 = vcombine.high %v1522_v10, %v1530_v11  ;;  %v1531_v14 = vld [vmem:[%s12956_s10 + $0x2c8] sm:$0xff]  ;;  %v8326_v23 = vcombine.high %v1538_v19, %v1546_v20 }
 0xabc   :  { %v8246_v27 = vcombine.high %v1458_v39, %v1466_v24  ;;  %2337 = vmatprep.subr.bf16.mxu0 %v8232_v26  ;;  %v8245_v34 = vcombine.low %v1458_v39, %v1466_v24  ;;  %v8312_v17 = vcombine.high %v1523_v12, %v1531_v14  ;;  %v1547_v38 = vld [vmem:[%s12956_s10 + $0x348] sm:$0xff]  ;;  %v8325_v39 = vcombine.low %v1538_v19, %v1546_v20  ;;  %v1554_v26 = vld [vmem:[%s12956_s10 + $0x380] sm:$0xff]  ;;  %v1493_v19 = vld [vmem:[%s12956_s10 + $0x198] sm:$0xff] }
 0xabd   :  { %1404 = vadd.xlane.f32.xlu1 %v1399_v16  ;;  %2338 = vmatpush1.bf16.msra.mxu0 %v8231_v25  ;;  %v8327_v24 = vcombine.low %v1539_v22, %v1547_v38  ;;  %v8328_v25 = vcombine.high %v1539_v22, %v1547_v38  ;;  %v1501_v20 = vld [vmem:[%s12956_s10 + $0x1d8] sm:$0xff] }
 0xabe   :  { %2296 = vmatprep.subr.bf16.mxu1 %v8246_v27  ;;  %2339 = vmatprep.subr.bf16.mxu0 %v8248_v33  ;;  %v1562_v27 = vld [vmem:[%s12956_s10 + $0x3c0] sm:$0xff]  ;;  %v1563_v33 = vld [vmem:[%s12956_s10 + $0x3c8] sm:$0xff] }
 0xabf   :  { %2297 = vmatpush1.bf16.msra.mxu1 %v8245_v34  ;;  %v8342_v30 = vcombine.high %v1554_v26, %v1562_v27  ;;  %v8341_v34 = vcombine.low %v1554_v26, %v1562_v27  ;;  %v1509_v26 = vld [vmem:[%s12956_s10 + $0x218] sm:$0xff] }
 0xac0   :  { %2298 = vmatprep.subr.bf16.mxu1 %v8262_v50  ;;  %v1517_v27 = vld [vmem:[%s12956_s10 + $0x258] sm:$0xff] }
 0xac1   :  { %2340 = vmatpush1.bf16.msra.mxu0 %v8247_v35  ;;  %v8343_v35 = vcombine.low %v1555_v28, %v1563_v33 }
 0xac2   :  { %2341 = vmatprep.subr.bf16.mxu0 %v8264_v55 }
 0xac3   :  { %2299 = vmatpush1.bf16.msra.mxu1 %v8261_v53 }
 0xac4   :  { %2300 = vmatprep.subr.bf16.mxu1 %v8278_v60  ;;  %v8227_v60 = vld [vmem:[%s12958_s8] ss:$0 sm:$0xff] }
 0xac5   :  { %2342 = vmatpush1.bf16.msra.mxu0 %v8263_v54 }
 0xac6   :  { %2343 = vmatprep.subr.bf16.mxu0 %v8280_v1 }
 0xac7   :  { %2301 = vmatpush1.bf16.msra.mxu1 %v8277_v62  ;;  %v8228_v62 = vld [vmem:[%s12959_s9] ss:$0 sm:$0xff] }
 0xac8   :  { %2302 = vmatprep.subr.bf16.mxu1 %v8294_v7 }
 0xac9   :  { %2344 = vmatpush1.bf16.msra.mxu0 %v8279_v63 }
 0xaca   :  { %2345 = vmatprep.subr.bf16.mxu0 %v8296_v9  ;;  %v1477_v9 = vld [vmem:[%s12956_s10 + $0x118] sm:$0xff] }
 0xacb   :  { %2303 = vmatpush1.bf16.msra.mxu1 %v8293_v8  ;;  %v1476_v8 = vld [vmem:[%s12956_s10 + $0x110] sm:$0xff] }
 0xacc   :  { %2304 = vmatprep.subr.bf16.mxu1 %v8310_v13  ;;  %v8252_v13 = vcombine.high %v1461_v6, %v1469_v4 }
 0xacd   :  { %2346 = vmatpush1.bf16.msra.mxu0 %v8295_v58  ;;  %v1484_v58 = vld [vmem:[%s12956_s10 + $0x150] sm:$0xff] }
 0xace   :  { %2347 = vmatprep.subr.bf16.mxu0 %v8312_v17  ;;  %v1500_v17 = vld [vmem:[%s12956_s10 + $0x1d0] sm:$0xff]  ;;  %v8266_v22 = vcombine.high %v1476_v8, %v1484_v58  ;;  %v8265_v38 = vcombine.low %v1476_v8, %v1484_v58 }
 0xb48   :  { %v1403_v36 = vpop.xlane.xlu0 %1402 }
 0xb49   :  { %v1407_v37 = vmul.f32 0.0078125, %v1403_v36  ;;  %v8344_v36 = vcombine.high %v1555_v28, %v1563_v33 }
 0xb4a   :  { %v1405_v40 = vpop.xlane.xlu1 %1404 }
 0xb4b   :  { %v10945_v41 = vsub.f32 %v1398_v15, %v1407_v37  ;;  %v1408_v44 = vmul.f32 0.0078125, %v1405_v40  ;;  %v8309_v15 = vcombine.low %v1522_v10, %v1530_v11  ;;  %v1444_v37 = vld [vmem:[%s12956_s10 + $0x10] sm:$0xff]  ;;  %v1485_v10 = vld [vmem:[%s12956_s10 + $0x158] sm:$0xff] }
 0xb4c   :  { %v1452_v40 = vld [vmem:[%s12956_s10 + $0x50] sm:$0xff] }
 0xb4d   :  { %v10947_v32 = vsub.f32 %v1399_v16, %v1408_v44  ;;  %v1411_v47 = vmul.f32 %v10945_v41, %v10945_v41  ;;  %v8311_v16 = vcombine.low %v1523_v12, %v1531_v14  ;;  %2305 = vmatpush1.bf16.msra.mxu1 %v8309_v15  ;;  %v1445_v44 = vld [vmem:[%s12956_s10 + $0x18] sm:$0xff]  ;;  %v8251_v15 = vcombine.low %v1461_v6, %v1469_v4  ;;  %v1454_v6 = vld [vmem:[%s12956_s10 + $0x60] sm:$0xff]  ;;  %v1447_v4 = vld [vmem:[%s12956_s10 + $0x28] sm:$0xff] }
 0xb4e   :  { %2306 = vmatprep.subr.bf16.mxu1 %v8326_v23  ;;  %v8235_v3 = vcombine.low %v1445_v44, %v1453_v48  ;;  %v8236_v49 = vcombine.high %v1445_v44, %v1453_v48  ;;  %v8268_v23 = vcombine.high %v1477_v9, %v1485_v10  ;;  %v8299_v48 = vcombine.low %v1509_v26, %v1517_v27 }
 0xb4f   :  { %1413 = vadd.xlane.f32.xlu0 %v1411_v47  ;;  %v1412_v31 = vmul.f32 %v10947_v32, %v10947_v32  ;;  %2348 = vmatpush1.bf16.msra.mxu0 %v8311_v16  ;;  %v8233_v47 = vcombine.low %v1444_v37, %v1452_v40  ;;  %v1492_v16 = vld [vmem:[%s12956_s10 + $0x190] sm:$0xff] }
 0xb50   :  { %2349 = vmatprep.subr.bf16.mxu0 %v8328_v25  ;;  %v1516_v25 = vld [vmem:[%s12956_s10 + $0x250] sm:$0xff]  ;;  %v8282_v28 = vcombine.high %v1492_v16, %v1500_v17  ;;  %v8281_v33 = vcombine.low %v1492_v16, %v1500_v17 }
 0xb51   :  { %2307 = vmatpush1.bf16.msra.mxu1 %v8325_v39  ;;  %v8267_v39 = vcombine.low %v1477_v9, %v1485_v10 }
 0xb52   :  { %2308 = vmatprep.subr.bf16.mxu1 %v8342_v30  ;;  %v8284_v30 = vcombine.high %v1493_v19, %v1501_v20 }
 0xb53   :  { %1415 = vadd.xlane.f32.xlu0 %v1412_v31  ;;  %2350 = vmatpush1.bf16.msra.mxu0 %v8327_v24  ;;  %v8234_v31 = vcombine.high %v1444_v37, %v1452_v40  ;;  %v1508_v24 = vld [vmem:[%s12956_s10 + $0x210] sm:$0xff]  ;;  %v1525_v37 = vld [vmem:[%s12956_s10 + $0x298] sm:$0xff] }
 0xb54   :  { %2351 = vmatprep.subr.bf16.mxu0 %v8344_v36  ;;  %v1532_v36 = vld [vmem:[%s12956_s10 + $0x2d0] sm:$0xff]  ;;  %v1533_v40 = vld [vmem:[%s12956_s10 + $0x2d8] sm:$0xff]  ;;  %v8298_v44 = vcombine.high %v1508_v24, %v1516_v25 }
 0xb55   :  { %2309 = vmatpush1.bf16.msra.mxu1 %v8341_v34  ;;  %v8283_v34 = vcombine.low %v1493_v19, %v1501_v20 }
 0xb56   :  { %2380 = vmatprep.subr.bf16.mxu1 %v8234_v31  ;;  %v8297_v31 = vcombine.low %v1508_v24, %v1516_v25 }
 0xb57   :  { %2352 = vmatpush1.bf16.msra.mxu0 %v8343_v35  ;;  %v1524_v35 = vld [vmem:[%s12956_s10 + $0x290] sm:$0xff] }
 0xb58   :  { %2423 = vmatprep.subr.bf16.mxu0 %v8236_v49  ;;  %v1548_v49 = vld [vmem:[%s12956_s10 + $0x350] sm:$0xff] }
 0xbdc   :  { %v1414_v50 = vpop.xlane.xlu0 %1413 }
 0xbdd   :  { %v1417_v51 = vmul.f32 0.0078125, %v1414_v50  ;;  %v1541_v50 = vld [vmem:[%s12956_s10 + $0x318] sm:$0xff] }
 0xbdf   :  { %v1419_v53 = vadd.f32 1e-05, %v1417_v51  ;;  %v1549_v51 = vld [vmem:[%s12956_s10 + $0x358] sm:$0xff] }
 0xbe0   :  { %v1416_v54 = vpop.xlane.xlu0 %1415 }
 0xbe1   :  { %10462 = vrsqrt.f32 %v1419_v53  ;;  %v1418_v55 = vmul.f32 0.0078125, %v1416_v54  ;;  %v8314_v53 = vcombine.high %v1524_v35, %v1532_v36  ;;  %v8316_v54 = vcombine.high %v1525_v37, %v1533_v40 }
 0xbe3   :  { %v1420_v56 = vadd.f32 1e-05, %v1418_v55  ;;  %v8313_v55 = vcombine.low %v1524_v35, %v1532_v36 }
 0xbe5   :  { %10464 = vrsqrt.f32 %v1420_v56  ;;  %v8315_v56 = vcombine.low %v1525_v37, %v1533_v40 }
 0xbeb   :  { %v10463_v57 = vpop.eup %10462 }
 0xbec   :  { %v1423_v59 = vmul.f32 %v10463_v57, %v10945_v41  ;;  %v1468_v41 = vld [vmem:[%s12956_s10 + $0xd0] sm:$0xff] }
 0xbed   :  { %v8250_v12 = vcombine.high %v1460_v5, %v1468_v41  ;;  %v8249_v14 = vcombine.low %v1460_v5, %v1468_v41  ;;  %v1556_v57 = vld [vmem:[%s12956_s10 + $0x390] sm:$0xff]  ;;  %v8331_v5 = vcombine.low %v1541_v50, %v1549_v51  ;;  %v1446_v41 = vld [vmem:[%s12956_s10 + $0x20] sm:$0xff] }
 0xbee   :  { %v1431_v63 = vmul.f32 %v8227_v60, %v1423_v59  ;;  %v1564_v59 = vld [vmem:[%s12956_s10 + $0x3d0] sm:$0xff]  ;;  %v8238_v16 = vcombine.high %v1446_v41, %v1454_v6  ;;  %v8237_v19 = vcombine.low %v1446_v41, %v1454_v6 }
 0xbef   :  { %v10465_v61 = vpop.eup %10464  ;;  %v8346_v8 = vcombine.high %v1556_v57, %v1564_v59  ;;  %v8345_v9 = vcombine.low %v1556_v57, %v1564_v59 }
 0xbf0   :  { %v1424_v1 = vmul.f32 %v10465_v61, %v10947_v32  ;;  %v11057_v52 = vadd.f32 %v8228_v62, %v1431_v63  ;;  %v1565_v61 = vld [vmem:[%s12956_s10 + $0x3d8] sm:$0xff]  ;;  %v8332_v63 = vcombine.high %v1541_v50, %v1549_v51 }
 0xbf2   :  { %v1432_v7 = vmul.f32 %v8227_v60, %v1424_v1  ;;  %v1557_v60 = vld [vmem:[%s12956_s10 + $0x398] sm:$0xff] }
 0xbf3   :  { %v8348_v58 = vcombine.high %v1557_v60, %v1565_v61  ;;  %v8347_v10 = vcombine.low %v1557_v60, %v1565_v61 }
 0xbf4   :  { %v11059_v32 = vadd.f32 %v8228_v62, %v1432_v7  ;;  %v1455_v7 = vld [vmem:[%s12956_s10 + $0x68] sm:$0xff] }
 0xbf5   :  { %v8240_v17 = vcombine.high %v1447_v4, %v1455_v7  ;;  %v8239_v20 = vcombine.low %v1447_v4, %v1455_v7 }
 0xbf6   :  { %v11075_v11 = vpack.c.bf16 %v11059_v32, %v11057_v52 }
 0xbf8   :  { %2327 = vmatmul.mubr.bf16.vlgmr.msra.gmra.mrb[12].mxu1 %v11075_v11  ;;  %2370 = vmatmul.mubr.bf16.vlgmr.msra.gmra.mrb[20].mxu0 %v11075_v11 }
 0xbf9   :  { %2381 = vmatpush1.bf16.msra.mxu1 %v8233_v47  ;;  %2424 = vmatpush1.bf16.msra.mxu0 %v8235_v3  ;;  %v8300_v47 = vcombine.high %v1509_v26, %v1517_v27  ;;  %v1540_v3 = vld [vmem:[%s12956_s10 + $0x310] sm:$0xff] }
 0xbfa   :  { %2382 = vmatprep.subr.bf16.mxu1 %v8250_v12  ;;  %2425 = vmatprep.subr.bf16.mxu0 %v8252_v13  ;;  %v8330_v62 = vcombine.high %v1540_v3, %v1548_v49  ;;  %v8329_v1 = vcombine.low %v1540_v3, %v1548_v49  ;;  %v1462_v12 = vld [vmem:[%s12956_s10 + $0xa0] sm:$0xff] }
 0xbfb   :  { %2412 = vmatprep.mubr.bf16.mxu1 %v10512_v29  ;;  %2455 = vmatprep.mubr.bf16.mxu0 %v10512_v29  ;;  %v1470_v13 = vld [vmem:[%s12956_s10 + $0xe0] sm:$0xff] }
 0xbfc   :  { %v8254_v24 = vcombine.high %v1462_v12, %v1470_v13  ;;  %v8253_v26 = vcombine.low %v1462_v12, %v1470_v13 }
 0xbfd   :  { %2383 = vmatpush1.bf16.msra.mxu1 %v8249_v14  ;;  %2426 = vmatpush1.bf16.msra.mxu0 %v8251_v15  ;;  %v1463_v14 = vld [vmem:[%s12956_s10 + $0xa8] sm:$0xff] }
 0xbfe   :  { %2384 = vmatprep.subr.bf16.mxu1 %v8266_v22  ;;  %2427 = vmatprep.subr.bf16.mxu0 %v8268_v23  ;;  %v1471_v15 = vld [vmem:[%s12956_s10 + $0xe8] sm:$0xff]  ;;  %v1478_v22 = vld [vmem:[%s12956_s10 + $0x120] sm:$0xff] }
 0xbff   :  { %v1486_v23 = vld [vmem:[%s12956_s10 + $0x160] sm:$0xff]  ;;  %v8256_v25 = vcombine.high %v1463_v14, %v1471_v15  ;;  %v8255_v27 = vcombine.low %v1463_v14, %v1471_v15 }
 0xc00   :  { %v8270_v35 = vcombine.high %v1478_v22, %v1486_v23  ;;  %v8269_v37 = vcombine.low %v1478_v22, %v1486_v23 }
 0xc01   :  { %2385 = vmatpush1.bf16.msra.mxu1 %v8265_v38  ;;  %2428 = vmatpush1.bf16.msra.mxu0 %v8267_v39  ;;  %v1479_v38 = vld [vmem:[%s12956_s10 + $0x128] sm:$0xff] }
 0xc02   :  { %2386 = vmatprep.subr.bf16.mxu1 %v8282_v28  ;;  %2429 = vmatprep.subr.bf16.mxu0 %v8284_v30  ;;  %v1487_v39 = vld [vmem:[%s12956_s10 + $0x168] sm:$0xff]  ;;  %v1494_v28 = vld [vmem:[%s12956_s10 + $0x1a0] sm:$0xff] }
 0xc03   :  { %v1502_v30 = vld [vmem:[%s12956_s10 + $0x1e0] sm:$0xff]  ;;  %v8272_v36 = vcombine.high %v1479_v38, %v1487_v39  ;;  %v8271_v40 = vcombine.low %v1479_v38, %v1487_v39 }
 0xc04   :  { %v8286_v3 = vcombine.high %v1494_v28, %v1502_v30  ;;  %v8285_v50 = vcombine.low %v1494_v28, %v1502_v30 }
 0xc05   :  { %2387 = vmatpush1.bf16.msra.mxu1 %v8281_v33  ;;  %2430 = vmatpush1.bf16.msra.mxu0 %v8283_v34  ;;  %v1495_v33 = vld [vmem:[%s12956_s10 + $0x1a8] sm:$0xff] }
 0xc06   :  { %2388 = vmatprep.subr.bf16.mxu1 %v8298_v44  ;;  %2431 = vmatprep.subr.bf16.mxu0 %v8300_v47  ;;  %v1503_v34 = vld [vmem:[%s12956_s10 + $0x1e8] sm:$0xff]  ;;  %v1510_v44 = vld [vmem:[%s12956_s10 + $0x220] sm:$0xff] }
 0xc07   :  { %v1518_v47 = vld [vmem:[%s12956_s10 + $0x260] sm:$0xff]  ;;  %v8288_v49 = vcombine.high %v1495_v33, %v1503_v34  ;;  %v8287_v51 = vcombine.low %v1495_v33, %v1503_v34 }
 0xc08   :  { %v8302_v57 = vcombine.high %v1510_v44, %v1518_v47  ;;  %v8301_v60 = vcombine.low %v1510_v44, %v1518_v47 }
 0xc09   :  { %2389 = vmatpush1.bf16.msra.mxu1 %v8297_v31  ;;  %2432 = vmatpush1.bf16.msra.mxu0 %v8299_v48  ;;  %v1511_v31 = vld [vmem:[%s12956_s10 + $0x228] sm:$0xff] }
 0xc0a   :  { %2390 = vmatprep.subr.bf16.mxu1 %v8314_v53  ;;  %2433 = vmatprep.subr.bf16.mxu0 %v8316_v54  ;;  %v1519_v48 = vld [vmem:[%s12956_s10 + $0x268] sm:$0xff]  ;;  %v1526_v53 = vld [vmem:[%s12956_s10 + $0x2a0] sm:$0xff] }
 0xc0b   :  { %v1534_v54 = vld [vmem:[%s12956_s10 + $0x2e0] sm:$0xff]  ;;  %v8304_v59 = vcombine.high %v1511_v31, %v1519_v48  ;;  %v8303_v61 = vcombine.low %v1511_v31, %v1519_v48 }
 0xc0c   :  { %v8318_v41 = vcombine.high %v1526_v53, %v1534_v54  ;;  %v8317_v4 = vcombine.low %v1526_v53, %v1534_v54 }
 0xc0d   :  { %2391 = vmatpush1.bf16.msra.mxu1 %v8313_v55  ;;  %2434 = vmatpush1.bf16.msra.mxu0 %v8315_v56  ;;  %v1527_v55 = vld [vmem:[%s12956_s10 + $0x2a8] sm:$0xff] }
 0xc0e   :  { %2392 = vmatprep.subr.bf16.mxu1 %v8330_v62  ;;  %2435 = vmatprep.subr.bf16.mxu0 %v8332_v63  ;;  %v1535_v56 = vld [vmem:[%s12956_s10 + $0x2e8] sm:$0xff]  ;;  %v1542_v62 = vld [vmem:[%s12956_s10 + $0x320] sm:$0xff] }
 0xc0f   :  { %v1550_v63 = vld [vmem:[%s12956_s10 + $0x360] sm:$0xff]  ;;  %v8320_v6 = vcombine.high %v1527_v55, %v1535_v56  ;;  %v8319_v7 = vcombine.low %v1527_v55, %v1535_v56 }
 0xc10   :  { %v8334_v12 = vcombine.high %v1542_v62, %v1550_v63  ;;  %v8333_v14 = vcombine.low %v1542_v62, %v1550_v63 }
 0xc11   :  { %2393 = vmatpush1.bf16.msra.mxu1 %v8329_v1  ;;  %2436 = vmatpush1.bf16.msra.mxu0 %v8331_v5  ;;  %v1543_v1 = vld [vmem:[%s12956_s10 + $0x328] sm:$0xff] }
 0xc12   :  { %2394 = vmatprep.subr.bf16.mxu1 %v8346_v8  ;;  %2437 = vmatprep.subr.bf16.mxu0 %v8348_v58  ;;  %v1551_v5 = vld [vmem:[%s12956_s10 + $0x368] sm:$0xff]  ;;  %v1558_v8 = vld [vmem:[%s12956_s10 + $0x3a0] sm:$0xff] }
 0xc13   :  { %v1566_v58 = vld [vmem:[%s12956_s10 + $0x3e0] sm:$0xff]  ;;  %v8336_v13 = vcombine.high %v1543_v1, %v1551_v5  ;;  %v8335_v15 = vcombine.low %v1543_v1, %v1551_v5 }
 0xc14   :  { %v8350_v22 = vcombine.high %v1558_v8, %v1566_v58  ;;  %v8349_v38 = vcombine.low %v1558_v8, %v1566_v58 }
 0xc15   :  { %2395 = vmatpush1.bf16.msra.mxu1 %v8345_v9  ;;  %2438 = vmatpush1.bf16.msra.mxu0 %v8347_v10  ;;  %v1559_v9 = vld [vmem:[%s12956_s10 + $0x3a8] sm:$0xff] }
 0xc16   :  { %2466 = vmatprep.subr.bf16.mxu1 %v8238_v16  ;;  %2509 = vmatprep.subr.bf16.mxu0 %v8240_v17  ;;  %v1567_v10 = vld [vmem:[%s12956_s10 + $0x3e8] sm:$0xff]  ;;  %v1448_v16 = vld [vmem:[%s12956_s10 + $0x30] sm:$0xff] }
 0xc17   :  { %v1456_v17 = vld [vmem:[%s12956_s10 + $0x70] sm:$0xff]  ;;  %v8352_v23 = vcombine.high %v1559_v9, %v1567_v10  ;;  %v8351_v39 = vcombine.low %v1559_v9, %v1567_v10 }
 0xc18   :  { %2413 = vmatmul.mubr.bf16.vlgmr.msra.gmra.mrb[16].mxu1 %v11075_v11  ;;  %2456 = vmatmul.mubr.bf16.vlgmr.msra.gmra.mrb[24].mxu0 %v11075_v11  ;;  %v8242_v28 = vcombine.high %v1448_v16, %v1456_v17  ;;  %v8241_v33 = vcombine.low %v1448_v16, %v1456_v17 }
 0xc19   :  { %2467 = vmatpush1.bf16.msra.mxu1 %v8237_v19  ;;  %2510 = vmatpush1.bf16.msra.mxu0 %v8239_v20  ;;  %v1449_v19 = vld [vmem:[%s12956_s10 + $0x38] sm:$0xff] }
 0xc1a   :  { %2468 = vmatprep.subr.bf16.mxu1 %v8254_v24  ;;  %2511 = vmatprep.subr.bf16.mxu0 %v8256_v25  ;;  %v1457_v20 = vld [vmem:[%s12956_s10 + $0x78] sm:$0xff]  ;;  %v1464_v24 = vld [vmem:[%s12956_s10 + $0xb0] sm:$0xff] }
 0xc1b   :  { %2498 = vmatprep.mubr.bf16.mxu1 %v10512_v29  ;;  %2541 = vmatprep.mubr.bf16.mxu0 %v10512_v29  ;;  %v1472_v25 = vld [vmem:[%s12956_s10 + $0xf0] sm:$0xff]  ;;  %v8244_v30 = vcombine.high %v1449_v19, %v1457_v20  ;;  %v8243_v34 = vcombine.low %v1449_v19, %v1457_v20 }
 0xc1c   :  { %v8258_v44 = vcombine.high %v1464_v24, %v1472_v25  ;;  %v8257_v31 = vcombine.low %v1464_v24, %v1472_v25  ;;  %v1569_v25 = vld [vmem:[%s12956_s10 + $0x3f8] sm:$0xff] }
 0xc1d   :  { %2469 = vmatpush1.bf16.msra.mxu1 %v8253_v26  ;;  %2512 = vmatpush1.bf16.msra.mxu0 %v8255_v27  ;;  %v1465_v26 = vld [vmem:[%s12956_s10 + $0xb8] sm:$0xff] }
 0xc1e   :  { %2470 = vmatprep.subr.bf16.mxu1 %v8270_v35  ;;  %2513 = vmatprep.subr.bf16.mxu0 %v8272_v36  ;;  %v1473_v27 = vld [vmem:[%s12956_s10 + $0xf8] sm:$0xff]  ;;  %v1480_v35 = vld [vmem:[%s12956_s10 + $0x130] sm:$0xff] }
 0xc1f   :  { %v1488_v36 = vld [vmem:[%s12956_s10 + $0x170] sm:$0xff]  ;;  %v8260_v47 = vcombine.high %v1465_v26, %v1473_v27  ;;  %v8259_v48 = vcombine.low %v1465_v26, %v1473_v27 }
 0xc20   :  { %v8274_v53 = vcombine.high %v1480_v35, %v1488_v36  ;;  %v8273_v55 = vcombine.low %v1480_v35, %v1488_v36  ;;  %v10126_v35 = vld [vmem:[%s12957_s12 + $0x40] sm:$0xff]  }
 0xc21   :  { %2471 = vmatpush1.bf16.msra.mxu1 %v8269_v37  ;;  %2514 = vmatpush1.bf16.msra.mxu0 %v8271_v40  ;;  %v1481_v37 = vld [vmem:[%s12956_s10 + $0x138] sm:$0xff]  ;;  %v10127_v36 = vld [vmem:[%s12957_s12 + $0xc0] sm:$0xff]  }
 0xc22   :  { %2472 = vmatprep.subr.bf16.mxu1 %v8286_v3  ;;  %2515 = vmatprep.subr.bf16.mxu0 %v8288_v49  ;;  %v1489_v40 = vld [vmem:[%s12956_s10 + $0x178] sm:$0xff]  ;;  %v1496_v3 = vld [vmem:[%s12956_s10 + $0x1b0] sm:$0xff] }
 0xc23   :  { %v1504_v49 = vld [vmem:[%s12956_s10 + $0x1f0] sm:$0xff]  ;;  %v8276_v54 = vcombine.high %v1481_v37, %v1489_v40  ;;  %v8275_v56 = vcombine.low %v1481_v37, %v1489_v40  ;;  %v10128_v37 = vld [vmem:[%s12957_s12] sm:$0xff]  }
 0xc24   :  { %v8290_v62 = vcombine.high %v1496_v3, %v1504_v49  ;;  %v8289_v1 = vcombine.low %v1496_v3, %v1504_v49  ;;  %v10129_v40 = vld [vmem:[%s12957_s12 + $0x80] sm:$0xff]   ;;  %v10134_v3 = vld [vmem:[%s12957_s12 + $0x50] sm:$0xff]  }
 0xc25   :  { %2473 = vmatpush1.bf16.msra.mxu1 %v8285_v50  ;;  %2516 = vmatpush1.bf16.msra.mxu0 %v8287_v51  ;;  %v1497_v50 = vld [vmem:[%s12956_s10 + $0x1b8] sm:$0xff]  ;;  %v10135_v49 = vld [vmem:[%s12957_s12 + $0xd0] sm:$0xff]  }
 0xc26   :  { %2474 = vmatprep.subr.bf16.mxu1 %v8302_v57  ;;  %2517 = vmatprep.subr.bf16.mxu0 %v8304_v59  ;;  %v1505_v51 = vld [vmem:[%s12956_s10 + $0x1f8] sm:$0xff]  ;;  %v1512_v57 = vld [vmem:[%s12956_s10 + $0x230] sm:$0xff] }
 0xc27   :  { %v1520_v59 = vld [vmem:[%s12956_s10 + $0x270] sm:$0xff]  ;;  %v8292_v63 = vcombine.high %v1497_v50, %v1505_v51  ;;  %v8291_v5 = vcombine.low %v1497_v50, %v1505_v51  ;;  %v10138_v51 = vld [vmem:[%s12957_s12 + $0x58] sm:$0xff]  }
 0xc28   :  { %v8306_v8 = vcombine.high %v1512_v57, %v1520_v59  ;;  %v8305_v9 = vcombine.low %v1512_v57, %v1520_v59  ;;  %v10137_v50 = vld [vmem:[%s12957_s12 + $0x90] sm:$0xff]   ;;  %v10143_v57 = vld [vmem:[%s12957_s12 + $0xe0] sm:$0xff]  }
 0xc29   :  { %2475 = vmatpush1.bf16.msra.mxu1 %v8301_v60  ;;  %2518 = vmatpush1.bf16.msra.mxu0 %v8303_v61  ;;  %v1513_v60 = vld [vmem:[%s12956_s10 + $0x238] sm:$0xff]  ;;  %v10144_v59 = vld [vmem:[%s12957_s12 + $0x20] sm:$0xff]  }
 0xc2a   :  { %2476 = vmatprep.subr.bf16.mxu1 %v8318_v41  ;;  %2519 = vmatprep.subr.bf16.mxu0 %v8320_v6  ;;  %v1521_v61 = vld [vmem:[%s12956_s10 + $0x278] sm:$0xff]  ;;  %v1528_v41 = vld [vmem:[%s12956_s10 + $0x2b0] sm:$0xff] }
 0xc2b   :  { %v1536_v6 = vld [vmem:[%s12956_s10 + $0x2f0] sm:$0xff]  ;;  %v8308_v58 = vcombine.high %v1513_v60, %v1521_v61  ;;  %v8307_v10 = vcombine.low %v1513_v60, %v1521_v61  ;;  %v10145_v60 = vld [vmem:[%s12957_s12 + $0xa0] sm:$0xff]   ;;  %v10146_v61 = vld [vmem:[%s12957_s12 + $0x68] sm:$0xff]  }
 0xc2c   :  { %v8322_v16 = vcombine.high %v1528_v41, %v1536_v6  ;;  %v8321_v19 = vcombine.low %v1528_v41, %v1536_v6  ;;  %v10151_v41 = vld [vmem:[%s12957_s12 + $0xf0] sm:$0xff]  }
 0xc2d   :  { %2477 = vmatpush1.bf16.msra.mxu1 %v8317_v4  ;;  %2520 = vmatpush1.bf16.msra.mxu0 %v8319_v7  ;;  %v1529_v4 = vld [vmem:[%s12956_s10 + $0x2b8] sm:$0xff]  ;;  %v10152_v6 = vld [vmem:[%s12957_s12 + $0x30] sm:$0xff]  }
 0xc2e   :  { %2478 = vmatprep.subr.bf16.mxu1 %v8334_v12  ;;  %2521 = vmatprep.subr.bf16.mxu0 %v8336_v13  ;;  %v1537_v7 = vld [vmem:[%s12956_s10 + $0x2f8] sm:$0xff]  ;;  %v1544_v12 = vld [vmem:[%s12956_s10 + $0x330] sm:$0xff] }
 0xc2f   :  { %v1552_v13 = vld [vmem:[%s12956_s10 + $0x370] sm:$0xff]  ;;  %v8324_v17 = vcombine.high %v1529_v4, %v1537_v7  ;;  %v8323_v20 = vcombine.low %v1529_v4, %v1537_v7  ;;  %v10154_v7 = vld [vmem:[%s12957_s12 + $0x78] sm:$0xff]  }
 0xc30   :  { %v8337_v26 = vcombine.low %v1544_v12, %v1552_v13  ;;  %v10153_v4 = vld [vmem:[%s12957_s12 + $0xb0] sm:$0xff]  }
 0xc31   :  { %2479 = vmatpush1.bf16.msra.mxu1 %v8333_v14  ;;  %2522 = vmatpush1.bf16.msra.mxu0 %v8335_v15  ;;  %v1545_v14 = vld [vmem:[%s12956_s10 + $0x338] sm:$0xff] }
 0xc32   :  { %2480 = vmatprep.subr.bf16.mxu1 %v8350_v22  ;;  %2523 = vmatprep.subr.bf16.mxu0 %v8352_v23  ;;  %v1553_v15 = vld [vmem:[%s12956_s10 + $0x378] sm:$0xff]  ;;  %v1560_v22 = vld [vmem:[%s12956_s10 + $0x3b0] sm:$0xff] }
 0xc33   :  { %v1568_v23 = vld [vmem:[%s12956_s10 + $0x3f0] sm:$0xff]  ;;  %v8340_v24 = vcombine.high %v1545_v14, %v1553_v15  ;;  %v8339_v27 = vcombine.low %v1545_v14, %v1553_v15  ;;  %v11451_v14 = vsub.s32 3, %v10729_v42 }
 0xc35   :  { %2481 = vmatpush1.bf16.msra.mxu1 %v8349_v38  ;;  %2524 = vmatpush1.bf16.msra.mxu0 %v8351_v39  ;;  %v1561_v38 = vld [vmem:[%s12956_s10 + $0x3b8] sm:$0xff]  ;;  %v8338_v39 = vcombine.high %v1544_v12, %v1552_v13  ;;  %v10159_v12 = vld [vmem:[%s12957_s12 + $0x1c0] sm:$0xff]  }
 0xc36   :  { %2552 = vmatprep.subr.bf16.mxu1 %v8242_v28  ;;  %2595 = vmatprep.subr.bf16.mxu0 %v8244_v30  ;;  %v8354_v28 = vcombine.high %v1560_v22, %v1568_v23  ;;  %v8356_v30 = vcombine.high %v1561_v38, %v1569_v25  ;;  %v11448_v13 = vld [vmem:[%s12960_s11] sm:$0xff] }
 0xc37   :  { %v1577_v15 = vrot.slane %v11448_v13, %v10732_v43 }
 0xc38   :  { %2499 = vmatmul.mubr.bf16.vlgmr.msra.gmra.mrb[20].mxu1 %v11075_v11  ;;  %2542 = vmatmul.mubr.bf16.vlgmr.msra.gmra.mrb[28].mxu0 %v11075_v11 }
 0xc39   :  { %2553 = vmatpush1.bf16.msra.mxu1 %v8241_v33  ;;  %2596 = vmatpush1.bf16.msra.mxu0 %v8243_v34  ;;  %v8353_v33 = vcombine.low %v1560_v22, %v1568_v23  ;;  %v8355_v34 = vcombine.low %v1561_v38, %v1569_v25 }
 0xc3a   :  { %2554 = vmatprep.subr.bf16.mxu1 %v8258_v44  ;;  %2597 = vmatprep.subr.bf16.mxu0 %v8260_v47  ;;  %v10130_v44 = vld [vmem:[%s12957_s12 + $0x48] sm:$0xff]  }
 0xc3b   :  { %2584 = vmatprep.mubr.bf16.mxu1 %v10512_v29  ;;  %2627 = vmatprep.mubr.bf16.mxu0 %v10512_v29  ;;  %v10131_v47 = vld [vmem:[%s12957_s12 + $0xc8] sm:$0xff]  }
 0xc3d   :  { %2555 = vmatpush1.bf16.msra.mxu1 %v8257_v31  ;;  %2598 = vmatpush1.bf16.msra.mxu0 %v8259_v48  ;;  %v10132_v31 = vld [vmem:[%s12957_s12 + $0x8] sm:$0xff]  }
 0xc3e   :  { %2556 = vmatprep.subr.bf16.mxu1 %v8274_v53  ;;  %2599 = vmatprep.subr.bf16.mxu0 %v8276_v54  ;;  %v10133_v48 = vld [vmem:[%s12957_s12 + $0x88] sm:$0xff]   ;;  %v10139_v53 = vld [vmem:[%s12957_s12 + $0xd8] sm:$0xff]  }
 0xc3f   :  { %v10140_v54 = vld [vmem:[%s12957_s12 + $0x18] sm:$0xff]  }
 0xc41   :  { %2557 = vmatpush1.bf16.msra.mxu1 %v8273_v55  ;;  %2600 = vmatpush1.bf16.msra.mxu0 %v8275_v56  ;;  %v10141_v55 = vld [vmem:[%s12957_s12 + $0x98] sm:$0xff]   ;;  %v10142_v56 = vld [vmem:[%s12957_s12 + $0x60] sm:$0xff]  }
 0xc42   :  { %2558 = vmatprep.subr.bf16.mxu1 %v8290_v62  ;;  %2601 = vmatprep.subr.bf16.mxu0 %v8292_v63  ;;  %v10147_v62 = vld [vmem:[%s12957_s12 + $0xe8] sm:$0xff]  }
 0xc43   :  { %v10148_v63 = vld [vmem:[%s12957_s12 + $0x28] sm:$0xff]  }
 0xc45   :  { %2559 = vmatpush1.bf16.msra.mxu1 %v8289_v1  ;;  %2602 = vmatpush1.bf16.msra.mxu0 %v8291_v5  ;;  %v10149_v1 = vld [vmem:[%s12957_s12 + $0xa8] sm:$0xff]   ;;  %v10150_v5 = vld [vmem:[%s12957_s12 + $0x70] sm:$0xff]  }
 0xc46   :  { %2560 = vmatprep.subr.bf16.mxu1 %v8306_v8  ;;  %2603 = vmatprep.subr.bf16.mxu0 %v8308_v58  ;;  %v10155_v8 = vld [vmem:[%s12957_s12 + $0xf8] sm:$0xff]  }
 0xc47   :  { %v10156_v58 = vld [vmem:[%s12957_s12 + $0x38] sm:$0xff]  }
 0xc49   :  { %2561 = vmatpush1.bf16.msra.mxu1 %v8305_v9  ;;  %2604 = vmatpush1.bf16.msra.mxu0 %v8307_v10  ;;  %v10157_v9 = vld [vmem:[%s12957_s12 + $0xb8] sm:$0xff]   ;;  %v10158_v10 = vld [vmem:[%s12957_s12 + $0x140] sm:$0xff]  }
 0xc4a   :  { %2562 = vmatprep.subr.bf16.mxu1 %v8322_v16  ;;  %2605 = vmatprep.subr.bf16.mxu0 %v8324_v17  ;;  %v1585_v16 = vrot.slane %v11448_v13, %v10738_v45  ;;  %v1581_v17 = vrot.slane %v11448_v13, %v10741_v46 }
 0xc4d   :  { %2563 = vmatpush1.bf16.msra.mxu1 %v8321_v19  ;;  %2606 = vmatpush1.bf16.msra.mxu0 %v8323_v20  ;;  %v1589_v19 = vrot.slane %v11448_v13, %v11451_v14 }
 0xc4e   :  { %2564 = vmatprep.subr.bf16.mxu1 %v8338_v39  ;;  %2607 = vmatprep.subr.bf16.mxu0 %v8340_v24 }
 0xc51   :  { %2565 = vmatpush1.bf16.msra.mxu1 %v8337_v26  ;;  %2608 = vmatpush1.bf16.msra.mxu0 %v8339_v27 }
 0xc52   :  { %2566 = vmatprep.subr.bf16.mxu1 %v8354_v28  ;;  %2609 = vmatprep.subr.bf16.mxu0 %v8356_v30 }
 0xc55   :  { %2567 = vmatpush1.bf16.msra.mxu1 %v8353_v33  ;;  %2610 = vmatpush1.bf16.msra.mxu0 %v8355_v34 }
 0xc56   :  { %9310 = vmatprep.subr.bf16.mxu1 %v10126_v35  ;;  %9332 = vmatprep.subr.bf16.mxu0 %v10127_v36 }
 0xc58   :  { %2585 = vmatmul.mubr.bf16.vlgmr.msra.gmra.mrb[24].mxu1 %v11075_v11  ;;  %2628 = vmatmul.mubr.bf16.vlgmr.msra.gmra.mrb[32].mxu0 %v11075_v11  ;;  %v10136_v11 = vld [vmem:[%s12957_s12 + $0x10] sm:$0xff]  }
 0xc59   :  { %9311 = vmatpush3.bf16.msra.mxu1 %v10128_v37  ;;  %9333 = vmatpush3.bf16.msra.mxu0 %v10129_v40 }
 0xc5a   :  { %9312 = vmatprep.subr.bf16.mxu1 %v10130_v44  ;;  %9334 = vmatprep.subr.bf16.mxu0 %v10131_v47 }
 0xc5d   :  { %9313 = vmatpush3.bf16.msra.mxu1 %v10132_v31  ;;  %9335 = vmatpush3.bf16.msra.mxu0 %v10133_v48 }
 0xc5e   :  { %9314 = vmatprep.subr.bf16.mxu1 %v10134_v3  ;;  %9336 = vmatprep.subr.bf16.mxu0 %v10135_v49 }
 0xc61   :  { %9315 = vmatpush3.bf16.msra.mxu1 %v10136_v11  ;;  %9337 = vmatpush3.bf16.msra.mxu0 %v10137_v50 }
 0xc62   :  { %9316 = vmatprep.subr.bf16.mxu1 %v10138_v51  ;;  %9338 = vmatprep.subr.bf16.mxu0 %v10139_v53 }
 0xc65   :  { %9317 = vmatpush3.bf16.msra.mxu1 %v10140_v54  ;;  %9339 = vmatpush3.bf16.msra.mxu0 %v10141_v55  ;;  %v10160_v55 = vld [vmem:[%s12957_s12 + $0x100] sm:$0xff]  }
 0xc66   :  { %9318 = vmatprep.subr.bf16.mxu1 %v10142_v56  ;;  %9340 = vmatprep.subr.bf16.mxu0 %v10143_v57  ;;  %v10161_v56 = vld [vmem:[%s12957_s12 + $0x180] sm:$0xff]   ;;  %v10162_v57 = vld [vmem:[%s12957_s12 + $0x148] sm:$0xff]  }
 0xc69   :  { %9319 = vmatpush3.bf16.msra.mxu1 %v10144_v59  ;;  %9341 = vmatpush3.bf16.msra.mxu0 %v10145_v60  ;;  %v10163_v59 = vld [vmem:[%s12957_s12 + $0x1c8] sm:$0xff]  }
 0xc6a   :  { %9320 = vmatprep.subr.bf16.mxu1 %v10146_v61  ;;  %9342 = vmatprep.subr.bf16.mxu0 %v10147_v62  ;;  %v10164_v60 = vld [vmem:[%s12957_s12 + $0x108] sm:$0xff]   ;;  %v10166_v62 = vld [vmem:[%s12957_s12 + $0x150] sm:$0xff]  }
 0xc6b   :  { %v10165_v61 = vld [vmem:[%s12957_s12 + $0x188] sm:$0xff]  }
 0xc6d   :  { %9321 = vmatpush3.bf16.msra.mxu1 %v10148_v63  ;;  %9343 = vmatpush3.bf16.msra.mxu0 %v10149_v1  ;;  %v10167_v63 = vld [vmem:[%s12957_s12 + $0x1d0] sm:$0xff]  }
 0xc6e   :  { %9322 = vmatprep.subr.bf16.mxu1 %v10150_v5  ;;  %9344 = vmatprep.subr.bf16.mxu0 %v10151_v41  ;;  %v10168_v1 = vld [vmem:[%s12957_s12 + $0x110] sm:$0xff]   ;;  %v10170_v41 = vld [vmem:[%s12957_s12 + $0x158] sm:$0xff]  }
 0xc6f   :  { %v10169_v5 = vld [vmem:[%s12957_s12 + $0x190] sm:$0xff]  }
 0xc71   :  { %9323 = vmatpush3.bf16.msra.mxu1 %v10152_v6  ;;  %9345 = vmatpush3.bf16.msra.mxu0 %v10153_v4  ;;  %v10171_v6 = vld [vmem:[%s12957_s12 + $0x1d8] sm:$0xff]  }
 0xc72   :  { %9324 = vmatprep.subr.bf16.mxu1 %v10154_v7  ;;  %9346 = vmatprep.subr.bf16.mxu0 %v10155_v8  ;;  %v10172_v4 = vld [vmem:[%s12957_s12 + $0x118] sm:$0xff]   ;;  %v10174_v8 = vld [vmem:[%s12957_s12 + $0x160] sm:$0xff]  }
 0xc73   :  { %v10173_v7 = vld [vmem:[%s12957_s12 + $0x198] sm:$0xff]  }
 0xc75   :  { %9325 = vmatpush3.bf16.msra.mxu1 %v10156_v58  ;;  %9347 = vmatpush3.bf16.msra.mxu0 %v10157_v9  ;;  %v10175_v58 = vld [vmem:[%s12957_s12 + $0x1e0] sm:$0xff]  }
 0xc76   :  { %9354 = vmatprep.subr.bf16.mxu1 %v10158_v10  ;;  %9376 = vmatprep.subr.bf16.mxu0 %v10159_v12  ;;  %v10176_v9 = vld [vmem:[%s12957_s12 + $0x120] sm:$0xff]   ;;  %v10178_v12 = vld [vmem:[%s12957_s12 + $0x168] sm:$0xff]  }
 0xc77   :  { %v10177_v10 = vld [vmem:[%s12957_s12 + $0x1a0] sm:$0xff]  }
 0xccb   :  { %v2328_v20 = vpop.f32.mrb[12].mxu1  ;;  %v2371_v22 = vpop.f32.mrb[20].mxu0 }
 0xccc   :  { %v2329_v23 = vadd.f32 %v2328_v20, %v1577_v15  ;;  %v2372_v38 = vadd.f32 %v2371_v22, %v1585_v16  ;;  %v2330_v39 = vpop.f32.mrb[13].mxu1  ;;  %v2373_v24 = vpop.f32.mrb[21].mxu0  ;;  %v11531_v20 = vsub.s32 7, %v10729_v42  ;;  %v10180_v22 = vld [vmem:[%s12957_s12 + $0x128] sm:$0xff]  }
 0xccd   :  { %v2331_v25 = vadd.f32 %v2330_v39, %v1581_v17  ;;  %v2374_v26 = vadd.f32 %v2373_v24, %v1589_v19  ;;  %v2332_v27 = vpop.f32.mrb[14].mxu1  ;;  %v2375_v28 = vpop.f32.mrb[22].mxu0  ;;  %v10183_v24 = vld [vmem:[%s12957_s12 + $0x1f0] sm:$0xff]  }
 0xcce   :  { %v2333_v30 = vadd.f32 %v2332_v27, %v1577_v15  ;;  %v2376_v33 = vadd.f32 %v2375_v28, %v1585_v16  ;;  %v2334_v34 = vpop.f32.mrb[15].mxu1  ;;  %v2377_v35 = vpop.f32.mrb[23].mxu0  ;;  %v2638_v40 = vmax.f32 %v2329_v23, 0.0  ;;  %v2640_v44 = vmax.f32 %v2372_v38, 0.0  ;;  %v10179_v15 = vld [vmem:[%s12957_s12 + $0x1e8] sm:$0xff]  }
 0xccf   :  { %v2335_v36 = vadd.f32 %v2334_v34, %v1581_v17  ;;  %v2378_v37 = vadd.f32 %v2377_v35, %v1589_v19  ;;  %v2639_v48 = vmax.f32 %v2331_v25, 0.0  ;;  %v2641_v3 = vmax.f32 %v2374_v26, 0.0  ;;  %v10181_v23 = vld [vmem:[%s12957_s12 + $0x1a8] sm:$0xff]  }
 0xcd0   :  { %v2654_v47 = vmax.f32 %v2333_v30, 0.0  ;;  %v2656_v31 = vmax.f32 %v2376_v33, 0.0  ;;  %v11522_v16 = vsub.s32 4, %v10729_v42  ;;  %v11525_v17 = vsub.s32 6, %v10729_v42  ;;  %v10184_v30 = vld [vmem:[%s12957_s12 + $0x130] sm:$0xff]  }
 0xcd1   :  { %v2655_v49 = vmax.f32 %v2335_v36, 0.0  ;;  %v2657_v11 = vmax.f32 %v2378_v37, 0.0  ;;  %v11528_v19 = vsub.s32 5, %v10729_v42  ;;  %v10182_v42 = vld [vmem:[%s12957_s12 + $0x170] sm:$0xff]   ;;  %v1605_v26 = vrot.slane %v11448_v13, %v11531_v20 }
 0xcd2   :  { %v2670_v50 = vpack.c.bf16 %v2654_v47, %v2638_v40  ;;  %v2672_v51 = vpack.c.bf16 %v2656_v31, %v2640_v44  ;;  %v1593_v38 = vrot.slane %v11448_v13, %v11522_v16  ;;  %v1601_v39 = vrot.slane %v11448_v13, %v11525_v17  ;;  %v10185_v33 = vld [vmem:[%s12957_s12 + $0x1b0] sm:$0xff]   ;;  %v10187_v40 = vld [vmem:[%s12957_s12 + $0x1f8] sm:$0xff]  }
 0xcd3   :  { %v2671_v53 = vpack.c.bf16 %v2655_v49, %v2639_v48  ;;  %v2673_v54 = vpack.c.bf16 %v2657_v11, %v2641_v3  ;;  %v1597_v25 = vrot.slane %v11448_v13, %v11528_v19  ;;  %v10186_v13 = vld [vmem:[%s12957_s12 + $0x178] sm:$0xff]  }
 0xcd5   :  { %3749 = vmatprep.mubr.bf16.mxu1 %v2671_v53  ;;  %3790 = vmatprep.mubr.bf16.mxu0 %v2673_v54  ;;  %v10188_v54 = vld [vmem:[%s12957_s12 + $0x138] sm:$0xff]  }
 0xcd6   :  { %3750 = vmatmul.mubr.bf16.vlgmr.msra.gmra.mrb[28].mxu1 %v2670_v50  ;;  %3791 = vmatmul.mubr.bf16.vlgmr.msra.gmra.mrb[36].mxu0 %v2672_v51 }
 0xcd7   :  { %9355 = vmatpush3.bf16.msra.mxu1 %v10160_v55  ;;  %9377 = vmatpush3.bf16.msra.mxu0 %v10161_v56  ;;  %v10189_v55 = vld [vmem:[%s12957_s12 + $0x1b8] sm:$0xff]  }
 0xcd8   :  { %9356 = vmatprep.subr.bf16.mxu1 %v10162_v57  ;;  %9378 = vmatprep.subr.bf16.mxu0 %v10163_v59 }
 0xcdb   :  { %9357 = vmatpush3.bf16.msra.mxu1 %v10164_v60  ;;  %9379 = vmatpush3.bf16.msra.mxu0 %v10165_v61  ;;  %v10190_v61 = vld [vmem:[%s12957_s12 + $0x240] sm:$0xff]  }
 0xcdc   :  { %9358 = vmatprep.subr.bf16.mxu1 %v10166_v62  ;;  %9380 = vmatprep.subr.bf16.mxu0 %v10167_v63  ;;  %v10191_v62 = vld [vmem:[%s12957_s12 + $0x2c0] sm:$0xff]  }
 0xcdf   :  { %9359 = vmatpush3.bf16.msra.mxu1 %v10168_v1  ;;  %9381 = vmatpush3.bf16.msra.mxu0 %v10169_v5 }
 0xce0   :  { %9360 = vmatprep.subr.bf16.mxu1 %v10170_v41  ;;  %9382 = vmatprep.subr.bf16.mxu0 %v10171_v6 }
 0xce3   :  { %9361 = vmatpush3.bf16.msra.mxu1 %v10172_v4  ;;  %9383 = vmatpush3.bf16.msra.mxu0 %v10173_v7 }
 0xce4   :  { %9362 = vmatprep.subr.bf16.mxu1 %v10174_v8  ;;  %9384 = vmatprep.subr.bf16.mxu0 %v10175_v58  ;;  %v10192_v58 = vld [vmem:[%s12957_s12 + $0x200] sm:$0xff]  }
 0xce7   :  { %9363 = vmatpush3.bf16.msra.mxu1 %v10176_v9  ;;  %9385 = vmatpush3.bf16.msra.mxu0 %v10177_v10  ;;  %v10193_v9 = vld [vmem:[%s12957_s12 + $0x280] sm:$0xff]   ;;  %v10194_v10 = vld [vmem:[%s12957_s12 + $0x248] sm:$0xff]  }
 0xce8   :  { %9364 = vmatprep.subr.bf16.mxu1 %v10178_v12  ;;  %9386 = vmatprep.subr.bf16.mxu0 %v10179_v15  ;;  %v10195_v12 = vld [vmem:[%s12957_s12 + $0x2c8] sm:$0xff]  }
 0xce9   :  { %v10196_v15 = vld [vmem:[%s12957_s12 + $0x208] sm:$0xff]  }
 0xceb   :  { %v2414_v27 = vpop.f32.mrb[16].mxu1  ;;  %v2457_v28 = vpop.f32.mrb[24].mxu0  ;;  %9365 = vmatpush3.bf16.msra.mxu1 %v10180_v22  ;;  %9387 = vmatpush3.bf16.msra.mxu0 %v10181_v23  ;;  %v10197_v22 = vld [vmem:[%s12957_s12 + $0x288] sm:$0xff]   ;;  %v10198_v23 = vld [vmem:[%s12957_s12 + $0x250] sm:$0xff]  }
 0xcec   :  { %v2415_v34 = vadd.f32 %v2414_v27, %v1593_v38  ;;  %v2458_v35 = vadd.f32 %v2457_v28, %v1601_v39  ;;  %v2416_v36 = vpop.f32.mrb[17].mxu1  ;;  %v2459_v37 = vpop.f32.mrb[25].mxu0  ;;  %9366 = vmatprep.subr.bf16.mxu1 %v10182_v42  ;;  %9388 = vmatprep.subr.bf16.mxu0 %v10183_v24  ;;  %v10201_v42 = vld [vmem:[%s12957_s12 + $0x290] sm:$0xff]   ;;  %v10202_v24 = vld [vmem:[%s12957_s12 + $0x258] sm:$0xff]   ;;  %v10206_v28 = vld [vmem:[%s12957_s12 + $0x260] sm:$0xff]  }
 0xced   :  { %v2417_v44 = vadd.f32 %v2416_v36, %v1597_v25  ;;  %v2460_v47 = vadd.f32 %v2459_v37, %v1605_v26  ;;  %v2418_v31 = vpop.f32.mrb[18].mxu1  ;;  %v2461_v48 = vpop.f32.mrb[26].mxu0  ;;  %v10205_v27 = vld [vmem:[%s12957_s12 + $0x298] sm:$0xff]   ;;  %v10211_v36 = vld [vmem:[%s12957_s12 + $0x2e8] sm:$0xff]  }
 0xcee   :  { %v2419_v3 = vadd.f32 %v2418_v31, %v1593_v38  ;;  %v2462_v49 = vadd.f32 %v2461_v48, %v1601_v39  ;;  %v2420_v11 = vpop.f32.mrb[19].mxu1  ;;  %v2463_v50 = vpop.f32.mrb[27].mxu0  ;;  %v2642_v56 = vmax.f32 %v2415_v34, 0.0  ;;  %v2644_v57 = vmax.f32 %v2458_v35, 0.0  ;;  %v10199_v38 = vld [vmem:[%s12957_s12 + $0x2d0] sm:$0xff]   ;;  %v10209_v34 = vld [vmem:[%s12957_s12 + $0x2a0] sm:$0xff]  }
 0xcef   :  { %v2421_v51 = vadd.f32 %v2420_v11, %v1597_v25  ;;  %v2464_v53 = vadd.f32 %v2463_v50, %v1605_v26  ;;  %9367 = vmatpush3.bf16.msra.mxu1 %v10184_v30  ;;  %9389 = vmatpush3.bf16.msra.mxu0 %v10185_v33  ;;  %v2643_v63 = vmax.f32 %v2417_v44, 0.0  ;;  %v2645_v1 = vmax.f32 %v2460_v47, 0.0  ;;  %v10200_v39 = vld [vmem:[%s12957_s12 + $0x210] sm:$0xff]   ;;  %v10203_v25 = vld [vmem:[%s12957_s12 + $0x2d8] sm:$0xff]   ;;  %v10207_v30 = vld [vmem:[%s12957_s12 + $0x2e0] sm:$0xff]  }
 0xcf0   :  { %v2658_v59 = vmax.f32 %v2419_v3, 0.0  ;;  %v2660_v60 = vmax.f32 %v2462_v49, 0.0  ;;  %9368 = vmatprep.subr.bf16.mxu1 %v10186_v13  ;;  %9390 = vmatprep.subr.bf16.mxu0 %v10187_v40  ;;  %v10204_v26 = vld [vmem:[%s12957_s12 + $0x218] sm:$0xff]   ;;  %v10208_v33 = vld [vmem:[%s12957_s12 + $0x220] sm:$0xff]   ;;  %v10210_v35 = vld [vmem:[%s12957_s12 + $0x268] sm:$0xff]  }
 0xcf1   :  { %v2659_v5 = vmax.f32 %v2421_v51, 0.0  ;;  %v2661_v41 = vmax.f32 %v2464_v53, 0.0  ;;  %v11640_v37 = vld [vmem:[%s12960_s11 + $0x8] sm:$0xff]  ;;  %v10214_v31 = vld [vmem:[%s12957_s12 + $0x270] sm:$0xff]  }
 0xcf2   :  { %v2674_v6 = vpack.c.bf16 %v2658_v59, %v2642_v56  ;;  %v2676_v4 = vpack.c.bf16 %v2660_v60, %v2644_v57  ;;  %v10212_v13 = vld [vmem:[%s12957_s12 + $0x228] sm:$0xff]   ;;  %v1609_v44 = vrot.slane %v11640_v37, %v10732_v43  ;;  %v1617_v47 = vrot.slane %v11640_v37, %v10738_v45  ;;  %v10215_v48 = vld [vmem:[%s12957_s12 + $0x2f0] sm:$0xff]   ;;  %v10218_v59 = vld [vmem:[%s12957_s12 + $0x278] sm:$0xff]  }
 0xcf3   :  { %v2675_v7 = vpack.c.bf16 %v2659_v5, %v2643_v63  ;;  %v2677_v8 = vpack.c.bf16 %v2661_v41, %v2645_v1  ;;  %9369 = vmatpush3.bf16.msra.mxu1 %v10188_v54  ;;  %9391 = vmatpush3.bf16.msra.mxu0 %v10189_v55  ;;  %v10213_v40 = vld [vmem:[%s12957_s12 + $0x2a8] sm:$0xff]   ;;  %v1613_v3 = vrot.slane %v11640_v37, %v10741_v46  ;;  %v10216_v51 = vld [vmem:[%s12957_s12 + $0x230] sm:$0xff]   ;;  %v10219_v60 = vld [vmem:[%s12957_s12 + $0x2f8] sm:$0xff]  }
 0xcf4   :  { %9398 = vmatprep.subr.bf16.mxu1 %v10190_v61  ;;  %9420 = vmatprep.subr.bf16.mxu0 %v10191_v62  ;;  %v1621_v49 = vrot.slane %v11640_v37, %v11451_v14  ;;  %v10217_v53 = vld [vmem:[%s12957_s12 + $0x2b0] sm:$0xff]  }
 0xcf5   :  { %3831 = vmatprep.mubr.bf16.mxu1 %v2675_v7  ;;  %3872 = vmatprep.mubr.bf16.mxu0 %v2677_v8 }
 0xcf6   :  { %3832 = vmatmul.mubr.bf16.vlgmr.msra.gmra.mrb[32].mxu1 %v2674_v6  ;;  %3873 = vmatmul.mubr.bf16.vlgmr.msra.gmra.mrb[40].mxu0 %v2676_v4 }
 0xcf7   :  { %9399 = vmatpush3.bf16.msra.mxu1 %v10192_v58  ;;  %9421 = vmatpush3.bf16.msra.mxu0 %v10193_v9  ;;  %v10220_v58 = vld [vmem:[%s12957_s12 + $0x238] sm:$0xff]  }
 0xcf8   :  { %9400 = vmatprep.subr.bf16.mxu1 %v10194_v10  ;;  %9422 = vmatprep.subr.bf16.mxu0 %v10195_v12  ;;  %v10221_v9 = vld [vmem:[%s12957_s12 + $0x2b8] sm:$0xff]  }
 0xcfb   :  { %9401 = vmatpush3.bf16.msra.mxu1 %v10196_v15  ;;  %9423 = vmatpush3.bf16.msra.mxu0 %v10197_v22 }
 0xcfc   :  { %9402 = vmatprep.subr.bf16.mxu1 %v10198_v23  ;;  %9424 = vmatprep.subr.bf16.mxu0 %v10199_v38  ;;  %v10222_v23 = vld [vmem:[%s12957_s12 + $0x340] sm:$0xff]  }
 0xcfd   :  { %v10223_v38 = vld [vmem:[%s12957_s12 + $0x3c0] sm:$0xff]  }
 0xcff   :  { %9403 = vmatpush3.bf16.msra.mxu1 %v10200_v39  ;;  %9425 = vmatpush3.bf16.msra.mxu0 %v10201_v42 }
 0xd00   :  { %9404 = vmatprep.subr.bf16.mxu1 %v10202_v24  ;;  %9426 = vmatprep.subr.bf16.mxu0 %v10203_v25 }
 0xd03   :  { %9405 = vmatpush3.bf16.msra.mxu1 %v10204_v26  ;;  %9427 = vmatpush3.bf16.msra.mxu0 %v10205_v27 }
 0xd04   :  { %9406 = vmatprep.subr.bf16.mxu1 %v10206_v28  ;;  %9428 = vmatprep.subr.bf16.mxu0 %v10207_v30 }
 0xd07   :  { %9407 = vmatpush3.bf16.msra.mxu1 %v10208_v33  ;;  %9429 = vmatpush3.bf16.msra.mxu0 %v10209_v34  ;;  %v10224_v33 = vld [vmem:[%s12957_s12 + $0x300] sm:$0xff]  }
 0xd08   :  { %9408 = vmatprep.subr.bf16.mxu1 %v10210_v35  ;;  %9430 = vmatprep.subr.bf16.mxu0 %v10211_v36  ;;  %v10225_v34 = vld [vmem:[%s12957_s12 + $0x380] sm:$0xff]   ;;  %v10226_v35 = vld [vmem:[%s12957_s12 + $0x348] sm:$0xff]  }
 0xd09   :  { %v10227_v36 = vld [vmem:[%s12957_s12 + $0x3c8] sm:$0xff]  }
 0xd0b   :  { %v2500_v11 = vpop.f32.mrb[20].mxu1  ;;  %v2543_v50 = vpop.f32.mrb[28].mxu0  ;;  %9409 = vmatpush3.bf16.msra.mxu1 %v10212_v13  ;;  %9431 = vmatpush3.bf16.msra.mxu0 %v10213_v40  ;;  %v10228_v13 = vld [vmem:[%s12957_s12 + $0x308] sm:$0xff]  }
 0xd0c   :  { %v2501_v54 = vadd.f32 %v2500_v11, %v1609_v44  ;;  %v2544_v55 = vadd.f32 %v2543_v50, %v1617_v47  ;;  %v2502_v56 = vpop.f32.mrb[21].mxu1  ;;  %v2545_v57 = vpop.f32.mrb[29].mxu0  ;;  %9410 = vmatprep.subr.bf16.mxu1 %v10214_v31  ;;  %9432 = vmatprep.subr.bf16.mxu0 %v10215_v48  ;;  %v10229_v40 = vld [vmem:[%s12957_s12 + $0x388] sm:$0xff]   ;;  %v10232_v31 = vld [vmem:[%s12957_s12 + $0x310] sm:$0xff]   ;;  %v10236_v11 = vld [vmem:[%s12957_s12 + $0x318] sm:$0xff]  }
 0xd0d   :  { %v2503_v61 = vadd.f32 %v2502_v56, %v1613_v3  ;;  %v2546_v62 = vadd.f32 %v2545_v57, %v1621_v49  ;;  %v2504_v63 = vpop.f32.mrb[22].mxu1  ;;  %v2547_v1 = vpop.f32.mrb[30].mxu0  ;;  %v10233_v48 = vld [vmem:[%s12957_s12 + $0x390] sm:$0xff]   ;;  %v10237_v50 = vld [vmem:[%s12957_s12 + $0x398] sm:$0xff]   ;;  %v10242_v56 = vld [vmem:[%s12957_s12 + $0x368] sm:$0xff]  }
 0xd0e   :  { %v2505_v5 = vadd.f32 %v2504_v63, %v1609_v44  ;;  %v2548_v41 = vadd.f32 %v2547_v1, %v1617_v47  ;;  %v2506_v6 = vpop.f32.mrb[23].mxu1  ;;  %v2549_v4 = vpop.f32.mrb[31].mxu0  ;;  %v2646_v10 = vmax.f32 %v2501_v54, 0.0  ;;  %v2648_v12 = vmax.f32 %v2544_v55, 0.0  ;;  %v10230_v44 = vld [vmem:[%s12957_s12 + $0x350] sm:$0xff]   ;;  %v10240_v54 = vld [vmem:[%s12957_s12 + $0x320] sm:$0xff]  }
 0xd0f   :  { %v2507_v7 = vadd.f32 %v2506_v6, %v1613_v3  ;;  %v2550_v8 = vadd.f32 %v2549_v4, %v1621_v49  ;;  %9411 = vmatpush3.bf16.msra.mxu1 %v10216_v51  ;;  %9433 = vmatpush3.bf16.msra.mxu0 %v10217_v53  ;;  %v2647_v39 = vmax.f32 %v2503_v61, 0.0  ;;  %v2649_v42 = vmax.f32 %v2546_v62, 0.0  ;;  %v10231_v47 = vld [vmem:[%s12957_s12 + $0x3d0] sm:$0xff]   ;;  %v10234_v3 = vld [vmem:[%s12957_s12 + $0x358] sm:$0xff]   ;;  %v10238_v51 = vld [vmem:[%s12957_s12 + $0x360] sm:$0xff]  }
 0xd10   :  { %v2662_v15 = vmax.f32 %v2505_v5, 0.0  ;;  %v2664_v22 = vmax.f32 %v2548_v41, 0.0  ;;  %9412 = vmatprep.subr.bf16.mxu1 %v10218_v59  ;;  %9434 = vmatprep.subr.bf16.mxu0 %v10219_v60  ;;  %v10235_v49 = vld [vmem:[%s12957_s12 + $0x3d8] sm:$0xff]   ;;  %v10239_v53 = vld [vmem:[%s12957_s12 + $0x3e0] sm:$0xff]   ;;  %v10243_v57 = vld [vmem:[%s12957_s12 + $0x3e8] sm:$0xff]   ;;  %v1625_v61 = vrot.slane %v11640_v37, %v11522_v16  ;;  %v1633_v62 = vrot.slane %v11640_v37, %v11525_v17 }
 0xd11   :  { %v2663_v24 = vmax.f32 %v2507_v7, 0.0  ;;  %v2665_v25 = vmax.f32 %v2550_v8, 0.0  ;;  %v10241_v55 = vld [vmem:[%s12957_s12 + $0x3a0] sm:$0xff]   ;;  %v10244_v59 = vld [vmem:[%s12957_s12 + $0x328] sm:$0xff]   ;;  %v10246_v63 = vld [vmem:[%s12957_s12 + $0x370] sm:$0xff]   ;;  %v1629_v5 = vrot.slane %v11640_v37, %v11528_v19  ;;  %v1637_v41 = vrot.slane %v11640_v37, %v11531_v20 }
 0xd12   :  { %v2678_v26 = vpack.c.bf16 %v2662_v15, %v2646_v10  ;;  %v2680_v27 = vpack.c.bf16 %v2664_v22, %v2648_v12  ;;  %v10245_v60 = vld [vmem:[%s12957_s12 + $0x3a8] sm:$0xff]   ;;  %v10247_v1 = vld [vmem:[%s12957_s12 + $0x3f0] sm:$0xff]   ;;  %v10250_v37 = vld [vmem:[%s12957_s12 + $0x378] sm:$0xff]  }
 0xd13   :  { %v2679_v28 = vpack.c.bf16 %v2663_v24, %v2647_v39  ;;  %v2681_v30 = vpack.c.bf16 %v2665_v25, %v2649_v42  ;;  %9413 = vmatpush3.bf16.msra.mxu1 %v10220_v58  ;;  %9435 = vmatpush3.bf16.msra.mxu0 %v10221_v9  ;;  %v10248_v7 = vld [vmem:[%s12957_s12 + $0x330] sm:$0xff]   ;;  %v10251_v15 = vld [vmem:[%s12957_s12 + $0x3f8] sm:$0xff]  }
 0xd14   :  { %9442 = vmatprep.subr.bf16.mxu1 %v10222_v23  ;;  %9464 = vmatprep.subr.bf16.mxu0 %v10223_v38  ;;  %v10249_v8 = vld [vmem:[%s12957_s12 + $0x3b0] sm:$0xff]  }
 0xd15   :  { %3913 = vmatprep.mubr.bf16.mxu1 %v2679_v28  ;;  %3954 = vmatprep.mubr.bf16.mxu0 %v2681_v30  ;;  %v10252_v30 = vld [vmem:[%s12957_s12 + $0x338] sm:$0xff]  }
 0xd16   :  { %3914 = vmatmul.mubr.bf16.vlgmr.msra.gmra.mrb[36].mxu1 %v2678_v26  ;;  %3955 = vmatmul.mubr.bf16.vlgmr.msra.gmra.mrb[44].mxu0 %v2680_v27 }
 0xd17   :  { %9443 = vmatpush3.bf16.msra.mxu1 %v10224_v33  ;;  %9465 = vmatpush3.bf16.msra.mxu0 %v10225_v34  ;;  %v10253_v33 = vld [vmem:[%s12957_s12 + $0x3b8] sm:$0xff]  }
 0xd18   :  { %9444 = vmatprep.subr.bf16.mxu1 %v10226_v35  ;;  %9466 = vmatprep.subr.bf16.mxu0 %v10227_v36 }
 0xd1b   :  { %9445 = vmatpush3.bf16.msra.mxu1 %v10228_v13  ;;  %9467 = vmatpush3.bf16.msra.mxu0 %v10229_v40 }
 0xd1c   :  { %9446 = vmatprep.subr.bf16.mxu1 %v10230_v44  ;;  %9468 = vmatprep.subr.bf16.mxu0 %v10231_v47 }
 0xd1f   :  { %9447 = vmatpush3.bf16.msra.mxu1 %v10232_v31  ;;  %9469 = vmatpush3.bf16.msra.mxu0 %v10233_v48 }
 0xd20   :  { %9448 = vmatprep.subr.bf16.mxu1 %v10234_v3  ;;  %9470 = vmatprep.subr.bf16.mxu0 %v10235_v49 }
 0xd23   :  { %9449 = vmatpush3.bf16.msra.mxu1 %v10236_v11  ;;  %9471 = vmatpush3.bf16.msra.mxu0 %v10237_v50 }
 0xd24   :  { %9450 = vmatprep.subr.bf16.mxu1 %v10238_v51  ;;  %9472 = vmatprep.subr.bf16.mxu0 %v10239_v53  ;;  %v8357_v53 = vld [vmem:[%s12961_s13] ss:$0 sm:$0xff] }
 0xd27   :  { %9451 = vmatpush3.bf16.msra.mxu1 %v10240_v54  ;;  %9473 = vmatpush3.bf16.msra.mxu0 %v10241_v55 }
 0xd28   :  { %9452 = vmatprep.subr.bf16.mxu1 %v10242_v56  ;;  %9474 = vmatprep.subr.bf16.mxu0 %v10243_v57 }
 0xd2b   :  { %v2586_v6 = vpop.f32.mrb[24].mxu1  ;;  %v2629_v4 = vpop.f32.mrb[32].mxu0  ;;  %9453 = vmatpush3.bf16.msra.mxu1 %v10244_v59  ;;  %9475 = vmatpush3.bf16.msra.mxu0 %v10245_v60 }
 0xd2c   :  { %v2587_v58 = vadd.f32 %v2586_v6, %v1625_v61  ;;  %v2630_v9 = vadd.f32 %v2629_v4, %v1633_v62  ;;  %v2588_v10 = vpop.f32.mrb[25].mxu1  ;;  %v2631_v12 = vpop.f32.mrb[33].mxu0  ;;  %9454 = vmatprep.subr.bf16.mxu1 %v10246_v63  ;;  %9476 = vmatprep.subr.bf16.mxu0 %v10247_v1 }
 0xd2d   :  { %v2589_v22 = vadd.f32 %v2588_v10, %v1629_v5  ;;  %v2632_v23 = vadd.f32 %v2631_v12, %v1637_v41  ;;  %v2590_v38 = vpop.f32.mrb[26].mxu1  ;;  %v2633_v39 = vpop.f32.mrb[34].mxu0 }
 0xd2e   :  { %v2591_v42 = vadd.f32 %v2590_v38, %v1625_v61  ;;  %v2634_v24 = vadd.f32 %v2633_v39, %v1633_v62  ;;  %v2592_v25 = vpop.f32.mrb[27].mxu1  ;;  %v2635_v26 = vpop.f32.mrb[35].mxu0  ;;  %v2650_v34 = vmax.f32 %v2587_v58, 0.0  ;;  %v2652_v35 = vmax.f32 %v2630_v9, 0.0 }
 0xd2f   :  { %v2593_v27 = vadd.f32 %v2592_v25, %v1629_v5  ;;  %v2636_v28 = vadd.f32 %v2635_v26, %v1637_v41  ;;  %9455 = vmatpush3.bf16.msra.mxu1 %v10248_v7  ;;  %9477 = vmatpush3.bf16.msra.mxu0 %v10249_v8  ;;  %v2651_v40 = vmax.f32 %v2589_v22, 0.0  ;;  %v2653_v44 = vmax.f32 %v2632_v23, 0.0 }
 0xd30   :  { %v2666_v36 = vmax.f32 %v2591_v42, 0.0  ;;  %v2668_v13 = vmax.f32 %v2634_v24, 0.0  ;;  %9456 = vmatprep.subr.bf16.mxu1 %v10250_v37  ;;  %9478 = vmatprep.subr.bf16.mxu0 %v10251_v15 }
 0xd31   :  { %v2667_v47 = vmax.f32 %v2593_v27, 0.0  ;;  %v2669_v31 = vmax.f32 %v2636_v28, 0.0 }
 0xd32   :  { %v2682_v48 = vpack.c.bf16 %v2666_v36, %v2650_v34  ;;  %v2684_v3 = vpack.c.bf16 %v2668_v13, %v2652_v35 }
 0xd33   :  { %v2683_v49 = vpack.c.bf16 %v2667_v47, %v2651_v40  ;;  %v2685_v11 = vpack.c.bf16 %v2669_v31, %v2653_v44  ;;  %9457 = vmatpush3.bf16.msra.mxu1 %v10252_v30  ;;  %9479 = vmatpush3.bf16.msra.mxu0 %v10253_v33 }
 0xd34   :  { %9823 = vmatprep.subr.bf16.mxu0 %v10510_v0 }
 0xd35   :  { %3995 = vmatprep.mubr.bf16.mxu1 %v2683_v49  ;;  %4036 = vmatprep.mubr.bf16.mxu0 %v2685_v11 }
 0xd36   :  { %3996 = vmatmul.mubr.bf16.vlgmr.msra.gmra.mrb[40].mxu1 %v2682_v48  ;;  %4037 = vmatmul.mubr.bf16.vlgmr.msra.gmra.mrb[48].mxu0 %v2684_v3 }
 0xd37   :  { %4299 = vmatprep.mubr.bf16.mxu1 %v10512_v29  ;;  %9839 = vmatprep.mubr.msk.bf16.mxu0 %vm10511_vm0, %v10510_v0 }
 0xda9   :  { %v9326_v50 = vpop.f32.mrb[28].mxu1  ;;  %v9348_v51 = vpop.f32.mrb[36].mxu0 }
 0xdaa   :  { %v9327_v54 = vpop.f32.mrb[29].mxu1  ;;  %v9349_v55 = vpop.f32.mrb[37].mxu0 }
 0xdab   :  { %v9328_v56 = vadd.f32 %v9327_v54, %v9326_v50  ;;  %v9350_v57 = vadd.f32 %v9349_v55, %v9348_v51  ;;  %v9329_v59 = vpop.f32.mrb[30].mxu1  ;;  %v9351_v60 = vpop.f32.mrb[38].mxu0 }
 0xdac   :  { %v9330_v61 = vpop.f32.mrb[31].mxu1  ;;  %v9352_v62 = vpop.f32.mrb[39].mxu0 }
 0xdad   :  { %v3752_v63 = vadd.f32 %v9328_v56, %v8357_v53  ;;  %v9331_v1 = vadd.f32 %v9330_v61, %v9329_v59  ;;  %v9353_v5 = vadd.f32 %v9352_v62, %v9351_v60 }
 0xdaf   :  { %v3793_v41 = vadd.f32 %v9350_v57, %v3752_v63  ;;  %v3755_v6 = vadd.f32 %v9331_v1, %v8357_v53 }
 0xdb1   :  { %v3796_v4 = vadd.f32 %v9353_v5, %v3755_v6 }
 0xdc9   :  { %v9370_v7 = vpop.f32.mrb[32].mxu1  ;;  %v9392_v8 = vpop.f32.mrb[40].mxu0 }
 0xdca   :  { %v9371_v58 = vpop.f32.mrb[33].mxu1  ;;  %v9393_v9 = vpop.f32.mrb[41].mxu0 }
 0xdcb   :  { %v9372_v10 = vadd.f32 %v9371_v58, %v9370_v7  ;;  %v9394_v12 = vadd.f32 %v9393_v9, %v9392_v8  ;;  %v9373_v37 = vpop.f32.mrb[34].mxu1  ;;  %v9395_v15 = vpop.f32.mrb[42].mxu0  ;;  %v10254_v8 = vld [vmem:[%s12978_s1 + $0xc0] ss:$12 sps:$4 sm:$0xff]   ;;  %v10256_v58 = vld [vmem:[%s12978_s1 + $0xc4] ss:$12 sps:$4 sm:$0xff]  }
 0xdcc   :  { %v9374_v22 = vpop.f32.mrb[35].mxu1  ;;  %v9396_v23 = vpop.f32.mrb[43].mxu0  ;;  %v10257_v9 = vld [vmem:[%s12978_s1 + $0xc8] ss:$12 sps:$4 sm:$0xff]   ;;  %4267 = vmatprep.subr.bf16.mxu1 %v10256_v58 }
 0xdcd   :  { %v3834_v38 = vadd.f32 %v9372_v10, %v3793_v41  ;;  %v9375_v39 = vadd.f32 %v9374_v22, %v9373_v37  ;;  %v9397_v42 = vadd.f32 %v9396_v23, %v9395_v15  ;;  %9824 = vmatpush3.bf16.msra.mxu0 %v10257_v9  ;;  %4268 = vmatpush1.bf16.msra.mxu1 %v10254_v8  ;;  %v10258_v10 = vld [vmem:[%s12978_s1 + $0xd8] ss:$12 sps:$4 sm:$0xff]  }
 0xdce   :  { %9825 = vmatprep.subr.bf16.mxu0 %v10510_v0 }
 0xdcf   :  { %v3875_v24 = vadd.f32 %v9394_v12, %v3834_v38  ;;  %v3837_v25 = vadd.f32 %v9375_v39, %v3796_v4 }
 0xdd1   :  { %v3878_v26 = vadd.f32 %v9397_v42, %v3837_v25  ;;  %v10262_v25 = vld [vmem:[%s12978_s1 + $0xf0] ss:$12 sps:$4 sm:$0xff]  }
 0xde9   :  { %v9414_v27 = vpop.f32.mrb[36].mxu1  ;;  %v9436_v28 = vpop.f32.mrb[44].mxu0 }
 0xdea   :  { %v9415_v30 = vpop.f32.mrb[37].mxu1  ;;  %v9437_v33 = vpop.f32.mrb[45].mxu0 }
 0xdeb   :  { %v9416_v34 = vadd.f32 %v9415_v30, %v9414_v27  ;;  %v9438_v35 = vadd.f32 %v9437_v33, %v9436_v28  ;;  %v9417_v36 = vpop.f32.mrb[38].mxu1  ;;  %v9439_v13 = vpop.f32.mrb[46].mxu0  ;;  %v10268_v27 = vld [vmem:[%s12978_s1 + $0x10c] ss:$12 sps:$4 sm:$0xff]   ;;  %v10266_v28 = vld [vmem:[%s12978_s1 + $0x108] ss:$12 sps:$4 sm:$0xff]  }
 0xdec   :  { %v9418_v40 = vpop.f32.mrb[39].mxu1  ;;  %v9440_v44 = vpop.f32.mrb[47].mxu0  ;;  %v10269_v30 = vld [vmem:[%s12978_s1 + $0x110] ss:$12 sps:$4 sm:$0xff]  }
 0xded   :  { %v3916_v47 = vadd.f32 %v9416_v34, %v3875_v24  ;;  %v9419_v31 = vadd.f32 %v9418_v40, %v9417_v36  ;;  %v9441_v48 = vadd.f32 %v9440_v44, %v9439_v13  ;;  %v10264_v24 = vld [vmem:[%s12978_s1 + $0xf4] ss:$12 sps:$4 sm:$0xff]   ;;  %v10272_v33 = vld [vmem:[%s12978_s1 + $0x124] ss:$12 sps:$4 sm:$0xff]   ;;  %v10276_v36 = vld [vmem:[%s12978_s1 + $0x13c] ss:$12 sps:$4 sm:$0xff]  }
 0xdee   :  { %v10270_v34 = vld [vmem:[%s12978_s1 + $0x120] ss:$12 sps:$4 sm:$0xff]   ;;  %v10274_v13 = vld [vmem:[%s12978_s1 + $0x138] ss:$12 sps:$4 sm:$0xff]  }
 0xdef   :  { %v3957_v3 = vadd.f32 %v9438_v35, %v3916_v47  ;;  %v3919_v49 = vadd.f32 %v9419_v31, %v3878_v26  ;;  %v10265_v26 = vld [vmem:[%s12978_s1 + $0xf8] ss:$12 sps:$4 sm:$0xff]   ;;  %v10273_v35 = vld [vmem:[%s12978_s1 + $0x128] ss:$12 sps:$4 sm:$0xff]   ;;  %v10277_v40 = vld [vmem:[%s12978_s1 + $0x140] ss:$12 sps:$4 sm:$0xff]  }
 0xdf0   :  { %v10280_v44 = vld [vmem:[%s12978_s1 + $0x154] ss:$12 sps:$4 sm:$0xff]   ;;  %v10278_v47 = vld [vmem:[%s12978_s1 + $0x150] ss:$12 sps:$4 sm:$0xff]   ;;  %v10281_v31 = vld [vmem:[%s12978_s1 + $0x158] ss:$12 sps:$4 sm:$0xff]  }
 0xdf1   :  { %v3960_v11 = vadd.f32 %v9441_v48, %v3919_v49  ;;  %v10284_v48 = vld [vmem:[%s12978_s1 + $0x16c] ss:$12 sps:$4 sm:$0xff]   ;;  %v10285_v49 = vld [vmem:[%s12978_s1 + $0x170] ss:$12 sps:$4 sm:$0xff]  }
 0xe09   :  { %v9458_v50 = vpop.f32.mrb[40].mxu1  ;;  %v9480_v51 = vpop.f32.mrb[48].mxu0 }
 0xe0a   :  { %v9459_v53 = vpop.f32.mrb[41].mxu1  ;;  %v9481_v54 = vpop.f32.mrb[49].mxu0 }
 0xe0b   :  { %v9460_v55 = vadd.f32 %v9459_v53, %v9458_v50  ;;  %v9482_v56 = vadd.f32 %v9481_v54, %v9480_v51  ;;  %v9461_v57 = vpop.f32.mrb[42].mxu1  ;;  %v9483_v59 = vpop.f32.mrb[50].mxu0 }
 0xe0c   :  { %v9462_v60 = vpop.f32.mrb[43].mxu1  ;;  %v9484_v61 = vpop.f32.mrb[51].mxu0 }
 0xe0d   :  { %v3998_v62 = vadd.f32 %v9460_v55, %v3957_v3  ;;  %v9463_v63 = vadd.f32 %v9462_v60, %v9461_v57  ;;  %v9485_v1 = vadd.f32 %v9484_v61, %v9483_v59  ;;  %v10282_v3 = vld [vmem:[%s12978_s1 + $0x168] ss:$12 sps:$4 sm:$0xff]   ;;  %v8486_v57 = vld [vmem:[%s12962_s14] ss:$0 sm:$0xff] }
 0xe0f   :  { %v4039_v5 = vadd.f32 %v9482_v56, %v3998_v62  ;;  %v4001_v41 = vadd.f32 %v9463_v63, %v3960_v11  ;;  %v8487_v63 = vld [vmem:[%s12963_s15] ss:$0 sm:$0xff] }
 0xe11   :  { %v4042_v6 = vadd.f32 %v9485_v1, %v4001_v41  ;;  %v4045_v4 = vadd.f32 %v4039_v5, %v11057_v52  ;;  %v10260_v52 = vld [vmem:[%s12978_s1 + $0xdc] ss:$12 sps:$4 sm:$0xff]  }
 0xe12   :  { %4269 = vmatprep.subr.bf16.mxu1 %v10260_v52 }
 0xe13   :  { %4049 = vadd.xlane.f32.xlu1 %v4045_v4  ;;  %v4046_v7 = vadd.f32 %v4042_v6, %v11059_v32  ;;  %v10261_v32 = vld [vmem:[%s12978_s1 + $0xe0] ss:$12 sps:$4 sm:$0xff]   ;;  %4270 = vmatpush1.bf16.msra.mxu1 %v10258_v10 }
 0xe14   :  { %9826 = vmatpush3.bf16.msra.mxu0 %v10261_v32  ;;  %4271 = vmatprep.subr.bf16.mxu1 %v10264_v24 }
 0xe15   :  { %4051 = vadd.xlane.f32.xlu0 %v4046_v7  ;;  %9827 = vmatprep.subr.bf16.mxu0 %v10510_v0 }
 0xe17   :  { %4272 = vmatpush1.bf16.msra.mxu1 %v10262_v25 }
 0xe18   :  { %9828 = vmatpush3.bf16.msra.mxu0 %v10265_v26  ;;  %4273 = vmatprep.subr.bf16.mxu1 %v10268_v27 }
 0xe19   :  { %9829 = vmatprep.subr.bf16.mxu0 %v10510_v0 }
 0xe1b   :  { %4274 = vmatpush1.bf16.msra.mxu1 %v10266_v28 }
 0xe1c   :  { %9830 = vmatpush3.bf16.msra.mxu0 %v10269_v30  ;;  %4275 = vmatprep.subr.bf16.mxu1 %v10272_v33 }
 0xe1d   :  { %9831 = vmatprep.subr.bf16.mxu0 %v10510_v0 }
 0xe1f   :  { %4276 = vmatpush1.bf16.msra.mxu1 %v10270_v34 }
 0xe20   :  { %9832 = vmatpush3.bf16.msra.mxu0 %v10273_v35  ;;  %4277 = vmatprep.subr.bf16.mxu1 %v10276_v36 }
 0xe21   :  { %9833 = vmatprep.subr.bf16.mxu0 %v10510_v0 }
 0xe23   :  { %4278 = vmatpush1.bf16.msra.mxu1 %v10274_v13 }
 0xe24   :  { %9834 = vmatpush3.bf16.msra.mxu0 %v10277_v40  ;;  %4279 = vmatprep.subr.bf16.mxu1 %v10280_v44 }
 0xe25   :  { %9835 = vmatprep.subr.bf16.mxu0 %v10510_v0 }
 0xe27   :  { %4280 = vmatpush1.bf16.msra.mxu1 %v10278_v47 }
 0xe28   :  { %9836 = vmatpush3.bf16.msra.mxu0 %v10281_v31  ;;  %4281 = vmatprep.subr.bf16.mxu1 %v10284_v48 }
 0xe29   :  { %9837 = vmatprep.subr.bf16.mxu0 %v10510_v0 }
 0xe2b   :  { %4282 = vmatpush1.bf16.msra.mxu1 %v10282_v3 }
 0xe2c   :  { %9838 = vmatpush3.bf16.msra.mxu0 %v10285_v49 }
 0xea0   :  { %v4050_v12 = vpop.xlane.xlu1 %4049 }
 0xea1   :  { %v4053_v37 = vmul.f32 0.0078125, %v4050_v12 }
 0xea2   :  { %v4052_v15 = vpop.xlane.xlu0 %4051 }
 0xea3   :  { %v4055_v22 = vsub.f32 %v4045_v4, %v4053_v37  ;;  %v4054_v23 = vmul.f32 0.0078125, %v4052_v15  ;;  %v8520_v4 = vld [vmem:[%s12953_s5 + $0x3] sm:$0x7] }
 0xea4   :  { %v4135_v8 = vrot.slane %v8520_v4, %v10738_v45  ;;  %v4131_v52 = vrot.slane %v8520_v4, %v10741_v46 }
 0xea5   :  { %v4056_v38 = vsub.f32 %v4046_v7, %v4054_v23  ;;  %v4057_v39 = vmul.f32 %v4055_v22, %v4055_v22  ;;  %v4127_v7 = vrot.slane %v8520_v4, %v10732_v43 }
 0xea7   :  { %4059 = vadd.xlane.f32.xlu1 %v4057_v39  ;;  %v4058_v42 = vmul.f32 %v4056_v38, %v4056_v38 }
 0xea9   :  { %4061 = vadd.xlane.f32.xlu0 %v4058_v42 }
 0xf34   :  { %v4060_v11 = vpop.xlane.xlu1 %4059 }
 0xf35   :  { %v4063_v50 = vmul.f32 0.0078125, %v4060_v11 }
 0xf36   :  { %v4062_v51 = vpop.xlane.xlu0 %4061 }
 0xf37   :  { %v4065_v53 = vadd.f32 1e-05, %v4063_v50  ;;  %v4064_v54 = vmul.f32 0.0078125, %v4062_v51 }
 0xf39   :  { %10466 = vrsqrt.f32 %v4065_v53  ;;  %v4066_v55 = vadd.f32 1e-05, %v4064_v54 }
 0xf3b   :  { %10468 = vrsqrt.f32 %v4066_v55 }
 0xf43   :  { %v10467_v56 = vpop.eup %10466 }
 0xf44   :  { %v4069_v59 = vmul.f32 %v10467_v56, %v4055_v22 }
 0xf45   :  { %v10469_v60 = vpop.eup %10468 }
 0xf46   :  { %v4070_v61 = vmul.f32 %v10469_v60, %v4056_v38  ;;  %v4077_v62 = vmul.f32 %v8486_v57, %v4069_v59 }
 0xf48   :  { %v4078_v1 = vmul.f32 %v8486_v57, %v4070_v61  ;;  %v11878_v5 = vadd.f32 %v8487_v63, %v4077_v62 }
 0xf4a   :  { %v11880_v41 = vadd.f32 %v8487_v63, %v4078_v1 }
 0xf4c   :  { %v4087_v6 = vpack.c.bf16 %v11880_v41, %v11878_v5 }
 0xf4e   :  { %4300 = vmatmul.mubr.bf16.vlgmr.msra.gmra.mrb[44].mxu1 %v4087_v6  ;;  %9840 = vmatmul.mubr.bf16.vlgmr.msra.gmra.mrb[52].mxu0 %v4087_v6 }
0x1021   :  { %v4301_v58 = vpop.f32.mrb[44].mxu1  ;;  %v4344_v9 = vpop.f32.mrb[52].mxu0 }
0x1022   :  { %v11890_v32 = vadd.f32 %v4301_v58, %v4127_v7  ;;  %v4303_v10 = vpop.f32.mrb[45].mxu1  ;;  %v9841_v12 = vpop.f32.mrb[53].mxu0  ;;  %v4345_v22 = vadd.f32 %v4344_v9, %v4135_v8 }
0x1023   :  { %v4305_v37 = vpop.f32.mrb[46].mxu1  ;;  %v4347_v15 = vpop.f32.mrb[54].mxu0  ;;  %v4304_v42 = vadd.f32 %v4303_v10, %v4131_v52 }
0x1024   :  { %v4348_v23 = vadd.f32 %v4347_v15, %v4135_v8  ;;  %v4307_v38 = vpop.f32.mrb[47].mxu1  ;;  %v9842_v39 = vpop.f32.mrb[55].mxu0  ;;  %9847 = vmatprep.mubr.msk.f32.mxu1 %vm439_vm2, %v11890_v32  ;;  %v11902_v30 = vadd.f32 %v4305_v37, %v4127_v7 }
0x1025   :  { %v4308_v24 = vadd.f32 %v4307_v38, %v4131_v52 }
0x1026   :  { %v9985_v25 = vpack.c.bf16 %v4348_v23, %v4345_v22  ;;  %v11894_v26 = vpack.i.bf16 %v4348_v23, %v4345_v22 }
0x1027   :  { %v9979_v27 = vpack.c.bf16 %v4308_v24, %v4304_v42  ;;  %v11896_v28 = vpack.i.bf16 %v4308_v24, %v4304_v42 }
0x1029   :  { %9981 = vmatprep.subr.msk.bf16.mxu1 %vm10756_vm3, %v9979_v27 }
0x102a   :  { %9984 = vmatpush3.bf16.xpose.msk.msra.mxu1 %vm10756_vm3, %v9979_v27 }
0x102b   :  { %9986 = vmatprep.subr.bf16.mxu1 %v9985_v25 }
0x1031   :  { %9848 = vmatmul.mubr.msk.f32.vlgmr.msra.gmra.mrb[48].mxu1 %vm439_vm2, %v11902_v30 }
0x1032   :  { %9988 = vmatpush3.bf16.msra.mxu1 %v9985_v25 }
0x1104   :  { %v9849_v33 = vpop.f32.mrb[48].mxu1 }
0x1105   :  { %v4439_v34 = vmul.f32 0.17677669, %v9849_v33  ;;  %v4429_v35 = vpop.f32.mrb[49].mxu1 }
0x1106   :  { %v4438_v36 = vmul.f32 0.17677669, %v4429_v35 }
0x1107   :  { %v4441_v13 = vsel %vm10782_vm4, %v4439_v34, -1e+30 }
0x1108   :  { %v4445_v40 = vsel %vm86_vm1, %v4441_v13, -inf  ;;  %v4440_v44 = vsel %vm10786_vm5, %v4438_v36, -1e+30 }
0x1109   :  { %4446 = vmax.xlane.f32.xlu0 %v4445_v40  ;;  %v4442_v47 = vsel %vm86_vm1, %v4440_v44, -inf }
0x110a   :  { %4443 = vmax.xlane.f32.xlu1 %v4442_v47 }
0x111b   :  { %10056 = vrot.lane.b32.xlu1 %v11896_v28, %s10513_s27 }
0x1196   :  { %v4447_v31 = vpop.xlane.xlu0 %4446 }
0x1197   :  { %v4449_v48 = vsub.f32 %v4441_v13, %v4447_v31  ;;  %v4444_v3 = vpop.xlane.xlu1 %4443 }
0x1198   :  { %v4448_v49 = vsub.f32 %v4440_v44, %v4444_v3 }
0x1199   :  { %v4452_v11 = vmul.f32 1.442695, %v4449_v48 }
0x119a   :  { %v4450_v50 = vmul.f32 1.442695, %v4448_v49 }
0x119b   :  { %10470 = vpow2.f32 %v4452_v11  ;;  %v10057_v51 = vpop.permute.xlu1 %10056 }
0x119c   :  { %10472 = vpow2.f32 %v4450_v50  ;;  %v10059_v53 = vunpack.i.h.bf16 %v10057_v51  ;;  %v10058_v54 = vunpack.i.l.bf16 %v10057_v51 }
0x119e   :  { %v9989_v55 = vpack.c.bf16 %v10059_v53, %v10058_v54 }
0x11a0   :  { %9991 = vmatprep.subr.msk.bf16.mxu1 %vm10756_vm3, %v9989_v55 }
0x11a5   :  { %v10471_v56 = vpop.eup %10470 }
0x11a6   :  { %v10473_v57 = vpop.eup %10472  ;;  %v4457_v59 = vsel %vm86_vm1, %v10471_v56, 0.0 }
0x11a7   :  { %4458 = vadd.xlane.f32.xlu0 %v4457_v59  ;;  %v4454_v60 = vsel %vm86_vm1, %v10473_v57, 0.0 }
0x11a8   :  { %4455 = vadd.xlane.f32.xlu1 %v4454_v60 }
0x11b9   :  { %4549 = vrot.lane.b32.xlu1 %v11902_v30, %s10513_s27 }
0x11bd   :  { %4547 = vrot.lane.b32.xlu0 %v11890_v32, %s10513_s27 }
0x1234   :  { %v4459_v61 = vpop.xlane.xlu0 %4458 }
0x1235   :  { %10474 = vrcp.f32 %v4459_v61  ;;  %v4456_v62 = vpop.xlane.xlu1 %4455 }
0x1236   :  { %10476 = vrcp.f32 %v4456_v62 }
0x1238   :  { %v4548_v7 = vpop.permute.xlu0 %4547 }
0x1239   :  { %v4550_v8 = vpop.permute.xlu1 %4549 }
0x123f   :  { %v10475_v63 = vpop.eup %10474 }
0x1240   :  { %v10477_v1 = vpop.eup %10476  ;;  %v4463_v4 = vmul.f32 %v10475_v63, %v10471_v56 }
0x1241   :  { %v4462_v6 = vmul.f32 %v10477_v1, %v10473_v57 }
0x1243   :  { %9854 = vmatprep.mubr.msk.f32.mxu1 %vm86_vm1, %v4462_v6 }
0x1244   :  { %9855 = vmatmul.mubr.msk.f32.vlgmr.msra.gmra.mrb[50].mxu1 %vm86_vm1, %v4463_v4 }
0x1245   :  { %9994 = vmatpush3.bf16.xpose.msk.msra.mxu1 %vm10756_vm3, %v9989_v55  ;;  %9861 = vmatprep.mubr.msk.f32.mxu1 %vm439_vm2, %v4548_v7 }
0x124c   :  { %9862 = vmatmul.mubr.msk.f32.vlgmr.msra.gmra.mrb[52].mxu1 %vm439_vm2, %v4550_v8 }
0x1317   :  { %v9856_v58 = vpop.f32.mrb[50].mxu1 }
0x1318   :  { %4546 = vst.msk [vmem:[#allocation2 + $0x8] sm:$0xff] %vm439_vm2, %v9856_v58  ;;  %v4536_v9 = vpop.f32.mrb[51].mxu1 }
0x1319   :  { %4545 = vst.msk [vmem:[#allocation2] sm:$0xff] %vm439_vm2, %v4536_v9 }
0x131f   :  { %v9863_v52 = vpop.f32.mrb[52].mxu1 }
0x1320   :  { %v4639_v10 = vmul.f32 0.17677669, %v9863_v52  ;;  %v4629_v12 = vpop.f32.mrb[53].mxu1 }
0x1321   :  { %v4638_v37 = vmul.f32 0.17677669, %v4629_v12 }
0x1322   :  { %v4641_v15 = vsel %vm10782_vm4, %v4639_v10, -1e+30 }
0x1323   :  { %v4645_v22 = vsel %vm86_vm1, %v4641_v15, -inf  ;;  %v4640_v23 = vsel %vm10786_vm5, %v4638_v37, -1e+30 }
0x1324   :  { %4646 = vmax.xlane.f32.xlu0 %v4645_v22  ;;  %v4642_v38 = vsel %vm86_vm1, %v4640_v23, -inf }
0x1325   :  { %4643 = vmax.xlane.f32.xlu1 %v4642_v38 }
0x13b1   :  { %v4647_v39 = vpop.xlane.xlu0 %4646 }
0x13b2   :  { %v4649_v42 = vsub.f32 %v4641_v15, %v4647_v39  ;;  %v4644_v24 = vpop.xlane.xlu1 %4643 }
0x13b3   :  { %v4648_v25 = vsub.f32 %v4640_v23, %v4644_v24 }
0x13b4   :  { %v4652_v27 = vmul.f32 1.442695, %v4649_v42 }
0x13b5   :  { %v4650_v33 = vmul.f32 1.442695, %v4648_v25 }
0x13b6   :  { %10478 = vpow2.f32 %v4652_v27 }
0x13b7   :  { %10480 = vpow2.f32 %v4650_v33 }
0x13c0   :  { %v10479_v34 = vpop.eup %10478 }
0x13c1   :  { %v10481_v35 = vpop.eup %10480  ;;  %v4657_v36 = vsel %vm86_vm1, %v10479_v34, 0.0 }
0x13c2   :  { %4658 = vadd.xlane.f32.xlu1 %v4657_v36  ;;  %v4654_v13 = vsel %vm86_vm1, %v10481_v35, 0.0 }
0x13c3   :  { %4655 = vadd.xlane.f32.xlu0 %v4654_v13 }
0x13d3   :  { %10066 = vrot.lane.b32.xlu1 %v11896_v28, %s10514_s28 }
0x13d7   :  { %10071 = vrot.lane.b32.xlu1 %v11896_v28, %s10515_s29 }
0x13d9   :  { %10061 = vrot.lane.b32.xlu0 %v11894_v26, %s10513_s27 }
0x13db   :  { %4765 = vrot.lane.b32.xlu1 %v11902_v30, %s10514_s28 }
0x13dd   :  { %4763 = vrot.lane.b32.xlu0 %v11890_v32, %s10514_s28 }
0x13df   :  { %4979 = vrot.lane.b32.xlu1 %v11902_v30, %s10515_s29 }
0x13e1   :  { %4977 = vrot.lane.b32.xlu0 %v11890_v32, %s10515_s29 }
0x144f   :  { %v4659_v40 = vpop.xlane.xlu1 %4658 }
0x1450   :  { %10482 = vrcp.f32 %v4659_v40  ;;  %v4656_v44 = vpop.xlane.xlu0 %4655 }
0x1451   :  { %10484 = vrcp.f32 %v4656_v44 }
0x1453   :  { %v10067_v28 = vpop.permute.xlu1 %10066 }
0x1454   :  { %v10062_v47 = vpop.permute.xlu0 %10061  ;;  %v10069_v31 = vunpack.i.h.bf16 %v10067_v28  ;;  %v10068_v48 = vunpack.i.l.bf16 %v10067_v28 }
0x1455   :  { %v10064_v3 = vunpack.i.h.bf16 %v10062_v47  ;;  %v10063_v49 = vunpack.i.l.bf16 %v10062_v47 }
0x1456   :  { %v9999_v55 = vpack.c.bf16 %v10069_v31, %v10068_v48 }
0x1457   :  { %v9995_v11 = vpack.c.bf16 %v10064_v3, %v10063_v49  ;;  %v10072_v50 = vpop.permute.xlu1 %10071 }
0x1458   :  { %v10074_v51 = vunpack.i.h.bf16 %v10072_v50  ;;  %v10073_v53 = vunpack.i.l.bf16 %v10072_v50  ;;  %v4764_v54 = vpop.permute.xlu0 %4763 }
0x1459   :  { %9996 = vmatprep.subr.bf16.mxu1 %v9995_v11 }
0x145a   :  { %v10483_v30 = vpop.eup %10482  ;;  %v10009_v56 = vpack.c.bf16 %v10074_v51, %v10073_v53  ;;  %9998 = vmatpush3.bf16.msra.mxu1 %v9995_v11 }
0x145b   :  { %v10485_v32 = vpop.eup %10484  ;;  %10001 = vmatprep.subr.msk.bf16.mxu1 %vm10756_vm3, %v9999_v55  ;;  %v4663_v60 = vmul.f32 %v10483_v30, %v10479_v34  ;;  %v4766_v61 = vpop.permute.xlu1 %4765 }
0x145c   :  { %v4978_v57 = vpop.permute.xlu0 %4977  ;;  %10011 = vmatprep.subr.msk.bf16.mxu0 %vm10756_vm3, %v10009_v56  ;;  %v4662_v59 = vmul.f32 %v10485_v32, %v10481_v35 }
0x145d   :  { %10014 = vmatpush3.bf16.xpose.msk.msra.mxu0 %vm10756_vm3, %v10009_v56  ;;  %9889 = vmatprep.mubr.msk.f32.mxu0 %vm439_vm2, %v4978_v57 }
0x145e   :  { %9868 = vmatprep.mubr.msk.f32.mxu1 %vm86_vm1, %v4662_v59  ;;  %9899 = vmatprep.subr.bf16.mxu0 %v10510_v0 }
0x145f   :  { %9869 = vmatmul.mubr.msk.f32.vlgmr.msra.gmra.mrb[54].mxu1 %vm86_vm1, %v4663_v60  ;;  %v4980_v62 = vpop.permute.xlu1 %4979 }
0x1460   :  { %9875 = vmatprep.mubr.msk.f32.mxu1 %vm439_vm2, %v4764_v54 }
0x1463   :  { %10004 = vmatpush3.bf16.xpose.msk.msra.mxu1 %vm10756_vm3, %v9999_v55 }
0x1464   :  { %9890 = vmatmul.mubr.msk.f32.vlgmr.msra.gmra.mrb[56].mxu0 %vm439_vm2, %v4980_v62 }
0x1465   :  { %9915 = vmatprep.mubr.msk.bf16.mxu0 %vm10511_vm0, %v10510_v0 }
0x146a   :  { %9876 = vmatmul.mubr.msk.f32.vlgmr.msra.gmra.mrb[56].mxu1 %vm439_vm2, %v4766_v61 }
0x1532   :  { %v9870_v63 = vpop.f32.mrb[54].mxu1 }
0x1533   :  { %v4744_v1 = vpop.f32.mrb[55].mxu1 }
0x1537   :  { %v9891_v6 = vpop.f32.mrb[56].mxu0 }
0x1538   :  { %v5059_v4 = vpop.f32.mrb[57].mxu0  ;;  %v5069_v15 = vmul.f32 0.17677669, %v9891_v6 }
0x1539   :  { %v5068_v9 = vmul.f32 0.17677669, %v5059_v4 }
0x153a   :  { %v5071_v38 = vsel %vm10782_vm4, %v5069_v15, -1e+30  ;;  %v10291_v15 = vld [vmem:[%s12954_s6 + $0x68] sm:$0xff]  }
0x153b   :  { %v5070_v22 = vsel %vm10786_vm5, %v5068_v9, -1e+30  ;;  %v5075_v39 = vsel %vm86_vm1, %v5071_v38, -inf }
0x153c   :  { %v5072_v23 = vsel %vm86_vm1, %v5070_v22, -inf }
0x153d   :  { %v9877_v7 = vpop.f32.mrb[56].mxu1 }
0x153e   :  { %v4855_v8 = vmul.f32 0.17677669, %v9877_v7  ;;  %v4845_v58 = vpop.f32.mrb[57].mxu1 }
0x153f   :  { %v4854_v52 = vmul.f32 0.17677669, %v4845_v58 }
0x1540   :  { %v4857_v2 = vsel %vm10782_vm4, %v4855_v8, -1e+30 }
0x1541   :  { %v4861_v10 = vsel %vm86_vm1, %v4857_v2, -inf  ;;  %v4856_v12 = vsel %vm10786_vm5, %v4854_v52, -1e+30  ;;  %v10286_v52 = vld [vmem:[%s12954_s6 + $0x40] sm:$0xff]  }
0x1542   :  { %4862 = vmax.xlane.f32.xlu1 %v4861_v10  ;;  %v4858_v37 = vsel %vm86_vm1, %v4856_v12, -inf  ;;  %9900 = vmatpush3.bf16.msra.mxu0 %v10286_v52  ;;  %v10288_v10 = vld [vmem:[%s12954_s6 + $0x50] sm:$0xff]   ;;  %v8632_v52 = vld [vmem:[%s12956_s10 + $0x508] sm:$0xff] }
0x1543   :  { %4859 = vmax.xlane.f32.xlu0 %v4858_v37  ;;  %9901 = vmatprep.subr.bf16.mxu0 %v10510_v0  ;;  %v10290_v37 = vld [vmem:[%s12954_s6 + $0x60] sm:$0xff]  }
0x1547   :  { %5073 = vmax.xlane.f32.xlu0 %v5072_v23  ;;  %v10293_v23 = vld [vmem:[%s12954_s6 + $0x78] sm:$0xff]  }
0x154b   :  { %5076 = vmax.xlane.f32.xlu0 %v5075_v39 }
0x15cf   :  { %v4863_v25 = vpop.xlane.xlu1 %4862 }
0x15d0   :  { %v4860_v42 = vpop.xlane.xlu0 %4859  ;;  %v4865_v34 = vsub.f32 %v4857_v2, %v4863_v25  ;;  %v10287_v2 = vld [vmem:[%s12954_s6 + $0x48] sm:$0xff]  }
0x15d1   :  { %v4864_v24 = vsub.f32 %v4856_v12, %v4860_v42  ;;  %9902 = vmatpush3.bf16.msra.mxu0 %v10287_v2  ;;  %v10289_v12 = vld [vmem:[%s12954_s6 + $0x58] sm:$0xff]  }
0x15d2   :  { %v4868_v40 = vmul.f32 1.442695, %v4865_v34  ;;  %9903 = vmatprep.subr.bf16.mxu0 %v10510_v0 }
0x15d3   :  { %v4866_v35 = vmul.f32 1.442695, %v4864_v24 }
0x15d4   :  { %v5074_v27 = vpop.xlane.xlu0 %5073 }
0x15d5   :  { %v5078_v33 = vsub.f32 %v5070_v22, %v5074_v27  ;;  %9904 = vmatpush3.bf16.msra.mxu0 %v10288_v10  ;;  %v10292_v22 = vld [vmem:[%s12954_s6 + $0x70] sm:$0xff]   ;;  %v8640_v10 = vld [vmem:[%s12956_s10 + $0x548] sm:$0xff] }
0x15d6   :  { %9905 = vmatprep.subr.bf16.mxu0 %v10510_v0 }
0x15d7   :  { %v5080_v36 = vmul.f32 1.442695, %v5078_v33 }
0x15d8   :  { %v5077_v13 = vpop.xlane.xlu0 %5076 }
0x15d9   :  { %10486 = vpow2.f32 %v5080_v36  ;;  %v5079_v21 = vsub.f32 %v5071_v38, %v5077_v13  ;;  %9906 = vmatpush3.bf16.msra.mxu0 %v10289_v12 }
0x15da   :  { %10488 = vpow2.f32 %v4866_v35  ;;  %9907 = vmatprep.subr.bf16.mxu0 %v10510_v0 }
0x15db   :  { %v5082_v44 = vmul.f32 1.442695, %v5079_v21  ;;  %v8586_v21 = vld [vmem:[%s12955_s7 + $0x1] ss:$0 sm:$0xff] }
0x15dd   :  { %10490 = vpow2.f32 %v5082_v44  ;;  %9908 = vmatpush3.bf16.msra.mxu0 %v10290_v37  ;;  %v8763_v37 = vcombine.low %v8632_v52, %v8640_v10 }
0x15de   :  { %10492 = vpow2.f32 %v4868_v40  ;;  %9909 = vmatprep.subr.bf16.mxu0 %v10510_v0 }
0x15e1   :  { %9910 = vmatpush3.bf16.msra.mxu0 %v10291_v15  ;;  %v8764_v15 = vcombine.high %v8632_v52, %v8640_v10 }
0x15e2   :  { %9911 = vmatprep.subr.bf16.mxu0 %v10510_v0 }
0x15e3   :  { %v10487_v18 = vpop.eup %10486 }
0x15e4   :  { %v5084_v28 = vsel %vm86_vm1, %v10487_v18, 0.0  ;;  %v10489_v47 = vpop.eup %10488 }
0x15e5   :  { %5085 = vadd.xlane.f32.xlu1 %v5084_v28  ;;  %v4870_v48 = vsel %vm86_vm1, %v10489_v47, 0.0  ;;  %9912 = vmatpush3.bf16.msra.mxu0 %v10292_v22  ;;  %v8647_v22 = vld [vmem:[%s12956_s10 + $0x580] sm:$0xff] }
0x15e6   :  { %9913 = vmatprep.subr.bf16.mxu0 %v10510_v0 }
0x15e7   :  { %v10491_v31 = vpop.eup %10490 }
0x15e8   :  { %v5087_v3 = vsel %vm86_vm1, %v10491_v31, 0.0  ;;  %v10493_v49 = vpop.eup %10492 }
0x15e9   :  { %4871 = vadd.xlane.f32.xlu1 %v4870_v48  ;;  %5088 = vadd.xlane.f32.xlu0 %v5087_v3  ;;  %v4873_v11 = vsel %vm86_vm1, %v10493_v49, 0.0 }
0x15ea   :  { %9914 = vmatpush3.bf16.msra.mxu0 %v10293_v23  ;;  %v8655_v23 = vld [vmem:[%s12956_s10 + $0x5c0] sm:$0xff] }
0x15ed   :  { %4874 = vadd.xlane.f32.xlu0 %v4873_v11  ;;  %v8607_v11 = vld [vmem:[%s12956_s10 + $0x440] sm:$0xff] }
0x15fa   :  { %10076 = vrot.lane.b32.xlu1 %v11894_v26, %s10514_s28 }
0x15fe   :  { %4755 = vrot.lane.b32.xlu1 %v4744_v1, %s10515_s29 }
0x1602   :  { %4757 = vrot.lane.b32.xlu1 %v9870_v63, %s10515_s29 }
0x1603   :  { %10081 = vrot.lane.b32.xlu0 %v11894_v26, %s10515_s29 }
0x1672   :  { %v5086_v50 = vpop.xlane.xlu1 %5085 }
0x1676   :  { %v4872_v51 = vpop.xlane.xlu1 %4871  ;;  %v5089_v53 = vpop.xlane.xlu0 %5088 }
0x1677   :  { %10494 = vrcp.f32 %v4872_v51 }
0x1678   :  { %10496 = vrcp.f32 %v5086_v50  ;;  %v8600_v50 = vld [vmem:[%s12956_s10 + $0x408] sm:$0xff] }
0x167a   :  { %v10077_v54 = vpop.permute.xlu1 %10076  ;;  %v4875_v55 = vpop.xlane.xlu0 %4874 }
0x167b   :  { %v10079_v30 = vunpack.i.h.bf16 %v10077_v54  ;;  %v10078_v56 = vunpack.i.l.bf16 %v10077_v54  ;;  %10498 = vrcp.f32 %v4875_v55  ;;  %v8623_v54 = vld [vmem:[%s12956_s10 + $0x4c0] sm:$0xff] }
0x167c   :  { %10500 = vrcp.f32 %v5089_v53 }
0x167d   :  { %v10005_v32 = vpack.c.bf16 %v10079_v30, %v10078_v56 }
0x167e   :  { %v4756_v57 = vpop.permute.xlu1 %4755  ;;  %v10082_v59 = vpop.permute.xlu0 %10081 }
0x167f   :  { %4761 = vst.msk [vmem:[#allocation2] sm:$0xff] %vm850_vm6, %v4756_v57  ;;  %v10084_v60 = vunpack.i.h.bf16 %v10082_v59  ;;  %v10083_v61 = vunpack.i.l.bf16 %v10082_v59  ;;  %10006 = vmatprep.subr.bf16.mxu1 %v10005_v32  ;;  %v8624_v57 = vld [vmem:[%s12956_s10 + $0x4c8] sm:$0xff] }
0x1680   :  { %10008 = vmatpush3.bf16.msra.mxu1 %v10005_v32  ;;  %v8616_v32 = vld [vmem:[%s12956_s10 + $0x488] sm:$0xff] }
0x1681   :  { %v10495_v26 = vpop.eup %10494  ;;  %v10015_v62 = vpack.c.bf16 %v10084_v60, %v10083_v61  ;;  %v8748_v59 = vcombine.high %v8616_v32, %v8624_v57  ;;  %v8747_v61 = vcombine.low %v8616_v32, %v8624_v57  ;;  %v8719_v32 = vld [vmem:[%s12956_s10 + $0x7c0] sm:$0xff]  ;;  %v8712_v57 = vld [vmem:[%s12956_s10 + $0x788] sm:$0xff] }
0x1682   :  { %v4758_v63 = vpop.permute.xlu1 %4757  ;;  %v4878_v1 = vmul.f32 %v10495_v26, %v10489_v47  ;;  %v10497_v6 = vpop.eup %10496 }
0x1683   :  { %4762 = vst.msk [vmem:[#allocation2 + $0x8] sm:$0xff] %vm850_vm6, %v4758_v63  ;;  %10016 = vmatprep.subr.bf16.mxu1 %v10015_v62  ;;  %v5092_v58 = vmul.f32 %v10497_v6, %v10487_v18 }
0x1684   :  { %9882 = vmatprep.mubr.msk.f32.mxu1 %vm86_vm1, %v4878_v1 }
0x1685   :  { %v10499_v4 = vpop.eup %10498 }
0x1686   :  { %v4879_v7 = vmul.f32 %v10499_v4, %v10493_v49  ;;  %v10501_v8 = vpop.eup %10500  ;;  %v8599_v49 = vld [vmem:[%s12956_s10 + $0x400] sm:$0xff] }
0x1687   :  { %v5093_v9 = vmul.f32 %v10501_v8, %v10491_v31  ;;  %v8729_v51 = vcombine.low %v8599_v49, %v8607_v11  ;;  %v8730_v53 = vcombine.high %v8599_v49, %v8607_v11 }
0x1688   :  { %9883 = vmatmul.mubr.msk.f32.vlgmr.msra.gmra.mrb[58].mxu1 %vm86_vm1, %v4879_v7 }
0x1689   :  { %10018 = vmatpush3.bf16.msra.mxu1 %v10015_v62  ;;  %9896 = vmatprep.mubr.msk.f32.mxu1 %vm86_vm1, %v5092_v58  ;;  %v8631_v58 = vld [vmem:[%s12956_s10 + $0x500] sm:$0xff] }
0x168a   :  { %6207 = vmatprep.subr.bf16.mxu1 %v8730_v53  ;;  %v8696_v53 = vld [vmem:[%s12956_s10 + $0x708] sm:$0xff] }
0x168c   :  { %9897 = vmatmul.mubr.msk.f32.vlgmr.msra.gmra.mrb[60].mxu1 %vm86_vm1, %v5093_v9  ;;  %v8639_v9 = vld [vmem:[%s12956_s10 + $0x540] sm:$0xff] }
0x168d   :  { %6239 = vmatprep.mubr.bf16.mxu1 %v10512_v29  ;;  %6208 = vmatpush1.bf16.msra.mxu1 %v8729_v51  ;;  %v8762_v2 = vcombine.high %v8631_v58, %v8639_v9  ;;  %v8761_v12 = vcombine.low %v8631_v58, %v8639_v9  ;;  %v8703_v51 = vld [vmem:[%s12956_s10 + $0x740] sm:$0xff]  ;;  %v8610_v9 = vld [vmem:[%s12956_s10 + $0x458] sm:$0xff] }
0x175b   :  { %v9884_v38 = vpop.f32.mrb[58].mxu1 }
0x175c   :  { %4971 = vrot.lane.b32.xlu1 %v9884_v38, %s10514_s28  ;;  %v4958_v39 = vpop.f32.mrb[59].mxu1  ;;  %v8648_v38 = vld [vmem:[%s12956_s10 + $0x588] sm:$0xff] }
0x175d   :  { %4969 = vrot.lane.b32.xlu0 %v4958_v39, %s10514_s28  ;;  %v8778_v39 = vcombine.high %v8647_v22, %v8655_v23 }
0x175f   :  { %v9898_v42 = vpop.f32.mrb[60].mxu1 }
0x1760   :  { %5185 = vrot.lane.b32.xlu1 %v9898_v42, %s10513_s27  ;;  %v5172_v24 = vpop.f32.mrb[61].mxu1  ;;  %v8656_v42 = vld [vmem:[%s12956_s10 + $0x5c8] sm:$0xff] }
0x1761   :  { %5183 = vrot.lane.b32.xlu0 %v5172_v24, %s10513_s27  ;;  %v8777_v24 = vcombine.low %v8647_v22, %v8655_v23 }
0x17ce   :  { %v4972_v25 = vpop.permute.xlu1 %4971 }
0x17cf   :  { %4976 = vst.msk [vmem:[#allocation2 + $0x8] sm:$0xff] %vm1065_vm7, %v4972_v25  ;;  %v4970_v27 = vpop.permute.xlu0 %4969  ;;  %v8779_v25 = vcombine.low %v8648_v38, %v8656_v42 }
0x17d0   :  { %4975 = vst.msk [vmem:[#allocation2] sm:$0xff] %vm1065_vm7, %v4970_v27  ;;  %v8780_v27 = vcombine.high %v8648_v38, %v8656_v42  ;;  %v8597_v42 = vld [vmem:[%s12958_s8 + $0x1] ss:$0 sm:$0xff] }
0x17d2   :  { %v5186_v33 = vpop.permute.xlu1 %5185 }
0x17d3   :  { %5190 = vst.msk [vmem:[#allocation2 + $0x8] sm:$0xff] %vm1280_vm8, %v5186_v33  ;;  %v5184_v34 = vpop.permute.xlu0 %5183  ;;  %v8663_v33 = vld [vmem:[%s12956_s10 + $0x600] sm:$0xff] }
0x17d4   :  { %5189 = vst.msk [vmem:[#allocation2] sm:$0xff] %vm1280_vm8, %v5184_v34  ;;  %v8671_v34 = vld [vmem:[%s12956_s10 + $0x640] sm:$0xff] }
0x17da   :  { %v5192_v35 = vld [vmem:[#allocation2 + $0x8] sm:$0xff] }
0x17db   :  { %v5191_v36 = vld [vmem:[#allocation2] sm:$0xff] }
0x17dc   :  { %v5193_v13 = vpack.c.bf16 %v5192_v35, %v5191_v36  ;;  %v8664_v35 = vld [vmem:[%s12956_s10 + $0x608] sm:$0xff]  ;;  %v8794_v36 = vcombine.high %v8663_v33, %v8671_v34 }
0x17de   :  { %9916 = vmatmul.mubr.bf16.vlgmr.msra.gmra.mrb[60].mxu0 %v5193_v13  ;;  %v8672_v13 = vld [vmem:[%s12956_s10 + $0x648] sm:$0xff] }
0x17df   :  { %6282 = vmatprep.mubr.bf16.mxu0 %v10512_v29 }
0x18b1   :  { %v5301_v40 = vpop.f32.mrb[60].mxu0 }
0x18b2   :  { %v5302_v44 = vadd.f32 %v8586_v21, %v5301_v40  ;;  %v9917_v18 = vpop.f32.mrb[61].mxu0  ;;  %v8795_v40 = vcombine.low %v8664_v35, %v8672_v13 }
0x18b3   :  { %v5304_v28 = vpop.f32.mrb[62].mxu0  ;;  %v8679_v18 = vld [vmem:[%s12956_s10 + $0x680] sm:$0xff] }
0x18b4   :  { %v5305_v47 = vadd.f32 %v8586_v21, %v5304_v28  ;;  %v9918_v31 = vpop.f32.mrb[63].mxu0  ;;  %v5308_v48 = vadd.f32 %v5302_v44, %v11878_v5  ;;  %v8608_v5 = vld [vmem:[%s12956_s10 + $0x448] sm:$0xff]  ;;  %v8793_v21 = vcombine.low %v8663_v33, %v8671_v34  ;;  %v8796_v44 = vcombine.high %v8664_v35, %v8672_v13  ;;  %v8687_v28 = vld [vmem:[%s12956_s10 + $0x6c0] sm:$0xff]  ;;  %v8617_v35 = vld [vmem:[%s12956_s10 + $0x490] sm:$0xff] }
0x18b5   :  { %v8731_v55 = vcombine.low %v8600_v50, %v8608_v5  ;;  %v8732_v30 = vcombine.high %v8600_v50, %v8608_v5  ;;  %v8810_v31 = vcombine.high %v8679_v18, %v8687_v28  ;;  %v8695_v50 = vld [vmem:[%s12956_s10 + $0x700] sm:$0xff] }
0x18b6   :  { %5314 = vadd.xlane.f32.xlu0 %v5308_v48  ;;  %v5309_v3 = vadd.f32 %v5305_v47, %v11880_v41  ;;  %v8615_v41 = vld [vmem:[%s12956_s10 + $0x480] sm:$0xff]  ;;  %v8680_v47 = vld [vmem:[%s12956_s10 + $0x688] sm:$0xff]  ;;  %v8826_v5 = vcombine.high %v8695_v50, %v8703_v51 }
0x18b7   :  { %v8746_v56 = vcombine.high %v8615_v41, %v8623_v54  ;;  %6250 = vmatprep.subr.bf16.mxu0 %v8732_v30  ;;  %v8745_v60 = vcombine.low %v8615_v41, %v8623_v54  ;;  %v8704_v41 = vld [vmem:[%s12956_s10 + $0x748] sm:$0xff]  ;;  %v8825_v54 = vcombine.low %v8695_v50, %v8703_v51  ;;  %v8598_v33 = vld [vmem:[%s12959_s9 + $0x1] ss:$0 sm:$0xff]  ;;  %v8649_v51 = vld [vmem:[%s12956_s10 + $0x590] sm:$0xff] }
0x18b8   :  { %5316 = vadd.xlane.f32.xlu1 %v5309_v3  ;;  %6251 = vmatpush1.bf16.msra.mxu0 %v8731_v55  ;;  %v8827_v55 = vcombine.low %v8696_v53, %v8704_v41  ;;  %v8828_v30 = vcombine.high %v8696_v53, %v8704_v41  ;;  %v8657_v53 = vld [vmem:[%s12956_s10 + $0x5d0] sm:$0xff]  ;;  %v8658_v41 = vld [vmem:[%s12956_s10 + $0x5d8] sm:$0xff] }
0x18b9   :  { %6209 = vmatprep.subr.bf16.mxu1 %v8746_v56  ;;  %6252 = vmatprep.subr.bf16.mxu0 %v8748_v59  ;;  %v8711_v56 = vld [vmem:[%s12956_s10 + $0x780] sm:$0xff] }
0x18ba   :  { %6210 = vmatpush1.bf16.msra.mxu1 %v8745_v60  ;;  %v8842_v59 = vcombine.high %v8711_v56, %v8719_v32  ;;  %v8720_v60 = vld [vmem:[%s12956_s10 + $0x7c8] sm:$0xff] }
0x18bb   :  { %6211 = vmatprep.subr.bf16.mxu1 %v8762_v2 }
0x18bc   :  { %6253 = vmatpush1.bf16.msra.mxu0 %v8747_v61  ;;  %v8841_v61 = vcombine.low %v8711_v56, %v8719_v32  ;;  %v8665_v32 = vld [vmem:[%s12956_s10 + $0x610] sm:$0xff] }
0x18bd   :  { %6254 = vmatprep.subr.bf16.mxu0 %v8764_v15 }
0x18be   :  { %6212 = vmatpush1.bf16.msra.mxu1 %v8761_v12 }
0x18bf   :  { %6213 = vmatprep.subr.bf16.mxu1 %v8778_v39 }
0x18c0   :  { %6255 = vmatpush1.bf16.msra.mxu0 %v8763_v37 }
0x18c1   :  { %6256 = vmatprep.subr.bf16.mxu0 %v8780_v27 }
0x18c2   :  { %6214 = vmatpush1.bf16.msra.mxu1 %v8777_v24 }
0x18c3   :  { %6215 = vmatprep.subr.bf16.mxu1 %v8794_v36  ;;  %v8618_v36 = vld [vmem:[%s12956_s10 + $0x498] sm:$0xff] }
0x18c4   :  { %6257 = vmatpush1.bf16.msra.mxu0 %v8779_v25 }
0x18c5   :  { %6258 = vmatprep.subr.bf16.mxu0 %v8796_v44 }
0x18c6   :  { %6216 = vmatpush1.bf16.msra.mxu1 %v8793_v21 }
0x18c7   :  { %6217 = vmatprep.subr.bf16.mxu1 %v8810_v31  ;;  %v8634_v31 = vld [vmem:[%s12956_s10 + $0x518] sm:$0xff] }
0x18c8   :  { %6259 = vmatpush1.bf16.msra.mxu0 %v8795_v40 }
0x1943   :  { %v5315_v26 = vpop.xlane.xlu0 %5314 }
0x1944   :  { %v5318_v62 = vmul.f32 0.0078125, %v5315_v26  ;;  %v8843_v26 = vcombine.low %v8712_v57, %v8720_v60 }
0x1945   :  { %v5317_v63 = vpop.xlane.xlu1 %5316 }
0x1946   :  { %v12067_v1 = vsub.f32 %v5308_v48, %v5318_v62  ;;  %v5319_v6 = vmul.f32 0.0078125, %v5317_v63  ;;  %v8688_v48 = vld [vmem:[%s12956_s10 + $0x6c8] sm:$0xff]  ;;  %v8844_v62 = vcombine.high %v8712_v57, %v8720_v60  ;;  %v8601_v63 = vld [vmem:[%s12956_s10 + $0x410] sm:$0xff]  ;;  %v8674_v60 = vld [vmem:[%s12956_s10 + $0x658] sm:$0xff] }
0x1947   :  { %v8811_v49 = vcombine.low %v8680_v47, %v8688_v48  ;;  %v8812_v11 = vcombine.high %v8680_v47, %v8688_v48  ;;  %v8641_v47 = vld [vmem:[%s12956_s10 + $0x550] sm:$0xff]  ;;  %v8642_v48 = vld [vmem:[%s12956_s10 + $0x558] sm:$0xff] }
0x1948   :  { %v12069_v4 = vsub.f32 %v5309_v3, %v5319_v6  ;;  %v5322_v7 = vmul.f32 %v12067_v1, %v12067_v1  ;;  %v8809_v3 = vcombine.low %v8679_v18, %v8687_v28  ;;  %v8609_v6 = vld [vmem:[%s12956_s10 + $0x450] sm:$0xff]  ;;  %v8768_v50 = vcombine.high %v8634_v31, %v8642_v48 }
0x1949   :  { %6260 = vmatprep.subr.bf16.mxu0 %v8812_v11  ;;  %v8734_v58 = vcombine.high %v8601_v63, %v8609_v6  ;;  %v8633_v28 = vld [vmem:[%s12956_s10 + $0x510] sm:$0xff] }
0x194a   :  { %5324 = vadd.xlane.f32.xlu0 %v5322_v7  ;;  %v5323_v8 = vmul.f32 %v12069_v4, %v12069_v4  ;;  %6218 = vmatpush1.bf16.msra.mxu1 %v8809_v3  ;;  %v8602_v7 = vld [vmem:[%s12956_s10 + $0x418] sm:$0xff]  ;;  %v8766_v11 = vcombine.high %v8633_v28, %v8641_v47  ;;  %v8673_v57 = vld [vmem:[%s12956_s10 + $0x650] sm:$0xff] }
0x194b   :  { %6261 = vmatpush1.bf16.msra.mxu0 %v8811_v49  ;;  %6219 = vmatprep.subr.bf16.mxu1 %v8826_v5  ;;  %v8735_v52 = vcombine.low %v8602_v7, %v8610_v9  ;;  %v8736_v2 = vcombine.high %v8602_v7, %v8610_v9  ;;  %v8650_v5 = vld [vmem:[%s12956_s10 + $0x598] sm:$0xff]  ;;  %v8689_v7 = vld [vmem:[%s12956_s10 + $0x6d0] sm:$0xff]  ;;  %v8797_v9 = vcombine.low %v8665_v32, %v8673_v57 }
0x194c   :  { %6262 = vmatprep.subr.bf16.mxu0 %v8828_v30  ;;  %v8782_v30 = vcombine.high %v8649_v51, %v8657_v53  ;;  %v8784_v56 = vcombine.high %v8650_v5, %v8658_v41 }
0x194e   :  { %5326 = vadd.xlane.f32.xlu0 %v5323_v8  ;;  %6220 = vmatpush1.bf16.msra.mxu1 %v8825_v54  ;;  %v8733_v8 = vcombine.low %v8601_v63, %v8609_v6  ;;  %v8765_v54 = vcombine.low %v8633_v28, %v8641_v47  ;;  %v8681_v6 = vld [vmem:[%s12956_s10 + $0x690] sm:$0xff]  ;;  %v8612_v28 = vld [vmem:[%s12956_s10 + $0x468] sm:$0xff] }
0x194f   :  { %6263 = vmatpush1.bf16.msra.mxu0 %v8827_v55  ;;  %6221 = vmatprep.subr.bf16.mxu1 %v8842_v59  ;;  %v8767_v55 = vcombine.low %v8634_v31, %v8642_v48  ;;  %v8666_v59 = vld [vmem:[%s12956_s10 + $0x618] sm:$0xff] }
0x1950   :  { %6264 = vmatprep.subr.bf16.mxu0 %v8844_v62  ;;  %v8798_v62 = vcombine.high %v8665_v32, %v8673_v57  ;;  %v8800_v63 = vcombine.high %v8666_v59, %v8674_v60  ;;  %v8644_v32 = vld [vmem:[%s12956_s10 + $0x568] sm:$0xff] }
0x1952   :  { %6222 = vmatpush1.bf16.msra.mxu1 %v8841_v61  ;;  %v8781_v61 = vcombine.low %v8649_v51, %v8657_v53  ;;  %v8628_v51 = vld [vmem:[%s12956_s10 + $0x4e8] sm:$0xff] }
0x1953   :  { %6265 = vmatpush1.bf16.msra.mxu0 %v8843_v26  ;;  %6293 = vmatprep.subr.bf16.mxu1 %v8734_v58  ;;  %v8783_v26 = vcombine.low %v8650_v5, %v8658_v41  ;;  %v8690_v58 = vld [vmem:[%s12956_s10 + $0x6d8] sm:$0xff] }
0x1954   :  { %6336 = vmatprep.subr.bf16.mxu0 %v8736_v2  ;;  %v8814_v2 = vcombine.high %v8681_v6, %v8689_v7 }
0x19d7   :  { %v5325_v10 = vpop.xlane.xlu0 %5324 }
0x19d8   :  { %v5328_v12 = vmul.f32 0.0078125, %v5325_v10 }
0x19da   :  { %v5330_v37 = vadd.f32 1e-05, %v5328_v12  ;;  %v8697_v12 = vld [vmem:[%s12956_s10 + $0x710] sm:$0xff] }
0x19db   :  { %v5327_v15 = vpop.xlane.xlu0 %5326 }
0x19dc   :  { %10502 = vrsqrt.f32 %v5330_v37  ;;  %v5329_v22 = vmul.f32 0.0078125, %v5327_v15  ;;  %v8705_v37 = vld [vmem:[%s12956_s10 + $0x750] sm:$0xff]  ;;  %v8698_v15 = vld [vmem:[%s12956_s10 + $0x718] sm:$0xff] }
0x19de   :  { %v5331_v23 = vadd.f32 1e-05, %v5329_v22  ;;  %v8706_v22 = vld [vmem:[%s12956_s10 + $0x758] sm:$0xff] }
0x19e0   :  { %10504 = vrsqrt.f32 %v5331_v23  ;;  %v8813_v23 = vcombine.low %v8681_v6, %v8689_v7  ;;  %v8660_v6 = vld [vmem:[%s12956_s10 + $0x5e8] sm:$0xff] }
0x19e6   :  { %v10503_v38 = vpop.eup %10502 }
0x19e7   :  { %v5334_v39 = vmul.f32 %v10503_v38, %v12067_v1  ;;  %v8625_v1 = vld [vmem:[%s12956_s10 + $0x4d0] sm:$0xff] }
0x19e8   :  { %v8750_v44 = vcombine.high %v8617_v35, %v8625_v1  ;;  %v8749_v3 = vcombine.low %v8617_v35, %v8625_v1  ;;  %v8831_v35 = vcombine.low %v8698_v15, %v8706_v22 }
0x19e9   :  { %v5342_v25 = vmul.f32 %v8597_v42, %v5334_v39  ;;  %v8830_v39 = vcombine.high %v8697_v12, %v8705_v37 }
0x19ea   :  { %v10505_v24 = vpop.eup %10504 }
0x19eb   :  { %v5335_v27 = vmul.f32 %v10505_v24, %v12069_v4  ;;  %v8626_v4 = vld [vmem:[%s12956_s10 + $0x4d8] sm:$0xff]  ;;  %v12179_v13 = vadd.f32 %v8598_v33, %v5342_v25  ;;  %v8713_v24 = vld [vmem:[%s12956_s10 + $0x790] sm:$0xff] }
0x19ec   :  { %v8752_v18 = vcombine.high %v8618_v36, %v8626_v4  ;;  %v8751_v49 = vcombine.low %v8618_v36, %v8626_v4  ;;  %v8721_v25 = vld [vmem:[%s12956_s10 + $0x7d0] sm:$0xff]  ;;  %v8603_v4 = vld [vmem:[%s12956_s10 + $0x420] sm:$0xff] }
0x19ed   :  { %v5343_v34 = vmul.f32 %v8597_v42, %v5335_v27  ;;  %v8832_v42 = vcombine.high %v8698_v15, %v8706_v22  ;;  %v8714_v27 = vld [vmem:[%s12956_s10 + $0x798] sm:$0xff]  ;;  %v8846_v1 = vcombine.high %v8713_v24, %v8721_v25  ;;  %v8845_v47 = vcombine.low %v8713_v24, %v8721_v25  ;;  %v8692_v24 = vld [vmem:[%s12956_s10 + $0x6e8] sm:$0xff] }
0x19ef   :  { %v12181_v21 = vadd.f32 %v8598_v33, %v5343_v34  ;;  %v8722_v33 = vld [vmem:[%s12956_s10 + $0x7d8] sm:$0xff]  ;;  %v8829_v34 = vcombine.low %v8697_v12, %v8705_v37  ;;  %v8676_v12 = vld [vmem:[%s12956_s10 + $0x668] sm:$0xff] }
0x19f0   :  { %v8848_v36 = vcombine.high %v8714_v27, %v8722_v33  ;;  %v8847_v31 = vcombine.low %v8714_v27, %v8722_v33 }
0x19f1   :  { %v12185_v40 = vpack.c.bf16 %v12181_v21, %v12179_v13 }
0x19f3   :  { %6240 = vmatmul.mubr.bf16.vlgmr.msra.gmra.mrb[64].mxu1 %v12185_v40  ;;  %6283 = vmatmul.mubr.bf16.vlgmr.msra.gmra.mrb[64].mxu0 %v12185_v40 }
0x19f4   :  { %6294 = vmatpush1.bf16.msra.mxu1 %v8733_v8  ;;  %6337 = vmatpush1.bf16.msra.mxu0 %v8735_v52  ;;  %v8682_v8 = vld [vmem:[%s12956_s10 + $0x698] sm:$0xff]  ;;  %v8799_v52 = vcombine.low %v8666_v59, %v8674_v60 }
0x19f5   :  { %6295 = vmatprep.subr.bf16.mxu1 %v8750_v44  ;;  %6338 = vmatprep.subr.bf16.mxu0 %v8752_v18  ;;  %v8816_v10 = vcombine.high %v8682_v8, %v8690_v58  ;;  %v8815_v38 = vcombine.low %v8682_v8, %v8690_v58  ;;  %v8611_v44 = vld [vmem:[%s12956_s10 + $0x460] sm:$0xff]  ;;  %v8604_v18 = vld [vmem:[%s12956_s10 + $0x428] sm:$0xff] }
0x19f6   :  { %6325 = vmatprep.mubr.bf16.mxu1 %v10512_v29  ;;  %6368 = vmatprep.mubr.bf16.mxu0 %v10512_v29  ;;  %v8738_v48 = vcombine.high %v8603_v4, %v8611_v44  ;;  %v8737_v53 = vcombine.low %v8603_v4, %v8611_v44  ;;  %v8739_v5 = vcombine.low %v8604_v18, %v8612_v28  ;;  %v8708_v4 = vld [vmem:[%s12956_s10 + $0x768] sm:$0xff] }
0x19f8   :  { %6296 = vmatpush1.bf16.msra.mxu1 %v8749_v3  ;;  %6339 = vmatpush1.bf16.msra.mxu0 %v8751_v49  ;;  %v8740_v3 = vcombine.high %v8604_v18, %v8612_v28  ;;  %v8619_v49 = vld [vmem:[%s12956_s10 + $0x4a0] sm:$0xff] }
0x19f9   :  { %6297 = vmatprep.subr.bf16.mxu1 %v8766_v11  ;;  %6340 = vmatprep.subr.bf16.mxu0 %v8768_v50  ;;  %v8627_v11 = vld [vmem:[%s12956_s10 + $0x4e0] sm:$0xff]  ;;  %v8620_v50 = vld [vmem:[%s12956_s10 + $0x4a8] sm:$0xff] }
0x19fa   :  { %v8754_v41 = vcombine.high %v8619_v49, %v8627_v11  ;;  %v8753_v57 = vcombine.low %v8619_v49, %v8627_v11  ;;  %v8755_v59 = vcombine.low %v8620_v50, %v8628_v51  ;;  %v8724_v49 = vld [vmem:[%s12956_s10 + $0x7e8] sm:$0xff] }
0x19fc   :  { %6298 = vmatpush1.bf16.msra.mxu1 %v8765_v54  ;;  %6341 = vmatpush1.bf16.msra.mxu0 %v8767_v55  ;;  %v8756_v54 = vcombine.high %v8620_v50, %v8628_v51  ;;  %v8635_v55 = vld [vmem:[%s12956_s10 + $0x520] sm:$0xff] }
0x19fd   :  { %6299 = vmatprep.subr.bf16.mxu1 %v8782_v30  ;;  %6342 = vmatprep.subr.bf16.mxu0 %v8784_v56  ;;  %v8643_v30 = vld [vmem:[%s12956_s10 + $0x560] sm:$0xff]  ;;  %v8636_v56 = vld [vmem:[%s12956_s10 + $0x528] sm:$0xff] }
0x19fe   :  { %v8770_v60 = vcombine.high %v8635_v55, %v8643_v30  ;;  %v8769_v7 = vcombine.low %v8635_v55, %v8643_v30  ;;  %v8771_v8 = vcombine.low %v8636_v56, %v8644_v32  ;;  %v8614_v55 = vld [vmem:[%s12956_s10 + $0x478] sm:$0xff] }
0x1a00   :  { %6300 = vmatpush1.bf16.msra.mxu1 %v8781_v61  ;;  %6343 = vmatpush1.bf16.msra.mxu0 %v8783_v26  ;;  %v8772_v61 = vcombine.high %v8636_v56, %v8644_v32  ;;  %v8651_v26 = vld [vmem:[%s12956_s10 + $0x5a0] sm:$0xff] }
0x1a01   :  { %6301 = vmatprep.subr.bf16.mxu1 %v8798_v62  ;;  %6344 = vmatprep.subr.bf16.mxu0 %v8800_v63  ;;  %v8659_v62 = vld [vmem:[%s12956_s10 + $0x5e0] sm:$0xff]  ;;  %v8652_v63 = vld [vmem:[%s12956_s10 + $0x5a8] sm:$0xff] }
0x1a02   :  { %v8786_v58 = vcombine.high %v8651_v26, %v8659_v62  ;;  %v8785_v37 = vcombine.low %v8651_v26, %v8659_v62  ;;  %v8787_v15 = vcombine.low %v8652_v63, %v8660_v6  ;;  %v8630_v26 = vld [vmem:[%s12956_s10 + $0x4f8] sm:$0xff] }
0x1a04   :  { %6302 = vmatpush1.bf16.msra.mxu1 %v8797_v9  ;;  %6345 = vmatpush1.bf16.msra.mxu0 %v8799_v52  ;;  %v8788_v9 = vcombine.high %v8652_v63, %v8660_v6  ;;  %v8667_v52 = vld [vmem:[%s12956_s10 + $0x620] sm:$0xff] }
0x1a05   :  { %6303 = vmatprep.subr.bf16.mxu1 %v8814_v2  ;;  %6346 = vmatprep.subr.bf16.mxu0 %v8816_v10  ;;  %v8675_v2 = vld [vmem:[%s12956_s10 + $0x660] sm:$0xff]  ;;  %v8668_v10 = vld [vmem:[%s12956_s10 + $0x628] sm:$0xff] }
0x1a06   :  { %v8802_v22 = vcombine.high %v8667_v52, %v8675_v2  ;;  %v8801_v25 = vcombine.low %v8667_v52, %v8675_v2  ;;  %v8803_v27 = vcombine.low %v8668_v10, %v8676_v12  ;;  %v8646_v52 = vld [vmem:[%s12956_s10 + $0x578] sm:$0xff] }
0x1a08   :  { %6304 = vmatpush1.bf16.msra.mxu1 %v8813_v23  ;;  %6347 = vmatpush1.bf16.msra.mxu0 %v8815_v38  ;;  %v8804_v23 = vcombine.high %v8668_v10, %v8676_v12  ;;  %v8683_v38 = vld [vmem:[%s12956_s10 + $0x6a0] sm:$0xff] }
0x1a09   :  { %6305 = vmatprep.subr.bf16.mxu1 %v8830_v39  ;;  %6348 = vmatprep.subr.bf16.mxu0 %v8832_v42  ;;  %v8691_v39 = vld [vmem:[%s12956_s10 + $0x6e0] sm:$0xff]  ;;  %v8684_v42 = vld [vmem:[%s12956_s10 + $0x6a8] sm:$0xff] }
0x1a0a   :  { %v8818_v33 = vcombine.high %v8683_v38, %v8691_v39  ;;  %v8817_v44 = vcombine.low %v8683_v38, %v8691_v39  ;;  %v8819_v18 = vcombine.low %v8684_v42, %v8692_v24  ;;  %v8662_v38 = vld [vmem:[%s12956_s10 + $0x5f8] sm:$0xff] }
0x1a0c   :  { %6306 = vmatpush1.bf16.msra.mxu1 %v8829_v34  ;;  %6349 = vmatpush1.bf16.msra.mxu0 %v8831_v35  ;;  %v8820_v34 = vcombine.high %v8684_v42, %v8692_v24  ;;  %v8699_v35 = vld [vmem:[%s12956_s10 + $0x720] sm:$0xff] }
0x1a0d   :  { %6307 = vmatprep.subr.bf16.mxu1 %v8846_v1  ;;  %6350 = vmatprep.subr.bf16.mxu0 %v8848_v36  ;;  %v8707_v1 = vld [vmem:[%s12956_s10 + $0x760] sm:$0xff]  ;;  %v8700_v36 = vld [vmem:[%s12956_s10 + $0x728] sm:$0xff] }
0x1a0e   :  { %v8834_v28 = vcombine.high %v8699_v35, %v8707_v1  ;;  %v8833_v11 = vcombine.low %v8699_v35, %v8707_v1  ;;  %v8835_v50 = vcombine.low %v8700_v36, %v8708_v4 }
0x1a10   :  { %6308 = vmatpush1.bf16.msra.mxu1 %v8845_v47  ;;  %6351 = vmatpush1.bf16.msra.mxu0 %v8847_v31  ;;  %v8836_v47 = vcombine.high %v8700_v36, %v8708_v4  ;;  %v8715_v31 = vld [vmem:[%s12956_s10 + $0x7a0] sm:$0xff] }
0x1a11   :  { %6379 = vmatprep.subr.bf16.mxu1 %v8738_v48  ;;  %6422 = vmatprep.subr.bf16.mxu0 %v8740_v3  ;;  %v8723_v48 = vld [vmem:[%s12956_s10 + $0x7e0] sm:$0xff]  ;;  %v8716_v3 = vld [vmem:[%s12956_s10 + $0x7a8] sm:$0xff] }
0x1a12   :  { %v8850_v51 = vcombine.high %v8715_v31, %v8723_v48  ;;  %v8849_v30 = vcombine.low %v8715_v31, %v8723_v48  ;;  %v8851_v56 = vcombine.low %v8716_v3, %v8724_v49 }
0x1a13   :  { %6326 = vmatmul.mubr.bf16.vlgmr.msra.gmra.mrb[68].mxu1 %v12185_v40  ;;  %6369 = vmatmul.mubr.bf16.vlgmr.msra.gmra.mrb[68].mxu0 %v12185_v40 }
0x1a14   :  { %6380 = vmatpush1.bf16.msra.mxu1 %v8737_v53  ;;  %6423 = vmatpush1.bf16.msra.mxu0 %v8739_v5  ;;  %v8852_v53 = vcombine.high %v8716_v3, %v8724_v49  ;;  %v8605_v5 = vld [vmem:[%s12956_s10 + $0x430] sm:$0xff] }
0x1a15   :  { %6381 = vmatprep.subr.bf16.mxu1 %v8754_v41  ;;  %6424 = vmatprep.subr.bf16.mxu0 %v8756_v54  ;;  %v8613_v41 = vld [vmem:[%s12956_s10 + $0x470] sm:$0xff]  ;;  %v8606_v54 = vld [vmem:[%s12956_s10 + $0x438] sm:$0xff] }
0x1a16   :  { %6411 = vmatprep.mubr.bf16.mxu1 %v10512_v29  ;;  %6454 = vmatprep.mubr.bf16.mxu0 %v10512_v29  ;;  %v8742_v32 = vcombine.high %v8605_v5, %v8613_v41  ;;  %v8741_v62 = vcombine.low %v8605_v5, %v8613_v41  ;;  %v8743_v63 = vcombine.low %v8606_v54, %v8614_v55 }
0x1a18   :  { %6382 = vmatpush1.bf16.msra.mxu1 %v8753_v57  ;;  %6425 = vmatpush1.bf16.msra.mxu0 %v8755_v59  ;;  %v8744_v57 = vcombine.high %v8606_v54, %v8614_v55  ;;  %v8621_v59 = vld [vmem:[%s12956_s10 + $0x4b0] sm:$0xff] }
0x1a19   :  { %6383 = vmatprep.subr.bf16.mxu1 %v8770_v60  ;;  %6426 = vmatprep.subr.bf16.mxu0 %v8772_v61  ;;  %v8629_v60 = vld [vmem:[%s12956_s10 + $0x4f0] sm:$0xff]  ;;  %v8622_v61 = vld [vmem:[%s12956_s10 + $0x4b8] sm:$0xff] }
0x1a1a   :  { %v8758_v6 = vcombine.high %v8621_v59, %v8629_v60  ;;  %v8757_v2 = vcombine.low %v8621_v59, %v8629_v60  ;;  %v8759_v10 = vcombine.low %v8622_v61, %v8630_v26 }
0x1a1c   :  { %6384 = vmatpush1.bf16.msra.mxu1 %v8769_v7  ;;  %6427 = vmatpush1.bf16.msra.mxu0 %v8771_v8  ;;  %v8760_v7 = vcombine.high %v8622_v61, %v8630_v26  ;;  %v8637_v8 = vld [vmem:[%s12956_s10 + $0x530] sm:$0xff] }
0x1a1d   :  { %6385 = vmatprep.subr.bf16.mxu1 %v8786_v58  ;;  %6428 = vmatprep.subr.bf16.mxu0 %v8788_v9  ;;  %v8645_v58 = vld [vmem:[%s12956_s10 + $0x570] sm:$0xff]  ;;  %v8638_v9 = vld [vmem:[%s12956_s10 + $0x538] sm:$0xff] }
0x1a1e   :  { %v8774_v12 = vcombine.high %v8637_v8, %v8645_v58  ;;  %v8773_v39 = vcombine.low %v8637_v8, %v8645_v58  ;;  %v8775_v42 = vcombine.low %v8638_v9, %v8646_v52  ;;  %v10296_v8 = vld [vmem:[%s12957_s12 + $0x400] sm:$0xff]  }
0x1a1f   :  { %v10297_v58 = vld [vmem:[%s12957_s12 + $0x480] sm:$0xff]  }
0x1a20   :  { %6386 = vmatpush1.bf16.msra.mxu1 %v8785_v37  ;;  %6429 = vmatpush1.bf16.msra.mxu0 %v8787_v15  ;;  %v8776_v37 = vcombine.high %v8638_v9, %v8646_v52  ;;  %v8653_v15 = vld [vmem:[%s12956_s10 + $0x5b0] sm:$0xff]  ;;  %v10298_v9 = vld [vmem:[%s12957_s12 + $0x448] sm:$0xff]  }
0x1a21   :  { %6387 = vmatprep.subr.bf16.mxu1 %v8802_v22  ;;  %6430 = vmatprep.subr.bf16.mxu0 %v8804_v23  ;;  %v8661_v22 = vld [vmem:[%s12956_s10 + $0x5f0] sm:$0xff]  ;;  %v8654_v23 = vld [vmem:[%s12956_s10 + $0x5b8] sm:$0xff]  ;;  %v10299_v52 = vld [vmem:[%s12957_s12 + $0x4c8] sm:$0xff]  }
0x1a22   :  { %v8790_v24 = vcombine.high %v8653_v15, %v8661_v22  ;;  %v8789_v35 = vcombine.low %v8653_v15, %v8661_v22  ;;  %v8791_v1 = vcombine.low %v8654_v23, %v8662_v38  ;;  %v10305_v15 = vld [vmem:[%s12957_s12 + $0x490] sm:$0xff]   ;;  %v10306_v22 = vld [vmem:[%s12957_s12 + $0x458] sm:$0xff]  }
0x1a24   :  { %6388 = vmatpush1.bf16.msra.mxu1 %v8801_v25  ;;  %6431 = vmatpush1.bf16.msra.mxu0 %v8803_v27  ;;  %v8792_v25 = vcombine.high %v8654_v23, %v8662_v38  ;;  %v8669_v27 = vld [vmem:[%s12956_s10 + $0x630] sm:$0xff]  ;;  %v10307_v23 = vld [vmem:[%s12957_s12 + $0x4d8] sm:$0xff]  }
0x1a25   :  { %6389 = vmatprep.subr.bf16.mxu1 %v8818_v33  ;;  %6432 = vmatprep.subr.bf16.mxu0 %v8820_v34  ;;  %v8677_v33 = vld [vmem:[%s12956_s10 + $0x670] sm:$0xff]  ;;  %v8678_v34 = vld [vmem:[%s12956_s10 + $0x678] sm:$0xff] }
0x1a26   :  { %v8806_v36 = vcombine.high %v8669_v27, %v8677_v33  ;;  %v8805_v31 = vcombine.low %v8669_v27, %v8677_v33  ;;  %v10308_v38 = vld [vmem:[%s12957_s12 + $0x418] sm:$0xff]   ;;  %v10313_v27 = vld [vmem:[%s12957_s12 + $0x4a0] sm:$0xff]   ;;  %v10314_v33 = vld [vmem:[%s12957_s12 + $0x468] sm:$0xff]  }
0x1a28   :  { %6390 = vmatpush1.bf16.msra.mxu1 %v8817_v44  ;;  %6433 = vmatpush1.bf16.msra.mxu0 %v8819_v18  ;;  %v8685_v44 = vld [vmem:[%s12956_s10 + $0x6b0] sm:$0xff] }
0x1a29   :  { %6391 = vmatprep.subr.bf16.mxu1 %v8834_v28  ;;  %6434 = vmatprep.subr.bf16.mxu0 %v8836_v47  ;;  %v8693_v18 = vld [vmem:[%s12956_s10 + $0x6f0] sm:$0xff]  ;;  %v8686_v28 = vld [vmem:[%s12956_s10 + $0x6b8] sm:$0xff] }
0x1a2a   :  { %v8694_v47 = vld [vmem:[%s12956_s10 + $0x6f8] sm:$0xff]  ;;  %v8822_v3 = vcombine.high %v8685_v44, %v8693_v18  ;;  %v8821_v5 = vcombine.low %v8685_v44, %v8693_v18  ;;  %v10321_v44 = vld [vmem:[%s12957_s12 + $0x4b0] sm:$0xff]  }
0x1a2b   :  { %v8824_v49 = vcombine.high %v8686_v28, %v8694_v47  ;;  %v8823_v41 = vcombine.low %v8686_v28, %v8694_v47  ;;  %v10322_v18 = vld [vmem:[%s12957_s12 + $0x478] sm:$0xff]  }
0x1a2c   :  { %6392 = vmatpush1.bf16.msra.mxu1 %v8833_v11  ;;  %6435 = vmatpush1.bf16.msra.mxu0 %v8835_v50  ;;  %v8701_v11 = vld [vmem:[%s12956_s10 + $0x730] sm:$0xff]  ;;  %v10323_v28 = vld [vmem:[%s12957_s12 + $0x4f8] sm:$0xff]  }
0x1a2d   :  { %6393 = vmatprep.subr.bf16.mxu1 %v8850_v51  ;;  %6436 = vmatprep.subr.bf16.mxu0 %v8852_v53  ;;  %v8709_v50 = vld [vmem:[%s12956_s10 + $0x770] sm:$0xff]  ;;  %v8702_v51 = vld [vmem:[%s12956_s10 + $0x738] sm:$0xff] }
0x1a2e   :  { %v8710_v53 = vld [vmem:[%s12956_s10 + $0x778] sm:$0xff]  ;;  %v8838_v54 = vcombine.high %v8701_v11, %v8709_v50  ;;  %v8837_v59 = vcombine.low %v8701_v11, %v8709_v50 }
0x1a2f   :  { %v8840_v55 = vcombine.high %v8702_v51, %v8710_v53  ;;  %v8839_v60 = vcombine.low %v8702_v51, %v8710_v53  ;;  %v10324_v47 = vld [vmem:[%s12957_s12 + $0x438] sm:$0xff]  }
0x1a30   :  { %6394 = vmatpush1.bf16.msra.mxu1 %v8849_v30  ;;  %6437 = vmatpush1.bf16.msra.mxu0 %v8851_v56  ;;  %v8717_v30 = vld [vmem:[%s12956_s10 + $0x7b0] sm:$0xff] }
0x1a31   :  { %6465 = vmatprep.subr.bf16.mxu1 %v8742_v32  ;;  %6508 = vmatprep.subr.bf16.mxu0 %v8744_v57  ;;  %v8725_v56 = vld [vmem:[%s12956_s10 + $0x7f0] sm:$0xff]  ;;  %v8718_v32 = vld [vmem:[%s12956_s10 + $0x7b8] sm:$0xff] }
0x1a32   :  { %v8726_v57 = vld [vmem:[%s12956_s10 + $0x7f8] sm:$0xff]  ;;  %v8854_v61 = vcombine.high %v8717_v30, %v8725_v56 }
0x1a33   :  { %6412 = vmatmul.mubr.bf16.vlgmr.msra.gmra.mrb[72].mxu1 %v12185_v40  ;;  %6455 = vmatmul.mubr.bf16.vlgmr.msra.gmra.mrb[72].mxu0 %v12185_v40  ;;  %v8856_v26 = vcombine.high %v8718_v32, %v8726_v57 }
0x1a34   :  { %6466 = vmatpush1.bf16.msra.mxu1 %v8741_v62  ;;  %6509 = vmatpush1.bf16.msra.mxu0 %v8743_v63  ;;  %v8853_v62 = vcombine.low %v8717_v30, %v8725_v56  ;;  %v8855_v63 = vcombine.low %v8718_v32, %v8726_v57 }
0x1a35   :  { %6467 = vmatprep.subr.bf16.mxu1 %v8758_v6  ;;  %6510 = vmatprep.subr.bf16.mxu0 %v8760_v7  ;;  %v10294_v6 = vld [vmem:[%s12957_s12 + $0x440] sm:$0xff]  }
0x1a36   :  { %6497 = vmatprep.mubr.bf16.mxu1 %v10512_v29  ;;  %6540 = vmatprep.mubr.bf16.mxu0 %v10512_v29  ;;  %v8670_v29 = vld [vmem:[%s12956_s10 + $0x638] sm:$0xff]  ;;  %v10295_v7 = vld [vmem:[%s12957_s12 + $0x4c0] sm:$0xff]  }
0x1a37   :  { %v8808_v4 = vcombine.high %v8670_v29, %v8678_v34  ;;  %v8807_v48 = vcombine.low %v8670_v29, %v8678_v34  ;;  %v10315_v29 = vld [vmem:[%s12957_s12 + $0x4e8] sm:$0xff]  }
0x1a38   :  { %6468 = vmatpush1.bf16.msra.mxu1 %v8757_v2  ;;  %6511 = vmatpush1.bf16.msra.mxu0 %v8759_v10  ;;  %v10300_v2 = vld [vmem:[%s12957_s12 + $0x408] sm:$0xff]  }
0x1a39   :  { %6469 = vmatprep.subr.bf16.mxu1 %v8774_v12  ;;  %6512 = vmatprep.subr.bf16.mxu0 %v8776_v37  ;;  %v10301_v10 = vld [vmem:[%s12957_s12 + $0x488] sm:$0xff]   ;;  %v10302_v12 = vld [vmem:[%s12957_s12 + $0x450] sm:$0xff]  }
0x1a3a   :  { %v10304_v37 = vld [vmem:[%s12957_s12 + $0x410] sm:$0xff]   ;;  %v10316_v34 = vld [vmem:[%s12957_s12 + $0x428] sm:$0xff]  }
0x1a3c   :  { %6470 = vmatpush1.bf16.msra.mxu1 %v8773_v39  ;;  %6513 = vmatpush1.bf16.msra.mxu0 %v8775_v42  ;;  %v10309_v39 = vld [vmem:[%s12957_s12 + $0x498] sm:$0xff]   ;;  %v10310_v42 = vld [vmem:[%s12957_s12 + $0x460] sm:$0xff]  }
0x1a3d   :  { %6471 = vmatprep.subr.bf16.mxu1 %v8790_v24  ;;  %6514 = vmatprep.subr.bf16.mxu0 %v8792_v25  ;;  %v10311_v24 = vld [vmem:[%s12957_s12 + $0x4e0] sm:$0xff]  }
0x1a3e   :  { %v10312_v25 = vld [vmem:[%s12957_s12 + $0x420] sm:$0xff]  }
0x1a40   :  { %6472 = vmatpush1.bf16.msra.mxu1 %v8789_v35  ;;  %6515 = vmatpush1.bf16.msra.mxu0 %v8791_v1  ;;  %v10317_v35 = vld [vmem:[%s12957_s12 + $0x4a8] sm:$0xff]   ;;  %v10318_v1 = vld [vmem:[%s12957_s12 + $0x470] sm:$0xff]  }
0x1a41   :  { %6473 = vmatprep.subr.bf16.mxu1 %v8806_v36  ;;  %6516 = vmatprep.subr.bf16.mxu0 %v8808_v4  ;;  %v10319_v36 = vld [vmem:[%s12957_s12 + $0x4f0] sm:$0xff]  }
0x1a42   :  { %v10320_v4 = vld [vmem:[%s12957_s12 + $0x430] sm:$0xff]  }
0x1a44   :  { %6474 = vmatpush1.bf16.msra.mxu1 %v8805_v31  ;;  %6517 = vmatpush1.bf16.msra.mxu0 %v8807_v48  ;;  %v10325_v31 = vld [vmem:[%s12957_s12 + $0x4b8] sm:$0xff]   ;;  %v10326_v48 = vld [vmem:[%s12957_s12 + $0x540] sm:$0xff]  }
0x1a45   :  { %6475 = vmatprep.subr.bf16.mxu1 %v8822_v3  ;;  %6518 = vmatprep.subr.bf16.mxu0 %v8824_v49  ;;  %v10327_v3 = vld [vmem:[%s12957_s12 + $0x5c0] sm:$0xff]   ;;  %v12570_v49 = vld [vmem:[%s12960_s11 + $0x10] sm:$0xff] }
0x1a46   :  { %v5490_v11 = vrot.slane %v12570_v49, %v10732_v43  ;;  %v5498_v50 = vrot.slane %v12570_v49, %v10738_v45  ;;  %v5494_v51 = vrot.slane %v12570_v49, %v10741_v46  ;;  %v5502_v53 = vrot.slane %v12570_v49, %v11451_v14 }
0x1a48   :  { %6476 = vmatpush1.bf16.msra.mxu1 %v8821_v5  ;;  %6519 = vmatpush1.bf16.msra.mxu0 %v8823_v41 }
0x1a49   :  { %6477 = vmatprep.subr.bf16.mxu1 %v8838_v54  ;;  %6520 = vmatprep.subr.bf16.mxu0 %v8840_v55 }
0x1a4c   :  { %6478 = vmatpush1.bf16.msra.mxu1 %v8837_v59  ;;  %6521 = vmatpush1.bf16.msra.mxu0 %v8839_v60 }
0x1a4d   :  { %6479 = vmatprep.subr.bf16.mxu1 %v8854_v61  ;;  %6522 = vmatprep.subr.bf16.mxu0 %v8856_v26 }
0x1a50   :  { %6480 = vmatpush1.bf16.msra.mxu1 %v8853_v62  ;;  %6523 = vmatpush1.bf16.msra.mxu0 %v8855_v63 }
0x1a51   :  { %9536 = vmatprep.subr.bf16.mxu1 %v10294_v6  ;;  %9558 = vmatprep.subr.bf16.mxu0 %v10295_v7 }
0x1a53   :  { %6498 = vmatmul.mubr.bf16.vlgmr.msra.gmra.mrb[76].mxu1 %v12185_v40  ;;  %6541 = vmatmul.mubr.bf16.vlgmr.msra.gmra.mrb[76].mxu0 %v12185_v40  ;;  %v10303_v40 = vld [vmem:[%s12957_s12 + $0x4d0] sm:$0xff]  }
0x1a54   :  { %9537 = vmatpush3.bf16.msra.mxu1 %v10296_v8  ;;  %9559 = vmatpush3.bf16.msra.mxu0 %v10297_v58 }
0x1a55   :  { %9538 = vmatprep.subr.bf16.mxu1 %v10298_v9  ;;  %9560 = vmatprep.subr.bf16.mxu0 %v10299_v52 }
0x1a58   :  { %9539 = vmatpush3.bf16.msra.mxu1 %v10300_v2  ;;  %9561 = vmatpush3.bf16.msra.mxu0 %v10301_v10 }
0x1a59   :  { %9540 = vmatprep.subr.bf16.mxu1 %v10302_v12  ;;  %9562 = vmatprep.subr.bf16.mxu0 %v10303_v40 }
0x1a5c   :  { %9541 = vmatpush3.bf16.msra.mxu1 %v10304_v37  ;;  %9563 = vmatpush3.bf16.msra.mxu0 %v10305_v15 }
0x1a5d   :  { %9542 = vmatprep.subr.bf16.mxu1 %v10306_v22  ;;  %9564 = vmatprep.subr.bf16.mxu0 %v10307_v23 }
0x1a60   :  { %9543 = vmatpush3.bf16.msra.mxu1 %v10308_v38  ;;  %9565 = vmatpush3.bf16.msra.mxu0 %v10309_v39  ;;  %v10328_v38 = vld [vmem:[%s12957_s12 + $0x500] sm:$0xff]  }
0x1a61   :  { %9544 = vmatprep.subr.bf16.mxu1 %v10310_v42  ;;  %9566 = vmatprep.subr.bf16.mxu0 %v10311_v24  ;;  %v10329_v39 = vld [vmem:[%s12957_s12 + $0x580] sm:$0xff]   ;;  %v10330_v42 = vld [vmem:[%s12957_s12 + $0x548] sm:$0xff]  }
0x1a62   :  { %v10331_v24 = vld [vmem:[%s12957_s12 + $0x5c8] sm:$0xff]  }
0x1a64   :  { %9545 = vmatpush3.bf16.msra.mxu1 %v10312_v25  ;;  %9567 = vmatpush3.bf16.msra.mxu0 %v10313_v27  ;;  %v10332_v25 = vld [vmem:[%s12957_s12 + $0x508] sm:$0xff]  }
0x1a65   :  { %9546 = vmatprep.subr.bf16.mxu1 %v10314_v33  ;;  %9568 = vmatprep.subr.bf16.mxu0 %v10315_v29  ;;  %v10333_v27 = vld [vmem:[%s12957_s12 + $0x588] sm:$0xff]   ;;  %v10334_v33 = vld [vmem:[%s12957_s12 + $0x550] sm:$0xff]  }
0x1a66   :  { %v10335_v29 = vld [vmem:[%s12957_s12 + $0x5d0] sm:$0xff]  }
0x1a68   :  { %9547 = vmatpush3.bf16.msra.mxu1 %v10316_v34  ;;  %9569 = vmatpush3.bf16.msra.mxu0 %v10317_v35  ;;  %v10336_v34 = vld [vmem:[%s12957_s12 + $0x510] sm:$0xff]  }
0x1a69   :  { %9548 = vmatprep.subr.bf16.mxu1 %v10318_v1  ;;  %9570 = vmatprep.subr.bf16.mxu0 %v10319_v36  ;;  %v10337_v35 = vld [vmem:[%s12957_s12 + $0x590] sm:$0xff]   ;;  %v10338_v1 = vld [vmem:[%s12957_s12 + $0x558] sm:$0xff]  }
0x1a6a   :  { %v10339_v36 = vld [vmem:[%s12957_s12 + $0x5d8] sm:$0xff]  }
0x1a6c   :  { %9549 = vmatpush3.bf16.msra.mxu1 %v10320_v4  ;;  %9571 = vmatpush3.bf16.msra.mxu0 %v10321_v44  ;;  %v10340_v4 = vld [vmem:[%s12957_s12 + $0x518] sm:$0xff]  }
0x1a6d   :  { %9550 = vmatprep.subr.bf16.mxu1 %v10322_v18  ;;  %9572 = vmatprep.subr.bf16.mxu0 %v10323_v28  ;;  %v10341_v44 = vld [vmem:[%s12957_s12 + $0x598] sm:$0xff]   ;;  %v10342_v18 = vld [vmem:[%s12957_s12 + $0x560] sm:$0xff]  }
0x1a6e   :  { %v10343_v28 = vld [vmem:[%s12957_s12 + $0x5e0] sm:$0xff]  }
0x1a70   :  { %9551 = vmatpush3.bf16.msra.mxu1 %v10324_v47  ;;  %9573 = vmatpush3.bf16.msra.mxu0 %v10325_v31  ;;  %v10344_v47 = vld [vmem:[%s12957_s12 + $0x520] sm:$0xff]  }
0x1a71   :  { %9580 = vmatprep.subr.bf16.mxu1 %v10326_v48  ;;  %9602 = vmatprep.subr.bf16.mxu0 %v10327_v3  ;;  %v10345_v31 = vld [vmem:[%s12957_s12 + $0x5a0] sm:$0xff]   ;;  %v10346_v48 = vld [vmem:[%s12957_s12 + $0x568] sm:$0xff]  }
0x1a72   :  { %v10347_v3 = vld [vmem:[%s12957_s12 + $0x5e8] sm:$0xff]  }
0x1ac6   :  { %v6241_v5 = vpop.f32.mrb[64].mxu1  ;;  %v6284_v41 = vpop.f32.mrb[64].mxu0 }
0x1ac7   :  { %v6242_v54 = vadd.f32 %v6241_v5, %v5490_v11  ;;  %v6285_v55 = vadd.f32 %v6284_v41, %v5498_v50  ;;  %v6243_v30 = vpop.f32.mrb[65].mxu1  ;;  %v6286_v56 = vpop.f32.mrb[65].mxu0  ;;  %v10350_v5 = vld [vmem:[%s12957_s12 + $0x570] sm:$0xff]  }
0x1ac8   :  { %v6244_v32 = vadd.f32 %v6243_v30, %v5494_v51  ;;  %v6287_v57 = vadd.f32 %v6286_v56, %v5502_v53  ;;  %v6245_v59 = vpop.f32.mrb[66].mxu1  ;;  %v6288_v60 = vpop.f32.mrb[66].mxu0  ;;  %v10351_v41 = vld [vmem:[%s12957_s12 + $0x5f0] sm:$0xff]  }
0x1ac9   :  { %v6246_v61 = vadd.f32 %v6245_v59, %v5490_v11  ;;  %v6289_v26 = vadd.f32 %v6288_v60, %v5498_v50  ;;  %v6247_v62 = vpop.f32.mrb[67].mxu1  ;;  %v6290_v63 = vpop.f32.mrb[67].mxu0  ;;  %v6551_v8 = vmax.f32 %v6242_v54, 0.0  ;;  %v6553_v58 = vmax.f32 %v6285_v55, 0.0  ;;  %v10348_v11 = vld [vmem:[%s12957_s12 + $0x528] sm:$0xff]  }
0x1aca   :  { %v6248_v6 = vadd.f32 %v6247_v62, %v5494_v51  ;;  %v6291_v7 = vadd.f32 %v6290_v63, %v5502_v53  ;;  %v6552_v2 = vmax.f32 %v6244_v32, 0.0  ;;  %v6554_v10 = vmax.f32 %v6287_v57, 0.0  ;;  %v10349_v50 = vld [vmem:[%s12957_s12 + $0x5a8] sm:$0xff]   ;;  %v10352_v32 = vld [vmem:[%s12957_s12 + $0x530] sm:$0xff]   ;;  %v10355_v62 = vld [vmem:[%s12957_s12 + $0x5f8] sm:$0xff]  }
0x1acb   :  { %v6567_v9 = vmax.f32 %v6246_v61, 0.0  ;;  %v6569_v52 = vmax.f32 %v6289_v26, 0.0  ;;  %v5506_v51 = vrot.slane %v12570_v49, %v11522_v16  ;;  %v5514_v53 = vrot.slane %v12570_v49, %v11525_v17  ;;  %v10353_v57 = vld [vmem:[%s12957_s12 + $0x5b0] sm:$0xff]  }
0x1acc   :  { %v6568_v12 = vmax.f32 %v6248_v6, 0.0  ;;  %v6570_v40 = vmax.f32 %v6291_v7, 0.0  ;;  %v5510_v54 = vrot.slane %v12570_v49, %v11528_v19  ;;  %v5518_v55 = vrot.slane %v12570_v49, %v11531_v20  ;;  %v10354_v49 = vld [vmem:[%s12957_s12 + $0x578] sm:$0xff]  }
0x1acd   :  { %v6583_v37 = vpack.c.bf16 %v6567_v9, %v6551_v8  ;;  %v6585_v15 = vpack.c.bf16 %v6569_v52, %v6553_v58 }
0x1ace   :  { %v6584_v22 = vpack.c.bf16 %v6568_v12, %v6552_v2  ;;  %v6586_v23 = vpack.c.bf16 %v6570_v40, %v6554_v10  ;;  %v10356_v40 = vld [vmem:[%s12957_s12 + $0x538] sm:$0xff]  }
0x1ad0   :  { %7664 = vmatprep.mubr.bf16.mxu1 %v6584_v22  ;;  %7705 = vmatprep.mubr.bf16.mxu0 %v6586_v23 }
0x1ad1   :  { %7665 = vmatmul.mubr.bf16.vlgmr.msra.gmra.mrb[80].mxu1 %v6583_v37  ;;  %7706 = vmatmul.mubr.bf16.vlgmr.msra.gmra.mrb[80].mxu0 %v6585_v15  ;;  %v10357_v37 = vld [vmem:[%s12957_s12 + $0x5b8] sm:$0xff]  }
0x1ad2   :  { %9581 = vmatpush3.bf16.msra.mxu1 %v10328_v38  ;;  %9603 = vmatpush3.bf16.msra.mxu0 %v10329_v39  ;;  %v10358_v39 = vld [vmem:[%s12957_s12 + $0x640] sm:$0xff]  }
0x1ad3   :  { %9582 = vmatprep.subr.bf16.mxu1 %v10330_v42  ;;  %9604 = vmatprep.subr.bf16.mxu0 %v10331_v24  ;;  %v10359_v42 = vld [vmem:[%s12957_s12 + $0x6c0] sm:$0xff]  }
0x1ad6   :  { %9583 = vmatpush3.bf16.msra.mxu1 %v10332_v25  ;;  %9605 = vmatpush3.bf16.msra.mxu0 %v10333_v27 }
0x1ad7   :  { %9584 = vmatprep.subr.bf16.mxu1 %v10334_v33  ;;  %9606 = vmatprep.subr.bf16.mxu0 %v10335_v29 }
0x1ada   :  { %9585 = vmatpush3.bf16.msra.mxu1 %v10336_v34  ;;  %9607 = vmatpush3.bf16.msra.mxu0 %v10337_v35 }
0x1adb   :  { %9586 = vmatprep.subr.bf16.mxu1 %v10338_v1  ;;  %9608 = vmatprep.subr.bf16.mxu0 %v10339_v36  ;;  %v10360_v36 = vld [vmem:[%s12957_s12 + $0x600] sm:$0xff]  }
0x1ade   :  { %9587 = vmatpush3.bf16.msra.mxu1 %v10340_v4  ;;  %9609 = vmatpush3.bf16.msra.mxu0 %v10341_v44  ;;  %v10361_v4 = vld [vmem:[%s12957_s12 + $0x680] sm:$0xff]   ;;  %v10362_v44 = vld [vmem:[%s12957_s12 + $0x648] sm:$0xff]  }
0x1adf   :  { %9588 = vmatprep.subr.bf16.mxu1 %v10342_v18  ;;  %9610 = vmatprep.subr.bf16.mxu0 %v10343_v28  ;;  %v10363_v18 = vld [vmem:[%s12957_s12 + $0x6c8] sm:$0xff]  }
0x1ae0   :  { %v10364_v28 = vld [vmem:[%s12957_s12 + $0x608] sm:$0xff]  }
0x1ae2   :  { %9589 = vmatpush3.bf16.msra.mxu1 %v10344_v47  ;;  %9611 = vmatpush3.bf16.msra.mxu0 %v10345_v31  ;;  %v10365_v47 = vld [vmem:[%s12957_s12 + $0x688] sm:$0xff]   ;;  %v10366_v31 = vld [vmem:[%s12957_s12 + $0x650] sm:$0xff]  }
0x1ae3   :  { %9590 = vmatprep.subr.bf16.mxu1 %v10346_v48  ;;  %9612 = vmatprep.subr.bf16.mxu0 %v10347_v3  ;;  %v10367_v48 = vld [vmem:[%s12957_s12 + $0x6d0] sm:$0xff]  }
0x1ae4   :  { %v10368_v3 = vld [vmem:[%s12957_s12 + $0x610] sm:$0xff]  }
0x1ae6   :  { %v6327_v30 = vpop.f32.mrb[68].mxu1  ;;  %v6370_v56 = vpop.f32.mrb[68].mxu0  ;;  %9591 = vmatpush3.bf16.msra.mxu1 %v10348_v11  ;;  %9613 = vmatpush3.bf16.msra.mxu0 %v10349_v50  ;;  %v10369_v11 = vld [vmem:[%s12957_s12 + $0x690] sm:$0xff]   ;;  %v10370_v50 = vld [vmem:[%s12957_s12 + $0x658] sm:$0xff]  }
0x1ae7   :  { %v6328_v59 = vadd.f32 %v6327_v30, %v5506_v51  ;;  %v6371_v60 = vadd.f32 %v6370_v56, %v5514_v53  ;;  %v6329_v61 = vpop.f32.mrb[69].mxu1  ;;  %v6372_v26 = vpop.f32.mrb[69].mxu0  ;;  %9592 = vmatprep.subr.bf16.mxu1 %v10350_v5  ;;  %9614 = vmatprep.subr.bf16.mxu0 %v10351_v41  ;;  %v10373_v5 = vld [vmem:[%s12957_s12 + $0x698] sm:$0xff]   ;;  %v10374_v41 = vld [vmem:[%s12957_s12 + $0x660] sm:$0xff]   ;;  %v10378_v56 = vld [vmem:[%s12957_s12 + $0x668] sm:$0xff]  }
0x1ae8   :  { %v6330_v63 = vadd.f32 %v6329_v61, %v5510_v54  ;;  %v6373_v6 = vadd.f32 %v6372_v26, %v5518_v55  ;;  %v6331_v7 = vpop.f32.mrb[70].mxu1  ;;  %v6374_v8 = vpop.f32.mrb[70].mxu0  ;;  %v10377_v30 = vld [vmem:[%s12957_s12 + $0x6a0] sm:$0xff]  }
0x1ae9   :  { %v6332_v58 = vadd.f32 %v6331_v7, %v5506_v51  ;;  %v6375_v9 = vadd.f32 %v6374_v8, %v5514_v53  ;;  %v6333_v52 = vpop.f32.mrb[71].mxu1  ;;  %v6376_v2 = vpop.f32.mrb[71].mxu0  ;;  %v6555_v15 = vmax.f32 %v6328_v59, 0.0  ;;  %v6557_v22 = vmax.f32 %v6371_v60, 0.0  ;;  %v10371_v51 = vld [vmem:[%s12957_s12 + $0x6d8] sm:$0xff]   ;;  %v10380_v59 = vld [vmem:[%s12957_s12 + $0x628] sm:$0xff]  }
0x1aea   :  { %v6334_v10 = vadd.f32 %v6333_v52, %v5510_v54  ;;  %v6377_v12 = vadd.f32 %v6376_v2, %v5518_v55  ;;  %9593 = vmatpush3.bf16.msra.mxu1 %v10352_v32  ;;  %9615 = vmatpush3.bf16.msra.mxu0 %v10353_v57  ;;  %v6556_v24 = vmax.f32 %v6330_v63, 0.0  ;;  %v6558_v25 = vmax.f32 %v6373_v6, 0.0  ;;  %v10372_v53 = vld [vmem:[%s12957_s12 + $0x618] sm:$0xff]   ;;  %v10375_v54 = vld [vmem:[%s12957_s12 + $0x6e0] sm:$0xff]   ;;  %v10379_v32 = vld [vmem:[%s12957_s12 + $0x6e8] sm:$0xff]  }
0x1aeb   :  { %v6571_v23 = vmax.f32 %v6332_v58, 0.0  ;;  %v6573_v38 = vmax.f32 %v6375_v9, 0.0  ;;  %9594 = vmatprep.subr.bf16.mxu1 %v10354_v49  ;;  %9616 = vmatprep.subr.bf16.mxu0 %v10355_v62  ;;  %v10376_v55 = vld [vmem:[%s12957_s12 + $0x620] sm:$0xff]   ;;  %v12747_v57 = vld [vmem:[%s12960_s11 + $0x18] sm:$0xff]  ;;  %v10381_v60 = vld [vmem:[%s12957_s12 + $0x6a8] sm:$0xff]  }
0x1aec   :  { %v6572_v27 = vmax.f32 %v6334_v10, 0.0  ;;  %v6574_v33 = vmax.f32 %v6377_v12, 0.0  ;;  %v5522_v61 = vrot.slane %v12747_v57, %v10732_v43  ;;  %v5530_v26 = vrot.slane %v12747_v57, %v10738_v45  ;;  %v10382_v49 = vld [vmem:[%s12957_s12 + $0x670] sm:$0xff]  }
0x1aed   :  { %v6587_v29 = vpack.c.bf16 %v6571_v23, %v6555_v15  ;;  %v6589_v34 = vpack.c.bf16 %v6573_v38, %v6557_v22  ;;  %v10383_v62 = vld [vmem:[%s12957_s12 + $0x6f0] sm:$0xff]   ;;  %v5526_v63 = vrot.slane %v12747_v57, %v10741_v46  ;;  %v5534_v6 = vrot.slane %v12747_v57, %v11451_v14  ;;  %v10386_v46 = vld [vmem:[%s12957_s12 + $0x678] sm:$0xff]  }
0x1aee   :  { %v6588_v35 = vpack.c.bf16 %v6572_v27, %v6556_v24  ;;  %v6590_v1 = vpack.c.bf16 %v6574_v33, %v6558_v25  ;;  %9595 = vmatpush3.bf16.msra.mxu1 %v10356_v40  ;;  %9617 = vmatpush3.bf16.msra.mxu0 %v10357_v37  ;;  %v10384_v43 = vld [vmem:[%s12957_s12 + $0x630] sm:$0xff]   ;;  %v10387_v14 = vld [vmem:[%s12957_s12 + $0x6f8] sm:$0xff]  }
0x1aef   :  { %9624 = vmatprep.subr.bf16.mxu1 %v10358_v39  ;;  %9646 = vmatprep.subr.bf16.mxu0 %v10359_v42  ;;  %v10385_v45 = vld [vmem:[%s12957_s12 + $0x6b0] sm:$0xff]   ;;  %v10388_v24 = vld [vmem:[%s12957_s12 + $0x638] sm:$0xff]  }
0x1af0   :  { %7746 = vmatprep.mubr.bf16.mxu1 %v6588_v35  ;;  %7787 = vmatprep.mubr.bf16.mxu0 %v6590_v1  ;;  %v10389_v25 = vld [vmem:[%s12957_s12 + $0x6b8] sm:$0xff]   ;;  %v10390_v35 = vld [vmem:[%s12957_s12 + $0x740] sm:$0xff]  }
0x1af1   :  { %7747 = vmatmul.mubr.bf16.vlgmr.msra.gmra.mrb[84].mxu1 %v6587_v29  ;;  %7788 = vmatmul.mubr.bf16.vlgmr.msra.gmra.mrb[84].mxu0 %v6589_v34  ;;  %v10391_v1 = vld [vmem:[%s12957_s12 + $0x7c0] sm:$0xff]  }
0x1af2   :  { %9625 = vmatpush3.bf16.msra.mxu1 %v10360_v36  ;;  %9647 = vmatpush3.bf16.msra.mxu0 %v10361_v4 }
0x1af3   :  { %9626 = vmatprep.subr.bf16.mxu1 %v10362_v44  ;;  %9648 = vmatprep.subr.bf16.mxu0 %v10363_v18 }
0x1af6   :  { %9627 = vmatpush3.bf16.msra.mxu1 %v10364_v28  ;;  %9649 = vmatpush3.bf16.msra.mxu0 %v10365_v47 }
0x1af7   :  { %9628 = vmatprep.subr.bf16.mxu1 %v10366_v31  ;;  %9650 = vmatprep.subr.bf16.mxu0 %v10367_v48 }
0x1afa   :  { %9629 = vmatpush3.bf16.msra.mxu1 %v10368_v3  ;;  %9651 = vmatpush3.bf16.msra.mxu0 %v10369_v11  ;;  %v10392_v3 = vld [vmem:[%s12957_s12 + $0x700] sm:$0xff]  }
0x1afb   :  { %9630 = vmatprep.subr.bf16.mxu1 %v10370_v50  ;;  %9652 = vmatprep.subr.bf16.mxu0 %v10371_v51  ;;  %v10393_v11 = vld [vmem:[%s12957_s12 + $0x780] sm:$0xff]   ;;  %v10394_v50 = vld [vmem:[%s12957_s12 + $0x748] sm:$0xff]  }
0x1afc   :  { %v10395_v51 = vld [vmem:[%s12957_s12 + $0x7c8] sm:$0xff]  }
0x1afe   :  { %9631 = vmatpush3.bf16.msra.mxu1 %v10372_v53  ;;  %9653 = vmatpush3.bf16.msra.mxu0 %v10373_v5  ;;  %v10396_v53 = vld [vmem:[%s12957_s12 + $0x708] sm:$0xff]  }
0x1aff   :  { %9632 = vmatprep.subr.bf16.mxu1 %v10374_v41  ;;  %9654 = vmatprep.subr.bf16.mxu0 %v10375_v54  ;;  %v10397_v5 = vld [vmem:[%s12957_s12 + $0x788] sm:$0xff]   ;;  %v10398_v41 = vld [vmem:[%s12957_s12 + $0x750] sm:$0xff]  }
0x1b00   :  { %v10399_v54 = vld [vmem:[%s12957_s12 + $0x7d0] sm:$0xff]  }
0x1b02   :  { %9633 = vmatpush3.bf16.msra.mxu1 %v10376_v55  ;;  %9655 = vmatpush3.bf16.msra.mxu0 %v10377_v30  ;;  %v10400_v55 = vld [vmem:[%s12957_s12 + $0x710] sm:$0xff]  }
0x1b03   :  { %9634 = vmatprep.subr.bf16.mxu1 %v10378_v56  ;;  %9656 = vmatprep.subr.bf16.mxu0 %v10379_v32  ;;  %v10401_v30 = vld [vmem:[%s12957_s12 + $0x790] sm:$0xff]   ;;  %v10402_v56 = vld [vmem:[%s12957_s12 + $0x758] sm:$0xff]  }
0x1b04   :  { %v10403_v32 = vld [vmem:[%s12957_s12 + $0x7d8] sm:$0xff]  }
0x1b06   :  { %v6413_v7 = vpop.f32.mrb[72].mxu1  ;;  %v6456_v8 = vpop.f32.mrb[72].mxu0  ;;  %9635 = vmatpush3.bf16.msra.mxu1 %v10380_v59  ;;  %9657 = vmatpush3.bf16.msra.mxu0 %v10381_v60  ;;  %v10404_v59 = vld [vmem:[%s12957_s12 + $0x718] sm:$0xff]  }
0x1b07   :  { %v6414_v58 = vadd.f32 %v6413_v7, %v5522_v61  ;;  %v6457_v9 = vadd.f32 %v6456_v8, %v5530_v26  ;;  %v6415_v52 = vpop.f32.mrb[73].mxu1  ;;  %v6458_v2 = vpop.f32.mrb[73].mxu0  ;;  %9636 = vmatprep.subr.bf16.mxu1 %v10382_v49  ;;  %9658 = vmatprep.subr.bf16.mxu0 %v10383_v62  ;;  %v10405_v60 = vld [vmem:[%s12957_s12 + $0x798] sm:$0xff]   ;;  %v10408_v49 = vld [vmem:[%s12957_s12 + $0x720] sm:$0xff]   ;;  %v10412_v7 = vld [vmem:[%s12957_s12 + $0x728] sm:$0xff]  }
0x1b08   :  { %v6416_v10 = vadd.f32 %v6415_v52, %v5526_v63  ;;  %v6459_v12 = vadd.f32 %v6458_v2, %v5534_v6  ;;  %v6417_v40 = vpop.f32.mrb[74].mxu1  ;;  %v6460_v37 = vpop.f32.mrb[74].mxu0  ;;  %v10409_v62 = vld [vmem:[%s12957_s12 + $0x7a0] sm:$0xff]   ;;  %v10413_v8 = vld [vmem:[%s12957_s12 + $0x7a8] sm:$0xff]   ;;  %v5542_v52 = vrot.slane %v12747_v57, %v11528_v19  ;;  %v5550_v2 = vrot.slane %v12747_v57, %v11531_v20  ;;  %v10418_v19 = vld [vmem:[%s12957_s12 + $0x778] sm:$0xff]  }
0x1b09   :  { %v6418_v15 = vadd.f32 %v6417_v40, %v5522_v61  ;;  %v6461_v22 = vadd.f32 %v6460_v37, %v5530_v26  ;;  %v6419_v23 = vpop.f32.mrb[75].mxu1  ;;  %v6462_v38 = vpop.f32.mrb[75].mxu0  ;;  %v6559_v27 = vmax.f32 %v6414_v58, 0.0  ;;  %v6561_v33 = vmax.f32 %v6457_v9, 0.0  ;;  %v10406_v61 = vld [vmem:[%s12957_s12 + $0x760] sm:$0xff]   ;;  %v10414_v58 = vld [vmem:[%s12957_s12 + $0x770] sm:$0xff]  }
0x1b0a   :  { %v6420_v39 = vadd.f32 %v6419_v23, %v5526_v63  ;;  %v6463_v42 = vadd.f32 %v6462_v38, %v5534_v6  ;;  %9637 = vmatpush3.bf16.msra.mxu1 %v10384_v43  ;;  %9659 = vmatpush3.bf16.msra.mxu0 %v10385_v45  ;;  %v6560_v36 = vmax.f32 %v6416_v10, 0.0  ;;  %v6562_v4 = vmax.f32 %v6459_v12, 0.0  ;;  %v10407_v26 = vld [vmem:[%s12957_s12 + $0x7e0] sm:$0xff]   ;;  %v10410_v63 = vld [vmem:[%s12957_s12 + $0x768] sm:$0xff]   ;;  %v10415_v9 = vld [vmem:[%s12957_s12 + $0x7f0] sm:$0xff]  }
0x1b0b   :  { %v6575_v29 = vmax.f32 %v6418_v15, 0.0  ;;  %v6577_v34 = vmax.f32 %v6461_v22, 0.0  ;;  %9638 = vmatprep.subr.bf16.mxu1 %v10386_v46  ;;  %9660 = vmatprep.subr.bf16.mxu0 %v10387_v14  ;;  %v10411_v6 = vld [vmem:[%s12957_s12 + $0x7e8] sm:$0xff]   ;;  %v5538_v43 = vrot.slane %v12747_v57, %v11522_v16  ;;  %v5546_v45 = vrot.slane %v12747_v57, %v11525_v17  ;;  %v10416_v16 = vld [vmem:[%s12957_s12 + $0x730] sm:$0xff]   ;;  %v10419_v20 = vld [vmem:[%s12957_s12 + $0x7f8] sm:$0xff]  }
0x1b0c   :  { %v6576_v44 = vmax.f32 %v6420_v39, 0.0  ;;  %v6578_v18 = vmax.f32 %v6463_v42, 0.0  ;;  %v10417_v17 = vld [vmem:[%s12957_s12 + $0x7b0] sm:$0xff]  }
0x1b0d   :  { %v6591_v28 = vpack.c.bf16 %v6575_v29, %v6559_v27  ;;  %v6593_v47 = vpack.c.bf16 %v6577_v34, %v6561_v33  ;;  %v10420_v33 = vld [vmem:[%s12957_s12 + $0x738] sm:$0xff]  }
0x1b0e   :  { %v6592_v31 = vpack.c.bf16 %v6576_v44, %v6560_v36  ;;  %v6594_v48 = vpack.c.bf16 %v6578_v18, %v6562_v4  ;;  %9639 = vmatpush3.bf16.msra.mxu1 %v10388_v24  ;;  %9661 = vmatpush3.bf16.msra.mxu0 %v10389_v25  ;;  %v10421_v29 = vld [vmem:[%s12957_s12 + $0x7b8] sm:$0xff]  }
0x1b0f   :  { %9668 = vmatprep.subr.bf16.mxu1 %v10390_v35  ;;  %9690 = vmatprep.subr.bf16.mxu0 %v10391_v1 }
0x1b10   :  { %7828 = vmatprep.mubr.bf16.mxu1 %v6592_v31  ;;  %7869 = vmatprep.mubr.bf16.mxu0 %v6594_v48 }
0x1b11   :  { %7829 = vmatmul.mubr.bf16.vlgmr.msra.gmra.mrb[88].mxu1 %v6591_v28  ;;  %7870 = vmatmul.mubr.bf16.vlgmr.msra.gmra.mrb[88].mxu0 %v6593_v47 }
0x1b12   :  { %9669 = vmatpush3.bf16.msra.mxu1 %v10392_v3  ;;  %9691 = vmatpush3.bf16.msra.mxu0 %v10393_v11 }
0x1b13   :  { %9670 = vmatprep.subr.bf16.mxu1 %v10394_v50  ;;  %9692 = vmatprep.subr.bf16.mxu0 %v10395_v51  ;;  %v9114_v51 = vld [vmem:[%s12961_s13 + $0x1] ss:$0 sm:$0xff] }
0x1b16   :  { %9671 = vmatpush3.bf16.msra.mxu1 %v10396_v53  ;;  %9693 = vmatpush3.bf16.msra.mxu0 %v10397_v5 }
0x1b17   :  { %9672 = vmatprep.subr.bf16.mxu1 %v10398_v41  ;;  %9694 = vmatprep.subr.bf16.mxu0 %v10399_v54 }
0x1b1a   :  { %9673 = vmatpush3.bf16.msra.mxu1 %v10400_v55  ;;  %9695 = vmatpush3.bf16.msra.mxu0 %v10401_v30 }
0x1b1b   :  { %9674 = vmatprep.subr.bf16.mxu1 %v10402_v56  ;;  %9696 = vmatprep.subr.bf16.mxu0 %v10403_v32 }
0x1b1e   :  { %9675 = vmatpush3.bf16.msra.mxu1 %v10404_v59  ;;  %9697 = vmatpush3.bf16.msra.mxu0 %v10405_v60 }
0x1b1f   :  { %9676 = vmatprep.subr.bf16.mxu1 %v10406_v61  ;;  %9698 = vmatprep.subr.bf16.mxu0 %v10407_v26 }
0x1b22   :  { %9677 = vmatpush3.bf16.msra.mxu1 %v10408_v49  ;;  %9699 = vmatpush3.bf16.msra.mxu0 %v10409_v62 }
0x1b23   :  { %9678 = vmatprep.subr.bf16.mxu1 %v10410_v63  ;;  %9700 = vmatprep.subr.bf16.mxu0 %v10411_v6 }
0x1b26   :  { %v6499_v46 = vpop.f32.mrb[76].mxu1  ;;  %v6542_v14 = vpop.f32.mrb[76].mxu0  ;;  %9679 = vmatpush3.bf16.msra.mxu1 %v10412_v7  ;;  %9701 = vmatpush3.bf16.msra.mxu0 %v10413_v8 }
0x1b27   :  { %v6500_v10 = vadd.f32 %v6499_v46, %v5538_v43  ;;  %v6543_v12 = vadd.f32 %v6542_v14, %v5546_v45  ;;  %v6501_v40 = vpop.f32.mrb[77].mxu1  ;;  %v6544_v37 = vpop.f32.mrb[77].mxu0  ;;  %9680 = vmatprep.subr.bf16.mxu1 %v10414_v58  ;;  %9702 = vmatprep.subr.bf16.mxu0 %v10415_v9 }
0x1b28   :  { %v6502_v57 = vadd.f32 %v6501_v40, %v5542_v52  ;;  %v6545_v15 = vadd.f32 %v6544_v37, %v5550_v2  ;;  %v6503_v22 = vpop.f32.mrb[78].mxu1  ;;  %v6546_v23 = vpop.f32.mrb[78].mxu0 }
0x1b29   :  { %v6504_v38 = vadd.f32 %v6503_v22, %v5538_v43  ;;  %v6547_v39 = vadd.f32 %v6546_v23, %v5546_v45  ;;  %v6505_v42 = vpop.f32.mrb[79].mxu1  ;;  %v6548_v24 = vpop.f32.mrb[79].mxu0  ;;  %v6563_v34 = vmax.f32 %v6500_v10, 0.0  ;;  %v6565_v35 = vmax.f32 %v6543_v12, 0.0 }
0x1b2a   :  { %v6506_v25 = vadd.f32 %v6505_v42, %v5542_v52  ;;  %v6549_v27 = vadd.f32 %v6548_v24, %v5550_v2  ;;  %9681 = vmatpush3.bf16.msra.mxu1 %v10416_v16  ;;  %9703 = vmatpush3.bf16.msra.mxu0 %v10417_v17  ;;  %v6564_v4 = vmax.f32 %v6502_v57, 0.0  ;;  %v6566_v44 = vmax.f32 %v6545_v15, 0.0 }
0x1b2b   :  { %v6579_v1 = vmax.f32 %v6504_v38, 0.0  ;;  %v6581_v36 = vmax.f32 %v6547_v39, 0.0  ;;  %9682 = vmatprep.subr.bf16.mxu1 %v10418_v19  ;;  %9704 = vmatprep.subr.bf16.mxu0 %v10419_v20 }
0x1b2c   :  { %v6580_v18 = vmax.f32 %v6506_v25, 0.0  ;;  %v6582_v28 = vmax.f32 %v6549_v27, 0.0 }
0x1b2d   :  { %v6595_v47 = vpack.c.bf16 %v6579_v1, %v6563_v34  ;;  %v6597_v31 = vpack.c.bf16 %v6581_v36, %v6565_v35 }
0x1b2e   :  { %v6596_v48 = vpack.c.bf16 %v6580_v18, %v6564_v4  ;;  %v6598_v3 = vpack.c.bf16 %v6582_v28, %v6566_v44  ;;  %9683 = vmatpush3.bf16.msra.mxu1 %v10420_v33  ;;  %9705 = vmatpush3.bf16.msra.mxu0 %v10421_v29 }
0x1b2f   :  { %9919 = vmatprep.subr.bf16.mxu1 %v10510_v0 }
0x1b30   :  { %7910 = vmatprep.mubr.bf16.mxu1 %v6596_v48  ;;  %7951 = vmatprep.mubr.bf16.mxu0 %v6598_v3 }
0x1b31   :  { %7911 = vmatmul.mubr.bf16.vlgmr.msra.gmra.mrb[92].mxu1 %v6595_v47  ;;  %7952 = vmatmul.mubr.bf16.vlgmr.msra.gmra.mrb[92].mxu0 %v6597_v31 }
0x1b32   :  { %9935 = vmatprep.mubr.msk.bf16.mxu1 %vm10511_vm0, %v10510_v0 }
0x1ba4   :  { %v9552_v11 = vpop.f32.mrb[80].mxu1  ;;  %v9574_v50 = vpop.f32.mrb[80].mxu0 }
0x1ba5   :  { %v9553_v53 = vpop.f32.mrb[81].mxu1  ;;  %v9575_v5 = vpop.f32.mrb[81].mxu0 }
0x1ba6   :  { %v9554_v41 = vadd.f32 %v9553_v53, %v9552_v11  ;;  %v9576_v54 = vadd.f32 %v9575_v5, %v9574_v50  ;;  %v9555_v55 = vpop.f32.mrb[82].mxu1  ;;  %v9577_v30 = vpop.f32.mrb[82].mxu0 }
0x1ba7   :  { %v9556_v56 = vpop.f32.mrb[83].mxu1  ;;  %v9578_v32 = vpop.f32.mrb[83].mxu0 }
0x1ba8   :  { %v7667_v59 = vadd.f32 %v9554_v41, %v9114_v51  ;;  %v9557_v60 = vadd.f32 %v9556_v56, %v9555_v55  ;;  %v9579_v61 = vadd.f32 %v9578_v32, %v9577_v30 }
0x1baa   :  { %v7708_v26 = vadd.f32 %v9576_v54, %v7667_v59  ;;  %v7670_v49 = vadd.f32 %v9557_v60, %v9114_v51 }
0x1bac   :  { %v7711_v62 = vadd.f32 %v9579_v61, %v7670_v49  ;;  %v10425_v49 = vld [vmem:[%s12964_s16 + $0x18] sm:$0xff]  }
0x1bc4   :  { %v9596_v63 = vpop.f32.mrb[84].mxu1  ;;  %v9618_v6 = vpop.f32.mrb[84].mxu0 }
0x1bc5   :  { %v9597_v7 = vpop.f32.mrb[85].mxu1  ;;  %v9619_v8 = vpop.f32.mrb[85].mxu0 }
0x1bc6   :  { %v9598_v43 = vadd.f32 %v9597_v7, %v9596_v63  ;;  %v9620_v45 = vadd.f32 %v9619_v8, %v9618_v6  ;;  %v9599_v58 = vpop.f32.mrb[86].mxu1  ;;  %v9621_v9 = vpop.f32.mrb[86].mxu0  ;;  %v10427_v63 = vld [vmem:[%s12964_s16 + $0x28] sm:$0xff]   ;;  %v10428_v6 = vld [vmem:[%s12964_s16 + $0x30] sm:$0xff]   ;;  %v10429_v7 = vld [vmem:[%s12964_s16 + $0x38] sm:$0xff]  }
0x1bc7   :  { %v9600_v52 = vpop.f32.mrb[87].mxu1  ;;  %v9622_v2 = vpop.f32.mrb[87].mxu0 }
0x1bc8   :  { %v7749_v46 = vadd.f32 %v9598_v43, %v7708_v26  ;;  %v9601_v14 = vadd.f32 %v9600_v52, %v9599_v58  ;;  %v9623_v16 = vadd.f32 %v9622_v2, %v9621_v9  ;;  %v10422_v26 = vld [vmem:[%s12964_s16] sm:$0xff]  }
0x1bc9   :  { %9920 = vmatpush3.bf16.msra.mxu1 %v10422_v26 }
0x1bca   :  { %v7790_v17 = vadd.f32 %v9620_v45, %v7749_v46  ;;  %v7752_v10 = vadd.f32 %v9601_v14, %v7711_v62  ;;  %9921 = vmatprep.subr.bf16.mxu1 %v10510_v0  ;;  %v10426_v62 = vld [vmem:[%s12964_s16 + $0x20] sm:$0xff]  }
0x1bcb   :  { %v9245_v46 = vld [vmem:[%s12962_s14 + $0x1] ss:$0 sm:$0xff] }
0x1bcc   :  { %v7793_v12 = vadd.f32 %v9623_v16, %v7752_v10 }
0x1be4   :  { %v9640_v40 = vpop.f32.mrb[88].mxu1  ;;  %v9662_v37 = vpop.f32.mrb[88].mxu0 }
0x1be5   :  { %v9641_v19 = vpop.f32.mrb[89].mxu1  ;;  %v9663_v20 = vpop.f32.mrb[89].mxu0 }
0x1be6   :  { %v9642_v57 = vadd.f32 %v9641_v19, %v9640_v40  ;;  %v9664_v15 = vadd.f32 %v9663_v20, %v9662_v37  ;;  %v9643_v22 = vpop.f32.mrb[90].mxu1  ;;  %v9665_v23 = vpop.f32.mrb[90].mxu0 }
0x1be7   :  { %v9644_v38 = vpop.f32.mrb[91].mxu1  ;;  %v9666_v39 = vpop.f32.mrb[91].mxu0 }
0x1be8   :  { %v7831_v42 = vadd.f32 %v9642_v57, %v7790_v17  ;;  %v9645_v24 = vadd.f32 %v9644_v38, %v9643_v22  ;;  %v9667_v25 = vadd.f32 %v9666_v39, %v9665_v23 }
0x1bea   :  { %v7872_v27 = vadd.f32 %v9664_v15, %v7831_v42  ;;  %v7834_v33 = vadd.f32 %v9645_v24, %v7793_v12 }
0x1bec   :  { %v7875_v29 = vadd.f32 %v9667_v25, %v7834_v33 }
0x1c04   :  { %v9684_v34 = vpop.f32.mrb[92].mxu1  ;;  %v9706_v35 = vpop.f32.mrb[92].mxu0 }
0x1c05   :  { %v9685_v1 = vpop.f32.mrb[93].mxu1  ;;  %v9707_v36 = vpop.f32.mrb[93].mxu0 }
0x1c06   :  { %v9686_v4 = vadd.f32 %v9685_v1, %v9684_v34  ;;  %v9708_v44 = vadd.f32 %v9707_v36, %v9706_v35  ;;  %v9687_v18 = vpop.f32.mrb[94].mxu1  ;;  %v9709_v28 = vpop.f32.mrb[94].mxu0 }
0x1c07   :  { %v9688_v47 = vpop.f32.mrb[95].mxu1  ;;  %v9710_v31 = vpop.f32.mrb[95].mxu0 }
0x1c08   :  { %v7913_v48 = vadd.f32 %v9686_v4, %v7872_v27  ;;  %v9689_v3 = vadd.f32 %v9688_v47, %v9687_v18  ;;  %v9711_v11 = vadd.f32 %v9710_v31, %v9709_v28  ;;  %v25_v18 = vstv %s12965_s19  ;;  %v9247_v28 = vld [vmem:[%s12966_s17] ss:$0 sm:$0xff] }
0x1c09   :  { %26 = vst [vmem:[#allocation3] sm:$0x1] %v25_v18 }
0x1c0a   :  { %v7954_v50 = vadd.f32 %v9708_v44, %v7913_v48  ;;  %v7916_v51 = vadd.f32 %v9689_v3, %v7875_v29 }
0x1c0c   :  { %v7957_v53 = vadd.f32 %v9711_v11, %v7916_v51  ;;  %v7960_v5 = vadd.f32 %v7954_v50, %v12179_v13  ;;  %v10423_v13 = vld [vmem:[%s12964_s16 + $0x8] sm:$0xff]   ;;  %v9256_v11 = vld [vmem:[%s12967_s18] ss:$0 sm:$0xff] }
0x1c0d   :  { %9922 = vmatpush3.bf16.msra.mxu1 %v10423_v13 }
0x1c0e   :  { %7966 = vadd.xlane.f32.xlu1 %v7960_v5  ;;  %v7961_v41 = vadd.f32 %v7957_v53, %v12181_v21  ;;  %9923 = vmatprep.subr.bf16.mxu1 %v10510_v0  ;;  %v10424_v21 = vld [vmem:[%s12964_s16 + $0x10] sm:$0xff]  }
0x1c10   :  { %7968 = vadd.xlane.f32.xlu0 %v7961_v41 }
0x1c11   :  { %9924 = vmatpush3.bf16.msra.mxu1 %v10424_v21 }
0x1c12   :  { %9925 = vmatprep.subr.bf16.mxu1 %v10510_v0 }
0x1c15   :  { %9926 = vmatpush3.bf16.msra.mxu1 %v10425_v49 }
0x1c16   :  { %9927 = vmatprep.subr.bf16.mxu1 %v10510_v0 }
0x1c19   :  { %9928 = vmatpush3.bf16.msra.mxu1 %v10426_v62 }
0x1c1a   :  { %9929 = vmatprep.subr.bf16.mxu1 %v10510_v0 }
0x1c1d   :  { %9930 = vmatpush3.bf16.msra.mxu1 %v10427_v63 }
0x1c1e   :  { %9931 = vmatprep.subr.bf16.mxu1 %v10510_v0 }
0x1c21   :  { %9932 = vmatpush3.bf16.msra.mxu1 %v10428_v6 }
0x1c22   :  { %9933 = vmatprep.subr.bf16.mxu1 %v10510_v0  ;;  %v9246_v0 = vld [vmem:[%s12963_s15 + $0x1] ss:$0 sm:$0xff] }
0x1c25   :  { %9934 = vmatpush3.bf16.msra.mxu1 %v10429_v7 }
0x1c9b   :  { %v7967_v54 = vpop.xlane.xlu1 %7966 }
0x1c9c   :  { %v7970_v55 = vmul.f32 0.0078125, %v7967_v54 }
0x1c9d   :  { %v7969_v30 = vpop.xlane.xlu0 %7968 }
0x1c9e   :  { %v7972_v56 = vsub.f32 %v7960_v5, %v7970_v55  ;;  %v7971_v32 = vmul.f32 0.0078125, %v7969_v30 }
0x1ca0   :  { %v7973_v59 = vsub.f32 %v7961_v41, %v7971_v32  ;;  %v7974_v60 = vmul.f32 %v7972_v56, %v7972_v56  ;;  %v9257_v41 = vld [vmem:[#allocation3] ss:$0 sm:$0xff] }
0x1ca2   :  { %7976 = vadd.xlane.f32.xlu1 %v7974_v60  ;;  %v7975_v61 = vmul.f32 %v7973_v59, %v7973_v59 }
0x1ca4   :  { %7978 = vadd.xlane.f32.xlu0 %v7975_v61 }
0x1d2f   :  { %v7977_v8 = vpop.xlane.xlu1 %7976 }
0x1d30   :  { %v7980_v43 = vmul.f32 0.0078125, %v7977_v8 }
0x1d31   :  { %v7979_v45 = vpop.xlane.xlu0 %7978 }
0x1d32   :  { %v7982_v58 = vadd.f32 1e-05, %v7980_v43  ;;  %v7981_v9 = vmul.f32 0.0078125, %v7979_v45 }
0x1d34   :  { %10506 = vrsqrt.f32 %v7982_v58  ;;  %v7983_v52 = vadd.f32 1e-05, %v7981_v9 }
0x1d36   :  { %10508 = vrsqrt.f32 %v7983_v52 }
0x1d3e   :  { %v10507_v2 = vpop.eup %10506 }
0x1d3f   :  { %v7986_v14 = vmul.f32 %v10507_v2, %v7972_v56 }
0x1d40   :  { %v10509_v16 = vpop.eup %10508 }
0x1d41   :  { %v7994_v17 = vmul.f32 %v9245_v46, %v7986_v14  ;;  %v7987_v10 = vmul.f32 %v10509_v16, %v7973_v59 }
0x1d43   :  { %v8002_v12 = vadd.f32 %v9246_v0, %v7994_v17  ;;  %v7995_v40 = vmul.f32 %v9245_v46, %v7987_v10 }
0x1d45   :  { %v8004_v37 = vrot.slane %v8002_v12, 4  ;;  %v8003_v19 = vadd.f32 %v9246_v0, %v7995_v40 }
0x1d47   :  { %v8010_v20 = vrot.slane %v8003_v19, 4  ;;  %v8005_v57 = vadd.f32 %v8004_v37, %v8002_v12 }
0x1d49   :  { %v8006_v15 = vrot.slane %v8005_v57, 2  ;;  %v8011_v22 = vadd.f32 %v8010_v20, %v8003_v19 }
0x1d4b   :  { %v8007_v23 = vadd.f32 %v8006_v15, %v8005_v57  ;;  %v8012_v38 = vrot.slane %v8011_v22, 2 }
0x1d4d   :  { %v8008_v39 = vrot.slane %v8007_v23, 1  ;;  %v8013_v42 = vadd.f32 %v8012_v38, %v8011_v22 }
0x1d4f   :  { %v8009_v24 = vadd.f32 %v8008_v39, %v8007_v23  ;;  %v8014_v25 = vrot.slane %v8013_v42, 1 }
0x1d51   :  { %v8015_v27 = vadd.f32 %v8014_v25, %v8013_v42  ;;  %v8017_v33 = vmul.f32 0.125, %v8009_v24 }
0x1d53   :  { %v8018_v29 = vmul.f32 0.125, %v8015_v27  ;;  %v8019_v34 = vpack.c.bf16 %v8017_v33, %v8017_v33 }
0x1d55   :  { %v8020_v35 = vpack.c.bf16 %v8018_v29, %v8018_v29  ;;  %v8046_v1 = vunpack.c.l.b16 %v8019_v34 }
0x1d57   :  { %v8047_v36 = vunpack.c.l.b16 %v8020_v35 }
0x1d59   :  { %v8049_v4 = vsel %vm8048_vm9, %v8047_v36, %v8046_v1 }
0x1d5a   :  { %v8050_v44 = vpack.c.b16 %v8049_v4, %v8049_v4 }
0x1d5c   :  { %9936 = vmatmul.mubr.bf16.vlgmr.msra.gmra.mrb[96].mxu1 %v8050_v44 }
0x1e2f   :  { %v8134_v47 = vpop.f32.mrb[96].mxu1 }
0x1e30   :  { %v8135_v31 = vadd.f32 %v9247_v28, %v8134_v47  ;;  %v9937_v48 = vpop.f32.mrb[97].mxu1 }
0x1e31   :  { %v8137_v3 = vpop.f32.mrb[98].mxu1 }
0x1e32   :  { %v8140_v50 = vmax.f32 %v8135_v31, 0.0  ;;  %v9938_v51 = vpop.f32.mrb[99].mxu1 }
0x1e34   :  { %v8148_v53 = vmul.f32 %v9256_v11, %v8140_v50 }
0x1e36   :  { %v8150_v5 = vsel %vm8149_vm10, %v8148_v53, 0.0 }
0x1e37   :  { %8151 = vadd.xlane.f32.xlu1 %v8150_v5 }
0x1ec4   :  { %v8152_v54 = vpop.xlane.xlu1 %8151 }
0x1ec5   :  { %v8160_v55 = vadd.f32 %v9257_v41, %v8152_v54 }
0x1ec7   :  { %8162 = vst.msk [vmem:[%s12968_s20] sm:$0x3] %vm8161_vm11, %v8160_v55 }

</bundles_post_ra>
